<compile_context>
chip_gen: v7x
topology: tpu7x:2x2x1
jax: 0.10.0
libtpu: 0.0.40
codegen_flags: <defaults>
</compile_context>

<pallas_src>
import jax
import jax.numpy as jnp
from jax import lax
from jax.experimental import pallas as pl
from jax.experimental.pallas import tpu as pltpu

# ----------------------------- configuration -------------------------------
N = 2                       # batch
STUDENT_DIMS = 32           # student channels (conv3x3 in/out)
TEACHER_DIMS = 64           # teacher channels / attention embed dims
H, W = 8, 8                 # hw_dims
HW = H * W
POS_DIMS = TEACHER_DIMS     # pos_dims (query linear input dims)
NUM_HEADS = 8
HEAD_DIM = TEACHER_DIMS // NUM_HEADS
SOFTMAX_SCALE = 1.0
BN_EPS = 1e-5
LN_EPS = 1e-5
FFN_HIDDEN = 4 * TEACHER_DIMS
K_IM2COL = 9 * STUDENT_DIMS

ROWS = N * HW               # 128 rows: batch folded into the row dimension
HEAD_CHUNK = 2              # heads per softmax chunk (bounds vreg live range)
N_CHUNKS = NUM_HEADS // HEAD_CHUNK

# slab row offsets
QK_OFF = K_IM2COL                       # slab32: [0,288) conv weight | [288,800) qk per head
W2_OFF = NUM_HEADS * STUDENT_DIMS       # slab64: [0,256) wvo per head | [256,512) ffn_w2
POS_ROW = 8                             # bias slab: rows 0..4 biases/LN, rows 8..135 pos (replicated)
BIAS_ROWS = POS_ROW + ROWS              # 136


# ------------------------------- fused kernel -------------------------------
def _fused_kernel(patch_ref, slab32_ref, slab64_ref, w1_ref, bias_ref, b1_ref, o_ref):
    f32, bf16 = jnp.float32, jnp.bfloat16

    head = bias_ref[0:8, :]                                   # one small f32 read
    bc = head[0:1, 0:STUDENT_DIMS]                            # conv bias (BN folded)
    bo = head[1:2, :]                                         # attn out bias (+ bv @ wo)
    ln_g = head[2:3, :]
    ln_b = head[3:4, :]
    b2 = head[4:5, :]
    pos = bias_ref[POS_ROW:POS_ROW + ROWS, 0:STUDENT_DIMS]    # pos_embed, replicated per batch

    # --- 1) proj_student: 3x3 conv (im2col, all N*HW rows) + folded BN + ReLU + pos_embed ---
    s = jnp.dot(patch_ref[...], slab32_ref[0:K_IM2COL, :],
                preferred_element_type=f32)                   # (ROWS, Cs)
    s = jnp.maximum(s + bc, 0.0) + pos                        # f32
    s_bf = s.astype(bf16)

    # --- 2/3) 8-head cross attention. Q·Wk^T ("qk") and Wv·Wo ("wvo") are pre-folded per head
    #          in the wrapper, so every matmul here is K>=32 with 64-wide lanes. ---
    attn_parts = []
    for b in range(N):                                        # static, N=2
        s_b = s_bf[b * HW:(b + 1) * HW, :]                    # (HW, Cs) bf16
        acc = jnp.zeros((HW, TEACHER_DIMS), f32)
        for c in range(N_CHUNKS):                             # heads in chunks of HEAD_CHUNK
            r0 = QK_OFF + c * HEAD_CHUNK * HW
            qk_c = slab32_ref[r0:r0 + HEAD_CHUNK * HW, :]     # (CH*HW, Cs) bf16
            sc = lax.dot_general(qk_c, s_b, (((1,), (1,)), ((), ())),
                                 preferred_element_type=f32)  # (CH*HW, HW) scores
            m = jnp.max(sc, axis=-1, keepdims=True)
            e = jnp.exp(sc - m)
            p = (e * pl.reciprocal(jnp.sum(e, axis=-1, keepdims=True),
                                   approx=True)).astype(bf16)  # softmax (chunk only)
            for hl in range(HEAD_CHUNK):
                hd = c * HEAD_CHUNK + hl
                wvo_h = slab64_ref[hd * STUDENT_DIMS:(hd + 1) * STUDENT_DIMS, :]   # (Cs, Td)
                vo_h = jnp.dot(s_b, wvo_h, preferred_element_type=f32)             # (HW, Td)
                p_h = p[hl * HW:(hl + 1) * HW, :]                                  # (HW, HW)
                acc = acc + jnp.dot(p_h, vo_h.astype(bf16), preferred_element_type=f32)
        attn_parts.append(acc)
    attn = jnp.concatenate(attn_parts, axis=0) + bo           # (ROWS, Td)

    # --- 4) LayerNorm([Td]) + FFN (mmcv defaults), merged over batch (M=128 matmuls) ---
    mu = jnp.mean(attn, axis=-1, keepdims=True)
    var = jnp.mean(jnp.square(attn - mu), axis=-1, keepdims=True)
    y = (attn - mu) * lax.rsqrt(var + LN_EPS) * ln_g + ln_b
    h1 = jnp.dot(y.astype(bf16), w1_ref[...], preferred_element_type=f32) + b1_ref[...]
    h1 = jnp.maximum(h1, 0.0)                                 # ReLU (mmcv default)
    o = jnp.dot(h1.astype(bf16), slab64_ref[W2_OFF:W2_OFF + FFN_HIDDEN, :],
                preferred_element_type=f32) + b2
    o_ref[...] = y + o                                        # FFN residual (identity = LN output)


# ------------------------------ wrapper / glue -------------------------------
def _prepare_inputs(x_nchw, params):
    f32, bf16 = jnp.float32, jnp.bfloat16

    # im2col of the padded NHWC input: tap ordering (dy, dx, ci) matches the weight reshape below.
    x_nhwc = jnp.transpose(x_nchw, (0, 2, 3, 1))
    xp = jnp.pad(x_nhwc, ((0, 0), (1, 1), (1, 1), (0, 0)))
    taps = [xp[:, dy:dy + H, dx:dx + W, :] for dy in range(3) for dx in range(3)]
    patches = jnp.concatenate(taps, axis=-1).reshape(ROWS, K_IM2COL).astype(bf16)

    # Fold BatchNorm2d (eval, running stats) into the conv weight / bias.
    bn_scale = params["bn_gamma"] * lax.rsqrt(params["bn_var"] + BN_EPS)
    bn_shift = params["bn_beta"] - params["bn_mean"] * bn_scale
    w_conv = jnp.transpose(params["conv_s_w"], (2, 3, 1, 0)).reshape(K_IM2COL, STUDENT_DIMS)
    w_conv = w_conv * bn_scale[None, :]
    b_conv = params["conv_s_b"] * bn_scale + bn_shift

    pos_flat = jnp.transpose(params["pos_embed"][0], (1, 2, 0)).reshape(HW, STUDENT_DIMS)
    pos_rep = jnp.tile(pos_flat, (N, 1))                                   # (ROWS, Cs)

    # Batch-invariant self-query branch: Embedding -> 1x1 conv -> ReLU -> Q linear (scale folded).
    w1x1 = params["conv_p_w"][:, :, 0, 0].T                                # (Cin, Cout)
    pos_emb = jnp.maximum(params["query_w"] @ w1x1 + params["conv_p_b"][None, :], 0.0)
    scale = (HEAD_DIM ** -0.5) * SOFTMAX_SCALE
    q = (pos_emb @ params["wq"] + params["bq"][None, :]) * scale           # (HW, Td)

    # Fold Wk^T into Q per head: qk[h,q,c] = sum_d q[q,h*hd+d] * wk[c,h*hd+d].
    q3 = q.reshape(HW, NUM_HEADS, HEAD_DIM)
    wk3 = params["wk"].reshape(STUDENT_DIMS, NUM_HEADS, HEAD_DIM)
    qk = jnp.einsum("qhd,chd->hqc", q3, wk3).reshape(NUM_HEADS * HW, STUDENT_DIMS)

    # Fold Wo into Wv per head; V bias folded into output bias; K bias dropped (softmax-invariant).
    wv3 = params["wv"].reshape(STUDENT_DIMS, NUM_HEADS, HEAD_DIM)
    wo3 = params["wo"].reshape(NUM_HEADS, HEAD_DIM, TEACHER_DIMS)
    wvo = jnp.einsum("chd,hde->hce", wv3, wo3).reshape(NUM_HEADS * STUDENT_DIMS, TEACHER_DIMS)
    bo_eff = params["bo"] + params["bv"] @ params["wo"]

    # Pack operands into a few slabs (one DMA descriptor each).
    slab32 = jnp.concatenate([w_conv, qk], axis=0).astype(bf16)             # (800, 32)
    slab64 = jnp.concatenate([wvo, params["ffn_w2"]], axis=0).astype(bf16)  # (512, 64)
    w1 = params["ffn_w1"].astype(bf16)                                       # (64, 256)

    bias64 = jnp.zeros((BIAS_ROWS, TEACHER_DIMS), f32)
    bias64 = bias64.at[0, 0:STUDENT_DIMS].set(b_conv)
    bias64 = bias64.at[1].set(bo_eff)
    bias64 = bias64.at[2].set(params["ln_g"])
    bias64 = bias64.at[3].set(params["ln_b"])
    bias64 = bias64.at[4].set(params["ffn_b2"])
    bias64 = bias64.at[POS_ROW:, 0:STUDENT_DIMS].set(pos_rep)
    b1 = params["ffn_b1"][None, :].astype(f32)                               # (1, 256)

    return patches, slab32, slab64, w1, bias64, b1


def attention_projector_forward(x_nchw, params):
    """x_nchw: (N, student_dims, H, W) float32. Returns (N, H*W, teacher_dims) float32."""
    args = _prepare_inputs(x_nchw, params)

    out = pl.pallas_call(
        _fused_kernel,
        out_shape=jax.ShapeDtypeStruct((ROWS, TEACHER_DIMS), jnp.float32),
        grid=(1,),  # whole problem in one step; on v7x a grid=(N,) 2-TC split may be benchmarked
        in_specs=[
            pl.BlockSpec((ROWS, K_IM2COL), lambda i: (0, 0)),                 # im2col patches
            pl.BlockSpec((K_IM2COL + NUM_HEADS * HW, STUDENT_DIMS),
                         lambda i: (0, 0)),                                   # conv w | qk slab
            pl.BlockSpec((NUM_HEADS * STUDENT_DIMS + FFN_HIDDEN, TEACHER_DIMS),
                         lambda i: (0, 0)),                                   # wvo | ffn_w2 slab
            pl.BlockSpec((TEACHER_DIMS, FFN_HIDDEN), lambda i: (0, 0)),       # ffn_w1
            pl.BlockSpec((BIAS_ROWS, TEACHER_DIMS), lambda i: (0, 0)),        # biases / LN / pos
            pl.BlockSpec((1, FFN_HIDDEN), lambda i: (0, 0)),                  # ffn_b1
        ],
        out_specs=pl.BlockSpec((ROWS, TEACHER_DIMS), lambda i: (0, 0)),
        compiler_params=pltpu.CompilerParams(dimension_semantics=("arbitrary",)),
        cost_estimate=pl.CostEstimate(flops=28_000_000, transcendentals=66_000,
                                      bytes_accessed=292_000),
    )(*args)
    return out.reshape(N, HW, TEACHER_DIMS)


# --------------------------------- main -------------------------------------
if __name__ == "__main__":
    f32 = jnp.float32
    ks = jax.random.split(jax.random.PRNGKey(0), 24)

    params = {
        # proj_student: Conv2d(Cs, Cs, 3, padding=1) + BatchNorm2d(Cs)
        "conv_s_w": 0.05 * jax.random.normal(ks[0], (STUDENT_DIMS, STUDENT_DIMS, 3, 3), f32),
        "conv_s_b": 0.05 * jax.random.normal(ks[1], (STUDENT_DIMS,), f32),
        "bn_gamma": 1.0 + 0.05 * jax.random.normal(ks[2], (STUDENT_DIMS,), f32),
        "bn_beta": 0.05 * jax.random.normal(ks[3], (STUDENT_DIMS,), f32),
        "bn_mean": 0.05 * jax.random.normal(ks[4], (STUDENT_DIMS,), f32),
        "bn_var": 1.0 + 0.1 * jnp.abs(jax.random.normal(ks[5], (STUDENT_DIMS,), f32)),
        # pos_embed ~ trunc_normal(std=0.02)
        "pos_embed": 0.02 * jax.random.normal(ks[6], (1, STUDENT_DIMS, H, W), f32),
        # proj_pos: Conv2d(Td, Td, 1)
        "conv_p_w": 0.05 * jax.random.normal(ks[7], (TEACHER_DIMS, TEACHER_DIMS, 1, 1), f32),
        "conv_p_b": 0.05 * jax.random.normal(ks[8], (TEACHER_DIMS,), f32),
        # self-query: nn.Embedding(H*W, Td)
        "query_w": 0.02 * jax.random.normal(ks[9], (HW, TEACHER_DIMS), f32),
        # pos_attention: q Linear(pos_dims, Td); k/v Linear(Cs, Td); proj Linear(Td, Td)
        "wq": 0.05 * jax.random.normal(ks[10], (POS_DIMS, TEACHER_DIMS), f32),
        "bq": 0.05 * jax.random.normal(ks[11], (TEACHER_DIMS,), f32),
        "wk": 0.05 * jax.random.normal(ks[12], (STUDENT_DIMS, TEACHER_DIMS), f32),
        "bk": 0.05 * jax.random.normal(ks[13], (TEACHER_DIMS,), f32),   # unused: softmax-invariant
        "wv": 0.05 * jax.random.normal(ks[14], (STUDENT_DIMS, TEACHER_DIMS), f32),
        "bv": 0.05 * jax.random.normal(ks[15], (TEACHER_DIMS,), f32),
        "wo": 0.05 * jax.random.normal(ks[16], (TEACHER_DIMS, TEACHER_DIMS), f32),
        "bo": 0.05 * jax.random.normal(ks[17], (TEACHER_DIMS,), f32),
        # LayerNorm([Td]) + FFN(Td -> 4*Td -> Td)
        "ln_g": jnp.ones((TEACHER_DIMS,), f32),
        "ln_b": jnp.zeros((TEACHER_DIMS,), f32),
        "ffn_w1": 0.05 * jax.random.normal(ks[18], (TEACHER_DIMS, FFN_HIDDEN), f32),
        "ffn_b1": 0.05 * jax.random.normal(ks[19], (FFN_HIDDEN,), f32),
        "ffn_w2": 0.05 * jax.random.normal(ks[20], (FFN_HIDDEN, TEACHER_DIMS), f32),
        "ffn_b2": 0.05 * jax.random.normal(ks[21], (TEACHER_DIMS,), f32),
    }

    x = jax.random.normal(ks[22], (N, STUDENT_DIMS, H, W), f32)   # NCHW, as in PyTorch

    fwd = jax.jit(attention_projector_forward)
    out = fwd(x, params)
    out = jax.block_until_ready(out)

    assert out.shape == (N, HW, TEACHER_DIMS), out.shape
    assert bool(jnp.all(jnp.isfinite(out)))
    print("KERNEL_OK")
</pallas_src>

<mosaic_0001>
module attributes {stable_mosaic.version = 11 : i64} {
  func.func @_fused_kernel(%arg0: i32, %arg1: memref<128x288xbf16, #tpu.memory_space<vmem>>, %arg2: memref<800x32xbf16, #tpu.memory_space<vmem>>, %arg3: memref<512x64xbf16, #tpu.memory_space<vmem>>, %arg4: memref<64x256xbf16, #tpu.memory_space<vmem>>, %arg5: memref<136x64xf32, #tpu.memory_space<vmem>>, %arg6: memref<1x256xf32, #tpu.memory_space<vmem>>, %arg7: memref<128x64xf32, #tpu.memory_space<vmem>>) attributes {dimension_semantics = [#tpu.dimension_semantics<arbitrary>], iteration_bounds = array<i64: 1>, scalar_prefetch = 0 : i64, scratch_operands = 0 : i64, tpu.core_type = #tpu.core_type<tc>, window_params = [{pipeline_mode = #tpu.pipeline_mode<synchronous>, transform_indices = @transform_0, window_bounds = array<i64: 128, 288>}, {pipeline_mode = #tpu.pipeline_mode<synchronous>, transform_indices = @transform_1, window_bounds = array<i64: 800, 32>}, {pipeline_mode = #tpu.pipeline_mode<synchronous>, transform_indices = @transform_2, window_bounds = array<i64: 512, 64>}, {pipeline_mode = #tpu.pipeline_mode<synchronous>, transform_indices = @transform_3, window_bounds = array<i64: 64, 256>}, {pipeline_mode = #tpu.pipeline_mode<synchronous>, transform_indices = @transform_4, window_bounds = array<i64: 136, 64>}, {pipeline_mode = #tpu.pipeline_mode<synchronous>, transform_indices = @transform_5, window_bounds = array<i64: 1, 256>}, {pipeline_mode = #tpu.pipeline_mode<synchronous>, transform_indices = @transform_6, window_bounds = array<i64: 128, 64>}]} {
    %c0 = arith.constant 0 : index
    %c0_0 = arith.constant 0 : index
    %0 = vector.load %arg5[%c0, %c0_0] : memref<136x64xf32, #tpu.memory_space<vmem>>, vector<8x64xf32>
    %1 = vector.extract_strided_slice %0 {offsets = [0, 0], sizes = [1, 32], strides = [1, 1]} : vector<8x64xf32> to vector<1x32xf32>
    %2 = vector.extract_strided_slice %0 {offsets = [1, 0], sizes = [1, 64], strides = [1, 1]} : vector<8x64xf32> to vector<1x64xf32>
    %3 = vector.extract_strided_slice %0 {offsets = [2, 0], sizes = [1, 64], strides = [1, 1]} : vector<8x64xf32> to vector<1x64xf32>
    %4 = vector.extract_strided_slice %0 {offsets = [3, 0], sizes = [1, 64], strides = [1, 1]} : vector<8x64xf32> to vector<1x64xf32>
    %5 = vector.extract_strided_slice %0 {offsets = [4, 0], sizes = [1, 64], strides = [1, 1]} : vector<8x64xf32> to vector<1x64xf32>
    %c8 = arith.constant 8 : index
    %c0_1 = arith.constant 0 : index
    %6 = vector.load %arg5[%c8, %c0_1] : memref<136x64xf32, #tpu.memory_space<vmem>>, vector<128x32xf32>
    %c0_2 = arith.constant 0 : index
    %c0_3 = arith.constant 0 : index
    %7 = vector.load %arg1[%c0_2, %c0_3] : memref<128x288xbf16, #tpu.memory_space<vmem>>, vector<128x288xbf16>
    %c0_4 = arith.constant 0 : index
    %c0_5 = arith.constant 0 : index
    %8 = vector.load %arg2[%c0_4, %c0_5] : memref<800x32xbf16, #tpu.memory_space<vmem>>, vector<288x32xbf16>
    %cst = arith.constant dense<0.000000e+00> : vector<128x32xf32>
    %9 = tpu.matmul %7, %8, %cst {dimension_numbers = #tpu.dot_dimension_numbers<[1], [0], [0], [1], [0, 0, 1, 1], [], []>} : vector<128x288xbf16>, vector<288x32xbf16>, vector<128x32xf32> -> vector<128x32xf32>
    %10 = vector.broadcast %1 : vector<1x32xf32> to vector<128x32xf32>
    %11 = arith.addf %9, %10 : vector<128x32xf32>
    %cst_6 = arith.constant 0.000000e+00 : f32
    %12 = vector.broadcast %cst_6 : f32 to vector<128x32xf32>
    %13 = arith.maximumf %11, %12 : vector<128x32xf32>
    %14 = arith.addf %13, %6 : vector<128x32xf32>
    %15 = arith.truncf %14 : vector<128x32xf32> to vector<128x32xbf16>
    %16 = vector.extract_strided_slice %15 {offsets = [0, 0], sizes = [64, 32], strides = [1, 1]} : vector<128x32xbf16> to vector<64x32xbf16>
    %cst_7 = arith.constant 0.000000e+00 : f32
    %17 = vector.broadcast %cst_7 : f32 to vector<64x64xf32>
    %c288 = arith.constant 288 : index
    %c0_8 = arith.constant 0 : index
    %18 = vector.load %arg2[%c288, %c0_8] : memref<800x32xbf16, #tpu.memory_space<vmem>>, vector<128x32xbf16>
    %cst_9 = arith.constant dense<0.000000e+00> : vector<128x64xf32>
    %19 = tpu.matmul %18, %16, %cst_9 {dimension_numbers = #tpu.dot_dimension_numbers<[1], [1], [0], [0], [0, 0, 1, 0], [], []>} : vector<128x32xbf16>, vector<64x32xbf16>, vector<128x64xf32> -> vector<128x64xf32>
    %cst_10 = arith.constant dense<0xFF800000> : vector<128xf32>
    %20 = vector.multi_reduction <maximumf>, %19, %cst_10 [1] : vector<128x64xf32> to vector<128xf32>
    %21 = vector.shape_cast %20 : vector<128xf32> to vector<128x1xf32>
    %22 = vector.broadcast %21 : vector<128x1xf32> to vector<128x64xf32>
    %23 = arith.subf %19, %22 : vector<128x64xf32>
    %24 = math.exp %23 : vector<128x64xf32>
    %cst_11 = arith.constant dense<0.000000e+00> : vector<128xf32>
    %25 = vector.multi_reduction <add>, %24, %cst_11 [1] : vector<128x64xf32> to vector<128xf32>
    %26 = vector.shape_cast %25 : vector<128xf32> to vector<128x1xf32>
    %27 = tpu.reciprocal %26 {approx = true} : vector<128x1xf32> -> vector<128x1xf32>
    %28 = vector.broadcast %27 : vector<128x1xf32> to vector<128x64xf32>
    %29 = arith.mulf %24, %28 : vector<128x64xf32>
    %30 = arith.truncf %29 : vector<128x64xf32> to vector<128x64xbf16>
    %c0_12 = arith.constant 0 : index
    %c0_13 = arith.constant 0 : index
    %31 = vector.load %arg3[%c0_12, %c0_13] : memref<512x64xbf16, #tpu.memory_space<vmem>>, vector<32x64xbf16>
    %cst_14 = arith.constant dense<0.000000e+00> : vector<64x64xf32>
    %32 = tpu.matmul %16, %31, %cst_14 {dimension_numbers = #tpu.dot_dimension_numbers<[1], [0], [0], [1], [0, 0, 1, 1], [], []>} : vector<64x32xbf16>, vector<32x64xbf16>, vector<64x64xf32> -> vector<64x64xf32>
    %33 = vector.extract_strided_slice %30 {offsets = [0, 0], sizes = [64, 64], strides = [1, 1]} : vector<128x64xbf16> to vector<64x64xbf16>
    %34 = arith.truncf %32 : vector<64x64xf32> to vector<64x64xbf16>
    %cst_15 = arith.constant dense<0.000000e+00> : vector<64x64xf32>
    %35 = tpu.matmul %33, %34, %cst_15 {dimension_numbers = #tpu.dot_dimension_numbers<[1], [0], [0], [1], [0, 0, 1, 1], [], []>} : vector<64x64xbf16>, vector<64x64xbf16>, vector<64x64xf32> -> vector<64x64xf32>
    %36 = arith.addf %17, %35 : vector<64x64xf32>
    %c32 = arith.constant 32 : index
    %c0_16 = arith.constant 0 : index
    %37 = vector.load %arg3[%c32, %c0_16] : memref<512x64xbf16, #tpu.memory_space<vmem>>, vector<32x64xbf16>
    %cst_17 = arith.constant dense<0.000000e+00> : vector<64x64xf32>
    %38 = tpu.matmul %16, %37, %cst_17 {dimension_numbers = #tpu.dot_dimension_numbers<[1], [0], [0], [1], [0, 0, 1, 1], [], []>} : vector<64x32xbf16>, vector<32x64xbf16>, vector<64x64xf32> -> vector<64x64xf32>
    %39 = vector.extract_strided_slice %30 {offsets = [64, 0], sizes = [64, 64], strides = [1, 1]} : vector<128x64xbf16> to vector<64x64xbf16>
    %40 = arith.truncf %38 : vector<64x64xf32> to vector<64x64xbf16>
    %cst_18 = arith.constant dense<0.000000e+00> : vector<64x64xf32>
    %41 = tpu.matmul %39, %40, %cst_18 {dimension_numbers = #tpu.dot_dimension_numbers<[1], [0], [0], [1], [0, 0, 1, 1], [], []>} : vector<64x64xbf16>, vector<64x64xbf16>, vector<64x64xf32> -> vector<64x64xf32>
    %42 = arith.addf %36, %41 : vector<64x64xf32>
    %c416 = arith.constant 416 : index
    %c0_19 = arith.constant 0 : index
    %43 = vector.load %arg2[%c416, %c0_19] : memref<800x32xbf16, #tpu.memory_space<vmem>>, vector<128x32xbf16>
    %cst_20 = arith.constant dense<0.000000e+00> : vector<128x64xf32>
    %44 = tpu.matmul %43, %16, %cst_20 {dimension_numbers = #tpu.dot_dimension_numbers<[1], [1], [0], [0], [0, 0, 1, 0], [], []>} : vector<128x32xbf16>, vector<64x32xbf16>, vector<128x64xf32> -> vector<128x64xf32>
    %cst_21 = arith.constant dense<0xFF800000> : vector<128xf32>
    %45 = vector.multi_reduction <maximumf>, %44, %cst_21 [1] : vector<128x64xf32> to vector<128xf32>
    %46 = vector.shape_cast %45 : vector<128xf32> to vector<128x1xf32>
    %47 = vector.broadcast %46 : vector<128x1xf32> to vector<128x64xf32>
    %48 = arith.subf %44, %47 : vector<128x64xf32>
    %49 = math.exp %48 : vector<128x64xf32>
    %cst_22 = arith.constant dense<0.000000e+00> : vector<128xf32>
    %50 = vector.multi_reduction <add>, %49, %cst_22 [1] : vector<128x64xf32> to vector<128xf32>
    %51 = vector.shape_cast %50 : vector<128xf32> to vector<128x1xf32>
    %52 = tpu.reciprocal %51 {approx = true} : vector<128x1xf32> -> vector<128x1xf32>
    %53 = vector.broadcast %52 : vector<128x1xf32> to vector<128x64xf32>
    %54 = arith.mulf %49, %53 : vector<128x64xf32>
    %55 = arith.truncf %54 : vector<128x64xf32> to vector<128x64xbf16>
    %c64 = arith.constant 64 : index
    %c0_23 = arith.constant 0 : index
    %56 = vector.load %arg3[%c64, %c0_23] : memref<512x64xbf16, #tpu.memory_space<vmem>>, vector<32x64xbf16>
    %cst_24 = arith.constant dense<0.000000e+00> : vector<64x64xf32>
    %57 = tpu.matmul %16, %56, %cst_24 {dimension_numbers = #tpu.dot_dimension_numbers<[1], [0], [0], [1], [0, 0, 1, 1], [], []>} : vector<64x32xbf16>, vector<32x64xbf16>, vector<64x64xf32> -> vector<64x64xf32>
    %58 = vector.extract_strided_slice %55 {offsets = [0, 0], sizes = [64, 64], strides = [1, 1]} : vector<128x64xbf16> to vector<64x64xbf16>
    %59 = arith.truncf %57 : vector<64x64xf32> to vector<64x64xbf16>
    %cst_25 = arith.constant dense<0.000000e+00> : vector<64x64xf32>
    %60 = tpu.matmul %58, %59, %cst_25 {dimension_numbers = #tpu.dot_dimension_numbers<[1], [0], [0], [1], [0, 0, 1, 1], [], []>} : vector<64x64xbf16>, vector<64x64xbf16>, vector<64x64xf32> -> vector<64x64xf32>
    %61 = arith.addf %42, %60 : vector<64x64xf32>
    %c96 = arith.constant 96 : index
    %c0_26 = arith.constant 0 : index
    %62 = vector.load %arg3[%c96, %c0_26] : memref<512x64xbf16, #tpu.memory_space<vmem>>, vector<32x64xbf16>
    %cst_27 = arith.constant dense<0.000000e+00> : vector<64x64xf32>
    %63 = tpu.matmul %16, %62, %cst_27 {dimension_numbers = #tpu.dot_dimension_numbers<[1], [0], [0], [1], [0, 0, 1, 1], [], []>} : vector<64x32xbf16>, vector<32x64xbf16>, vector<64x64xf32> -> vector<64x64xf32>
    %64 = vector.extract_strided_slice %55 {offsets = [64, 0], sizes = [64, 64], strides = [1, 1]} : vector<128x64xbf16> to vector<64x64xbf16>
    %65 = arith.truncf %63 : vector<64x64xf32> to vector<64x64xbf16>
    %cst_28 = arith.constant dense<0.000000e+00> : vector<64x64xf32>
    %66 = tpu.matmul %64, %65, %cst_28 {dimension_numbers = #tpu.dot_dimension_numbers<[1], [0], [0], [1], [0, 0, 1, 1], [], []>} : vector<64x64xbf16>, vector<64x64xbf16>, vector<64x64xf32> -> vector<64x64xf32>
    %67 = arith.addf %61, %66 : vector<64x64xf32>
    %c544 = arith.constant 544 : index
    %c0_29 = arith.constant 0 : index
    %68 = vector.load %arg2[%c544, %c0_29] : memref<800x32xbf16, #tpu.memory_space<vmem>>, vector<128x32xbf16>
    %cst_30 = arith.constant dense<0.000000e+00> : vector<128x64xf32>
    %69 = tpu.matmul %68, %16, %cst_30 {dimension_numbers = #tpu.dot_dimension_numbers<[1], [1], [0], [0], [0, 0, 1, 0], [], []>} : vector<128x32xbf16>, vector<64x32xbf16>, vector<128x64xf32> -> vector<128x64xf32>
    %cst_31 = arith.constant dense<0xFF800000> : vector<128xf32>
    %70 = vector.multi_reduction <maximumf>, %69, %cst_31 [1] : vector<128x64xf32> to vector<128xf32>
    %71 = vector.shape_cast %70 : vector<128xf32> to vector<128x1xf32>
    %72 = vector.broadcast %71 : vector<128x1xf32> to vector<128x64xf32>
    %73 = arith.subf %69, %72 : vector<128x64xf32>
    %74 = math.exp %73 : vector<128x64xf32>
    %cst_32 = arith.constant dense<0.000000e+00> : vector<128xf32>
    %75 = vector.multi_reduction <add>, %74, %cst_32 [1] : vector<128x64xf32> to vector<128xf32>
    %76 = vector.shape_cast %75 : vector<128xf32> to vector<128x1xf32>
    %77 = tpu.reciprocal %76 {approx = true} : vector<128x1xf32> -> vector<128x1xf32>
    %78 = vector.broadcast %77 : vector<128x1xf32> to vector<128x64xf32>
    %79 = arith.mulf %74, %78 : vector<128x64xf32>
    %80 = arith.truncf %79 : vector<128x64xf32> to vector<128x64xbf16>
    %c128 = arith.constant 128 : index
    %c0_33 = arith.constant 0 : index
    %81 = vector.load %arg3[%c128, %c0_33] : memref<512x64xbf16, #tpu.memory_space<vmem>>, vector<32x64xbf16>
    %cst_34 = arith.constant dense<0.000000e+00> : vector<64x64xf32>
    %82 = tpu.matmul %16, %81, %cst_34 {dimension_numbers = #tpu.dot_dimension_numbers<[1], [0], [0], [1], [0, 0, 1, 1], [], []>} : vector<64x32xbf16>, vector<32x64xbf16>, vector<64x64xf32> -> vector<64x64xf32>
    %83 = vector.extract_strided_slice %80 {offsets = [0, 0], sizes = [64, 64], strides = [1, 1]} : vector<128x64xbf16> to vector<64x64xbf16>
    %84 = arith.truncf %82 : vector<64x64xf32> to vector<64x64xbf16>
    %cst_35 = arith.constant dense<0.000000e+00> : vector<64x64xf32>
    %85 = tpu.matmul %83, %84, %cst_35 {dimension_numbers = #tpu.dot_dimension_numbers<[1], [0], [0], [1], [0, 0, 1, 1], [], []>} : vector<64x64xbf16>, vector<64x64xbf16>, vector<64x64xf32> -> vector<64x64xf32>
    %86 = arith.addf %67, %85 : vector<64x64xf32>
    %c160 = arith.constant 160 : index
    %c0_36 = arith.constant 0 : index
    %87 = vector.load %arg3[%c160, %c0_36] : memref<512x64xbf16, #tpu.memory_space<vmem>>, vector<32x64xbf16>
    %cst_37 = arith.constant dense<0.000000e+00> : vector<64x64xf32>
    %88 = tpu.matmul %16, %87, %cst_37 {dimension_numbers = #tpu.dot_dimension_numbers<[1], [0], [0], [1], [0, 0, 1, 1], [], []>} : vector<64x32xbf16>, vector<32x64xbf16>, vector<64x64xf32> -> vector<64x64xf32>
    %89 = vector.extract_strided_slice %80 {offsets = [64, 0], sizes = [64, 64], strides = [1, 1]} : vector<128x64xbf16> to vector<64x64xbf16>
    %90 = arith.truncf %88 : vector<64x64xf32> to vector<64x64xbf16>
    %cst_38 = arith.constant dense<0.000000e+00> : vector<64x64xf32>
    %91 = tpu.matmul %89, %90, %cst_38 {dimension_numbers = #tpu.dot_dimension_numbers<[1], [0], [0], [1], [0, 0, 1, 1], [], []>} : vector<64x64xbf16>, vector<64x64xbf16>, vector<64x64xf32> -> vector<64x64xf32>
    %92 = arith.addf %86, %91 : vector<64x64xf32>
    %c672 = arith.constant 672 : index
    %c0_39 = arith.constant 0 : index
    %93 = vector.load %arg2[%c672, %c0_39] : memref<800x32xbf16, #tpu.memory_space<vmem>>, vector<128x32xbf16>
    %cst_40 = arith.constant dense<0.000000e+00> : vector<128x64xf32>
    %94 = tpu.matmul %93, %16, %cst_40 {dimension_numbers = #tpu.dot_dimension_numbers<[1], [1], [0], [0], [0, 0, 1, 0], [], []>} : vector<128x32xbf16>, vector<64x32xbf16>, vector<128x64xf32> -> vector<128x64xf32>
    %cst_41 = arith.constant dense<0xFF800000> : vector<128xf32>
    %95 = vector.multi_reduction <maximumf>, %94, %cst_41 [1] : vector<128x64xf32> to vector<128xf32>
    %96 = vector.shape_cast %95 : vector<128xf32> to vector<128x1xf32>
    %97 = vector.broadcast %96 : vector<128x1xf32> to vector<128x64xf32>
    %98 = arith.subf %94, %97 : vector<128x64xf32>
    %99 = math.exp %98 : vector<128x64xf32>
    %cst_42 = arith.constant dense<0.000000e+00> : vector<128xf32>
    %100 = vector.multi_reduction <add>, %99, %cst_42 [1] : vector<128x64xf32> to vector<128xf32>
    %101 = vector.shape_cast %100 : vector<128xf32> to vector<128x1xf32>
    %102 = tpu.reciprocal %101 {approx = true} : vector<128x1xf32> -> vector<128x1xf32>
    %103 = vector.broadcast %102 : vector<128x1xf32> to vector<128x64xf32>
    %104 = arith.mulf %99, %103 : vector<128x64xf32>
    %105 = arith.truncf %104 : vector<128x64xf32> to vector<128x64xbf16>
    %c192 = arith.constant 192 : index
    %c0_43 = arith.constant 0 : index
    %106 = vector.load %arg3[%c192, %c0_43] : memref<512x64xbf16, #tpu.memory_space<vmem>>, vector<32x64xbf16>
    %cst_44 = arith.constant dense<0.000000e+00> : vector<64x64xf32>
    %107 = tpu.matmul %16, %106, %cst_44 {dimension_numbers = #tpu.dot_dimension_numbers<[1], [0], [0], [1], [0, 0, 1, 1], [], []>} : vector<64x32xbf16>, vector<32x64xbf16>, vector<64x64xf32> -> vector<64x64xf32>
    %108 = vector.extract_strided_slice %105 {offsets = [0, 0], sizes = [64, 64], strides = [1, 1]} : vector<128x64xbf16> to vector<64x64xbf16>
    %109 = arith.truncf %107 : vector<64x64xf32> to vector<64x64xbf16>
    %cst_45 = arith.constant dense<0.000000e+00> : vector<64x64xf32>
    %110 = tpu.matmul %108, %109, %cst_45 {dimension_numbers = #tpu.dot_dimension_numbers<[1], [0], [0], [1], [0, 0, 1, 1], [], []>} : vector<64x64xbf16>, vector<64x64xbf16>, vector<64x64xf32> -> vector<64x64xf32>
    %111 = arith.addf %92, %110 : vector<64x64xf32>
    %c224 = arith.constant 224 : index
    %c0_46 = arith.constant 0 : index
    %112 = vector.load %arg3[%c224, %c0_46] : memref<512x64xbf16, #tpu.memory_space<vmem>>, vector<32x64xbf16>
    %cst_47 = arith.constant dense<0.000000e+00> : vector<64x64xf32>
    %113 = tpu.matmul %16, %112, %cst_47 {dimension_numbers = #tpu.dot_dimension_numbers<[1], [0], [0], [1], [0, 0, 1, 1], [], []>} : vector<64x32xbf16>, vector<32x64xbf16>, vector<64x64xf32> -> vector<64x64xf32>
    %114 = vector.extract_strided_slice %105 {offsets = [64, 0], sizes = [64, 64], strides = [1, 1]} : vector<128x64xbf16> to vector<64x64xbf16>
    %115 = arith.truncf %113 : vector<64x64xf32> to vector<64x64xbf16>
    %cst_48 = arith.constant dense<0.000000e+00> : vector<64x64xf32>
    %116 = tpu.matmul %114, %115, %cst_48 {dimension_numbers = #tpu.dot_dimension_numbers<[1], [0], [0], [1], [0, 0, 1, 1], [], []>} : vector<64x64xbf16>, vector<64x64xbf16>, vector<64x64xf32> -> vector<64x64xf32>
    %117 = arith.addf %111, %116 : vector<64x64xf32>
    %118 = vector.extract_strided_slice %15 {offsets = [64, 0], sizes = [64, 32], strides = [1, 1]} : vector<128x32xbf16> to vector<64x32xbf16>
    %cst_49 = arith.constant 0.000000e+00 : f32
    %119 = vector.broadcast %cst_49 : f32 to vector<64x64xf32>
    %c288_50 = arith.constant 288 : index
    %c0_51 = arith.constant 0 : index
    %120 = vector.load %arg2[%c288_50, %c0_51] : memref<800x32xbf16, #tpu.memory_space<vmem>>, vector<128x32xbf16>
    %cst_52 = arith.constant dense<0.000000e+00> : vector<128x64xf32>
    %121 = tpu.matmul %120, %118, %cst_52 {dimension_numbers = #tpu.dot_dimension_numbers<[1], [1], [0], [0], [0, 0, 1, 0], [], []>} : vector<128x32xbf16>, vector<64x32xbf16>, vector<128x64xf32> -> vector<128x64xf32>
    %cst_53 = arith.constant dense<0xFF800000> : vector<128xf32>
    %122 = vector.multi_reduction <maximumf>, %121, %cst_53 [1] : vector<128x64xf32> to vector<128xf32>
    %123 = vector.shape_cast %122 : vector<128xf32> to vector<128x1xf32>
    %124 = vector.broadcast %123 : vector<128x1xf32> to vector<128x64xf32>
    %125 = arith.subf %121, %124 : vector<128x64xf32>
    %126 = math.exp %125 : vector<128x64xf32>
    %cst_54 = arith.constant dense<0.000000e+00> : vector<128xf32>
    %127 = vector.multi_reduction <add>, %126, %cst_54 [1] : vector<128x64xf32> to vector<128xf32>
    %128 = vector.shape_cast %127 : vector<128xf32> to vector<128x1xf32>
    %129 = tpu.reciprocal %128 {approx = true} : vector<128x1xf32> -> vector<128x1xf32>
    %130 = vector.broadcast %129 : vector<128x1xf32> to vector<128x64xf32>
    %131 = arith.mulf %126, %130 : vector<128x64xf32>
    %132 = arith.truncf %131 : vector<128x64xf32> to vector<128x64xbf16>
    %c0_55 = arith.constant 0 : index
    %c0_56 = arith.constant 0 : index
    %133 = vector.load %arg3[%c0_55, %c0_56] : memref<512x64xbf16, #tpu.memory_space<vmem>>, vector<32x64xbf16>
    %cst_57 = arith.constant dense<0.000000e+00> : vector<64x64xf32>
    %134 = tpu.matmul %118, %133, %cst_57 {dimension_numbers = #tpu.dot_dimension_numbers<[1], [0], [0], [1], [0, 0, 1, 1], [], []>} : vector<64x32xbf16>, vector<32x64xbf16>, vector<64x64xf32> -> vector<64x64xf32>
    %135 = vector.extract_strided_slice %132 {offsets = [0, 0], sizes = [64, 64], strides = [1, 1]} : vector<128x64xbf16> to vector<64x64xbf16>
    %136 = arith.truncf %134 : vector<64x64xf32> to vector<64x64xbf16>
    %cst_58 = arith.constant dense<0.000000e+00> : vector<64x64xf32>
    %137 = tpu.matmul %135, %136, %cst_58 {dimension_numbers = #tpu.dot_dimension_numbers<[1], [0], [0], [1], [0, 0, 1, 1], [], []>} : vector<64x64xbf16>, vector<64x64xbf16>, vector<64x64xf32> -> vector<64x64xf32>
    %138 = arith.addf %119, %137 : vector<64x64xf32>
    %c32_59 = arith.constant 32 : index
    %c0_60 = arith.constant 0 : index
    %139 = vector.load %arg3[%c32_59, %c0_60] : memref<512x64xbf16, #tpu.memory_space<vmem>>, vector<32x64xbf16>
    %cst_61 = arith.constant dense<0.000000e+00> : vector<64x64xf32>
    %140 = tpu.matmul %118, %139, %cst_61 {dimension_numbers = #tpu.dot_dimension_numbers<[1], [0], [0], [1], [0, 0, 1, 1], [], []>} : vector<64x32xbf16>, vector<32x64xbf16>, vector<64x64xf32> -> vector<64x64xf32>
    %141 = vector.extract_strided_slice %132 {offsets = [64, 0], sizes = [64, 64], strides = [1, 1]} : vector<128x64xbf16> to vector<64x64xbf16>
    %142 = arith.truncf %140 : vector<64x64xf32> to vector<64x64xbf16>
    %cst_62 = arith.constant dense<0.000000e+00> : vector<64x64xf32>
    %143 = tpu.matmul %141, %142, %cst_62 {dimension_numbers = #tpu.dot_dimension_numbers<[1], [0], [0], [1], [0, 0, 1, 1], [], []>} : vector<64x64xbf16>, vector<64x64xbf16>, vector<64x64xf32> -> vector<64x64xf32>
    %144 = arith.addf %138, %143 : vector<64x64xf32>
    %c416_63 = arith.constant 416 : index
    %c0_64 = arith.constant 0 : index
    %145 = vector.load %arg2[%c416_63, %c0_64] : memref<800x32xbf16, #tpu.memory_space<vmem>>, vector<128x32xbf16>
    %cst_65 = arith.constant dense<0.000000e+00> : vector<128x64xf32>
    %146 = tpu.matmul %145, %118, %cst_65 {dimension_numbers = #tpu.dot_dimension_numbers<[1], [1], [0], [0], [0, 0, 1, 0], [], []>} : vector<128x32xbf16>, vector<64x32xbf16>, vector<128x64xf32> -> vector<128x64xf32>
    %cst_66 = arith.constant dense<0xFF800000> : vector<128xf32>
    %147 = vector.multi_reduction <maximumf>, %146, %cst_66 [1] : vector<128x64xf32> to vector<128xf32>
    %148 = vector.shape_cast %147 : vector<128xf32> to vector<128x1xf32>
    %149 = vector.broadcast %148 : vector<128x1xf32> to vector<128x64xf32>
    %150 = arith.subf %146, %149 : vector<128x64xf32>
    %151 = math.exp %150 : vector<128x64xf32>
    %cst_67 = arith.constant dense<0.000000e+00> : vector<128xf32>
    %152 = vector.multi_reduction <add>, %151, %cst_67 [1] : vector<128x64xf32> to vector<128xf32>
    %153 = vector.shape_cast %152 : vector<128xf32> to vector<128x1xf32>
    %154 = tpu.reciprocal %153 {approx = true} : vector<128x1xf32> -> vector<128x1xf32>
    %155 = vector.broadcast %154 : vector<128x1xf32> to vector<128x64xf32>
    %156 = arith.mulf %151, %155 : vector<128x64xf32>
    %157 = arith.truncf %156 : vector<128x64xf32> to vector<128x64xbf16>
    %c64_68 = arith.constant 64 : index
    %c0_69 = arith.constant 0 : index
    %158 = vector.load %arg3[%c64_68, %c0_69] : memref<512x64xbf16, #tpu.memory_space<vmem>>, vector<32x64xbf16>
    %cst_70 = arith.constant dense<0.000000e+00> : vector<64x64xf32>
    %159 = tpu.matmul %118, %158, %cst_70 {dimension_numbers = #tpu.dot_dimension_numbers<[1], [0], [0], [1], [0, 0, 1, 1], [], []>} : vector<64x32xbf16>, vector<32x64xbf16>, vector<64x64xf32> -> vector<64x64xf32>
    %160 = vector.extract_strided_slice %157 {offsets = [0, 0], sizes = [64, 64], strides = [1, 1]} : vector<128x64xbf16> to vector<64x64xbf16>
    %161 = arith.truncf %159 : vector<64x64xf32> to vector<64x64xbf16>
    %cst_71 = arith.constant dense<0.000000e+00> : vector<64x64xf32>
    %162 = tpu.matmul %160, %161, %cst_71 {dimension_numbers = #tpu.dot_dimension_numbers<[1], [0], [0], [1], [0, 0, 1, 1], [], []>} : vector<64x64xbf16>, vector<64x64xbf16>, vector<64x64xf32> -> vector<64x64xf32>
    %163 = arith.addf %144, %162 : vector<64x64xf32>
    %c96_72 = arith.constant 96 : index
    %c0_73 = arith.constant 0 : index
    %164 = vector.load %arg3[%c96_72, %c0_73] : memref<512x64xbf16, #tpu.memory_space<vmem>>, vector<32x64xbf16>
    %cst_74 = arith.constant dense<0.000000e+00> : vector<64x64xf32>
    %165 = tpu.matmul %118, %164, %cst_74 {dimension_numbers = #tpu.dot_dimension_numbers<[1], [0], [0], [1], [0, 0, 1, 1], [], []>} : vector<64x32xbf16>, vector<32x64xbf16>, vector<64x64xf32> -> vector<64x64xf32>
    %166 = vector.extract_strided_slice %157 {offsets = [64, 0], sizes = [64, 64], strides = [1, 1]} : vector<128x64xbf16> to vector<64x64xbf16>
    %167 = arith.truncf %165 : vector<64x64xf32> to vector<64x64xbf16>
    %cst_75 = arith.constant dense<0.000000e+00> : vector<64x64xf32>
    %168 = tpu.matmul %166, %167, %cst_75 {dimension_numbers = #tpu.dot_dimension_numbers<[1], [0], [0], [1], [0, 0, 1, 1], [], []>} : vector<64x64xbf16>, vector<64x64xbf16>, vector<64x64xf32> -> vector<64x64xf32>
    %169 = arith.addf %163, %168 : vector<64x64xf32>
    %c544_76 = arith.constant 544 : index
    %c0_77 = arith.constant 0 : index
    %170 = vector.load %arg2[%c544_76, %c0_77] : memref<800x32xbf16, #tpu.memory_space<vmem>>, vector<128x32xbf16>
    %cst_78 = arith.constant dense<0.000000e+00> : vector<128x64xf32>
    %171 = tpu.matmul %170, %118, %cst_78 {dimension_numbers = #tpu.dot_dimension_numbers<[1], [1], [0], [0], [0, 0, 1, 0], [], []>} : vector<128x32xbf16>, vector<64x32xbf16>, vector<128x64xf32> -> vector<128x64xf32>
    %cst_79 = arith.constant dense<0xFF800000> : vector<128xf32>
    %172 = vector.multi_reduction <maximumf>, %171, %cst_79 [1] : vector<128x64xf32> to vector<128xf32>
    %173 = vector.shape_cast %172 : vector<128xf32> to vector<128x1xf32>
    %174 = vector.broadcast %173 : vector<128x1xf32> to vector<128x64xf32>
    %175 = arith.subf %171, %174 : vector<128x64xf32>
    %176 = math.exp %175 : vector<128x64xf32>
    %cst_80 = arith.constant dense<0.000000e+00> : vector<128xf32>
    %177 = vector.multi_reduction <add>, %176, %cst_80 [1] : vector<128x64xf32> to vector<128xf32>
    %178 = vector.shape_cast %177 : vector<128xf32> to vector<128x1xf32>
    %179 = tpu.reciprocal %178 {approx = true} : vector<128x1xf32> -> vector<128x1xf32>
    %180 = vector.broadcast %179 : vector<128x1xf32> to vector<128x64xf32>
    %181 = arith.mulf %176, %180 : vector<128x64xf32>
    %182 = arith.truncf %181 : vector<128x64xf32> to vector<128x64xbf16>
    %c128_81 = arith.constant 128 : index
    %c0_82 = arith.constant 0 : index
    %183 = vector.load %arg3[%c128_81, %c0_82] : memref<512x64xbf16, #tpu.memory_space<vmem>>, vector<32x64xbf16>
    %cst_83 = arith.constant dense<0.000000e+00> : vector<64x64xf32>
    %184 = tpu.matmul %118, %183, %cst_83 {dimension_numbers = #tpu.dot_dimension_numbers<[1], [0], [0], [1], [0, 0, 1, 1], [], []>} : vector<64x32xbf16>, vector<32x64xbf16>, vector<64x64xf32> -> vector<64x64xf32>
    %185 = vector.extract_strided_slice %182 {offsets = [0, 0], sizes = [64, 64], strides = [1, 1]} : vector<128x64xbf16> to vector<64x64xbf16>
    %186 = arith.truncf %184 : vector<64x64xf32> to vector<64x64xbf16>
    %cst_84 = arith.constant dense<0.000000e+00> : vector<64x64xf32>
    %187 = tpu.matmul %185, %186, %cst_84 {dimension_numbers = #tpu.dot_dimension_numbers<[1], [0], [0], [1], [0, 0, 1, 1], [], []>} : vector<64x64xbf16>, vector<64x64xbf16>, vector<64x64xf32> -> vector<64x64xf32>
    %188 = arith.addf %169, %187 : vector<64x64xf32>
    %c160_85 = arith.constant 160 : index
    %c0_86 = arith.constant 0 : index
    %189 = vector.load %arg3[%c160_85, %c0_86] : memref<512x64xbf16, #tpu.memory_space<vmem>>, vector<32x64xbf16>
    %cst_87 = arith.constant dense<0.000000e+00> : vector<64x64xf32>
    %190 = tpu.matmul %118, %189, %cst_87 {dimension_numbers = #tpu.dot_dimension_numbers<[1], [0], [0], [1], [0, 0, 1, 1], [], []>} : vector<64x32xbf16>, vector<32x64xbf16>, vector<64x64xf32> -> vector<64x64xf32>
    %191 = vector.extract_strided_slice %182 {offsets = [64, 0], sizes = [64, 64], strides = [1, 1]} : vector<128x64xbf16> to vector<64x64xbf16>
    %192 = arith.truncf %190 : vector<64x64xf32> to vector<64x64xbf16>
    %cst_88 = arith.constant dense<0.000000e+00> : vector<64x64xf32>
    %193 = tpu.matmul %191, %192, %cst_88 {dimension_numbers = #tpu.dot_dimension_numbers<[1], [0], [0], [1], [0, 0, 1, 1], [], []>} : vector<64x64xbf16>, vector<64x64xbf16>, vector<64x64xf32> -> vector<64x64xf32>
    %194 = arith.addf %188, %193 : vector<64x64xf32>
    %c672_89 = arith.constant 672 : index
    %c0_90 = arith.constant 0 : index
    %195 = vector.load %arg2[%c672_89, %c0_90] : memref<800x32xbf16, #tpu.memory_space<vmem>>, vector<128x32xbf16>
    %cst_91 = arith.constant dense<0.000000e+00> : vector<128x64xf32>
    %196 = tpu.matmul %195, %118, %cst_91 {dimension_numbers = #tpu.dot_dimension_numbers<[1], [1], [0], [0], [0, 0, 1, 0], [], []>} : vector<128x32xbf16>, vector<64x32xbf16>, vector<128x64xf32> -> vector<128x64xf32>
    %cst_92 = arith.constant dense<0xFF800000> : vector<128xf32>
    %197 = vector.multi_reduction <maximumf>, %196, %cst_92 [1] : vector<128x64xf32> to vector<128xf32>
    %198 = vector.shape_cast %197 : vector<128xf32> to vector<128x1xf32>
    %199 = vector.broadcast %198 : vector<128x1xf32> to vector<128x64xf32>
    %200 = arith.subf %196, %199 : vector<128x64xf32>
    %201 = math.exp %200 : vector<128x64xf32>
    %cst_93 = arith.constant dense<0.000000e+00> : vector<128xf32>
    %202 = vector.multi_reduction <add>, %201, %cst_93 [1] : vector<128x64xf32> to vector<128xf32>
    %203 = vector.shape_cast %202 : vector<128xf32> to vector<128x1xf32>
    %204 = tpu.reciprocal %203 {approx = true} : vector<128x1xf32> -> vector<128x1xf32>
    %205 = vector.broadcast %204 : vector<128x1xf32> to vector<128x64xf32>
    %206 = arith.mulf %201, %205 : vector<128x64xf32>
    %207 = arith.truncf %206 : vector<128x64xf32> to vector<128x64xbf16>
    %c192_94 = arith.constant 192 : index
    %c0_95 = arith.constant 0 : index
    %208 = vector.load %arg3[%c192_94, %c0_95] : memref<512x64xbf16, #tpu.memory_space<vmem>>, vector<32x64xbf16>
    %cst_96 = arith.constant dense<0.000000e+00> : vector<64x64xf32>
    %209 = tpu.matmul %118, %208, %cst_96 {dimension_numbers = #tpu.dot_dimension_numbers<[1], [0], [0], [1], [0, 0, 1, 1], [], []>} : vector<64x32xbf16>, vector<32x64xbf16>, vector<64x64xf32> -> vector<64x64xf32>
    %210 = vector.extract_strided_slice %207 {offsets = [0, 0], sizes = [64, 64], strides = [1, 1]} : vector<128x64xbf16> to vector<64x64xbf16>
    %211 = arith.truncf %209 : vector<64x64xf32> to vector<64x64xbf16>
    %cst_97 = arith.constant dense<0.000000e+00> : vector<64x64xf32>
    %212 = tpu.matmul %210, %211, %cst_97 {dimension_numbers = #tpu.dot_dimension_numbers<[1], [0], [0], [1], [0, 0, 1, 1], [], []>} : vector<64x64xbf16>, vector<64x64xbf16>, vector<64x64xf32> -> vector<64x64xf32>
    %213 = arith.addf %194, %212 : vector<64x64xf32>
    %c224_98 = arith.constant 224 : index
    %c0_99 = arith.constant 0 : index
    %214 = vector.load %arg3[%c224_98, %c0_99] : memref<512x64xbf16, #tpu.memory_space<vmem>>, vector<32x64xbf16>
    %cst_100 = arith.constant dense<0.000000e+00> : vector<64x64xf32>
    %215 = tpu.matmul %118, %214, %cst_100 {dimension_numbers = #tpu.dot_dimension_numbers<[1], [0], [0], [1], [0, 0, 1, 1], [], []>} : vector<64x32xbf16>, vector<32x64xbf16>, vector<64x64xf32> -> vector<64x64xf32>
    %216 = vector.extract_strided_slice %207 {offsets = [64, 0], sizes = [64, 64], strides = [1, 1]} : vector<128x64xbf16> to vector<64x64xbf16>
    %217 = arith.truncf %215 : vector<64x64xf32> to vector<64x64xbf16>
    %cst_101 = arith.constant dense<0.000000e+00> : vector<64x64xf32>
    %218 = tpu.matmul %216, %217, %cst_101 {dimension_numbers = #tpu.dot_dimension_numbers<[1], [0], [0], [1], [0, 0, 1, 1], [], []>} : vector<64x64xbf16>, vector<64x64xbf16>, vector<64x64xf32> -> vector<64x64xf32>
    %219 = arith.addf %213, %218 : vector<64x64xf32>
    %220 = tpu.concatenate %117, %219 in 0 : vector<64x64xf32>, vector<64x64xf32> -> vector<128x64xf32>
    %221 = vector.broadcast %2 : vector<1x64xf32> to vector<128x64xf32>
    %222 = arith.addf %220, %221 : vector<128x64xf32>
    %cst_102 = arith.constant dense<0.000000e+00> : vector<128xf32>
    %223 = vector.multi_reduction <add>, %222, %cst_102 [1] : vector<128x64xf32> to vector<128xf32>
    %224 = vector.shape_cast %223 : vector<128xf32> to vector<128x1xf32>
    %cst_103 = arith.constant 6.400000e+01 : f32
    %225 = vector.broadcast %cst_103 : f32 to vector<128x1xf32>
    %226 = arith.divf %224, %225 : vector<128x1xf32>
    %227 = vector.broadcast %226 : vector<128x1xf32> to vector<128x64xf32>
    %228 = arith.subf %222, %227 : vector<128x64xf32>
    %229 = arith.mulf %228, %228 : vector<128x64xf32>
    %cst_104 = arith.constant dense<0.000000e+00> : vector<128xf32>
    %230 = vector.multi_reduction <add>, %229, %cst_104 [1] : vector<128x64xf32> to vector<128xf32>
    %231 = vector.shape_cast %230 : vector<128xf32> to vector<128x1xf32>
    %cst_105 = arith.constant 6.400000e+01 : f32
    %232 = vector.broadcast %cst_105 : f32 to vector<128x1xf32>
    %233 = arith.divf %231, %232 : vector<128x1xf32>
    %234 = vector.broadcast %226 : vector<128x1xf32> to vector<128x64xf32>
    %235 = arith.subf %222, %234 : vector<128x64xf32>
    %cst_106 = arith.constant 9.99999974E-6 : f32
    %236 = vector.broadcast %cst_106 : f32 to vector<128x1xf32>
    %237 = arith.addf %233, %236 : vector<128x1xf32>
    %238 = math.rsqrt %237 : vector<128x1xf32>
    %239 = vector.broadcast %238 : vector<128x1xf32> to vector<128x64xf32>
    %240 = arith.mulf %235, %239 : vector<128x64xf32>
    %241 = vector.broadcast %3 : vector<1x64xf32> to vector<128x64xf32>
    %242 = arith.mulf %240, %241 : vector<128x64xf32>
    %243 = vector.broadcast %4 : vector<1x64xf32> to vector<128x64xf32>
    %244 = arith.addf %242, %243 : vector<128x64xf32>
    %245 = arith.truncf %244 : vector<128x64xf32> to vector<128x64xbf16>
    %c0_107 = arith.constant 0 : index
    %c0_108 = arith.constant 0 : index
    %246 = vector.load %arg4[%c0_107, %c0_108] : memref<64x256xbf16, #tpu.memory_space<vmem>>, vector<64x256xbf16>
    %cst_109 = arith.constant dense<0.000000e+00> : vector<128x256xf32>
    %247 = tpu.matmul %245, %246, %cst_109 {dimension_numbers = #tpu.dot_dimension_numbers<[1], [0], [0], [1], [0, 0, 1, 1], [], []>} : vector<128x64xbf16>, vector<64x256xbf16>, vector<128x256xf32> -> vector<128x256xf32>
    %c0_110 = arith.constant 0 : index
    %c0_111 = arith.constant 0 : index
    %248 = vector.load %arg6[%c0_110, %c0_111] : memref<1x256xf32, #tpu.memory_space<vmem>>, vector<1x256xf32>
    %249 = vector.broadcast %248 : vector<1x256xf32> to vector<128x256xf32>
    %250 = arith.addf %247, %249 : vector<128x256xf32>
    %cst_112 = arith.constant 0.000000e+00 : f32
    %251 = vector.broadcast %cst_112 : f32 to vector<128x256xf32>
    %252 = arith.maximumf %250, %251 : vector<128x256xf32>
    %253 = arith.truncf %252 : vector<128x256xf32> to vector<128x256xbf16>
    %c256 = arith.constant 256 : index
    %c0_113 = arith.constant 0 : index
    %254 = vector.load %arg3[%c256, %c0_113] : memref<512x64xbf16, #tpu.memory_space<vmem>>, vector<256x64xbf16>
    %cst_114 = arith.constant dense<0.000000e+00> : vector<128x64xf32>
    %255 = tpu.matmul %253, %254, %cst_114 {dimension_numbers = #tpu.dot_dimension_numbers<[1], [0], [0], [1], [0, 0, 1, 1], [], []>} : vector<128x256xbf16>, vector<256x64xbf16>, vector<128x64xf32> -> vector<128x64xf32>
    %256 = vector.broadcast %5 : vector<1x64xf32> to vector<128x64xf32>
    %257 = arith.addf %255, %256 : vector<128x64xf32>
    %258 = arith.addf %244, %257 : vector<128x64xf32>
    %c0_115 = arith.constant 0 : index
    %c0_116 = arith.constant 0 : index
    %259 = vector.load %arg7[%c0_115, %c0_116] : memref<128x64xf32, #tpu.memory_space<vmem>>, vector<128x64xf32>
    tpu.vector_store %arg7[%c0_115, %c0_116], %258 {strides = array<i32>} : memref<128x64xf32, #tpu.memory_space<vmem>>, vector<128x64xf32>,
    return
  }
  func.func @transform_0(%arg0: i32) -> (i32, i32) {
    %c0_i32 = arith.constant 0 : i32
    %c0_i32_0 = arith.constant 0 : i32
    %c0_i32_1 = arith.constant 0 : i32
    return %c0_i32, %c0_i32_0 : i32, i32
  }
  func.func @transform_1(%arg0: i32) -> (i32, i32) {
    %c0_i32 = arith.constant 0 : i32
    %c0_i32_0 = arith.constant 0 : i32
    %c0_i32_1 = arith.constant 0 : i32
    return %c0_i32, %c0_i32_0 : i32, i32
  }
  func.func @transform_2(%arg0: i32) -> (i32, i32) {
    %c0_i32 = arith.constant 0 : i32
    %c0_i32_0 = arith.constant 0 : i32
    %c0_i32_1 = arith.constant 0 : i32
    return %c0_i32, %c0_i32_0 : i32, i32
  }
  func.func @transform_3(%arg0: i32) -> (i32, i32) {
    %c0_i32 = arith.constant 0 : i32
    %c0_i32_0 = arith.constant 0 : i32
    %c0_i32_1 = arith.constant 0 : i32
    return %c0_i32, %c0_i32_0 : i32, i32
  }
  func.func @transform_4(%arg0: i32) -> (i32, i32) {
    %c0_i32 = arith.constant 0 : i32
    %c0_i32_0 = arith.constant 0 : i32
    %c0_i32_1 = arith.constant 0 : i32
    return %c0_i32, %c0_i32_0 : i32, i32
  }
  func.func @transform_5(%arg0: i32) -> (i32, i32) {
    %c0_i32 = arith.constant 0 : i32
    %c0_i32_0 = arith.constant 0 : i32
    %c0_i32_1 = arith.constant 0 : i32
    return %c0_i32, %c0_i32_0 : i32, i32
  }
  func.func @transform_6(%arg0: i32) -> (i32, i32) {
    %c0_i32 = arith.constant 0 : i32
    %c0_i32_0 = arith.constant 0 : i32
    %c0_i32_1 = arith.constant 0 : i32
    return %c0_i32, %c0_i32_0 : i32, i32
  }
}

</mosaic_0001>

<bundles_post_ra>
// kernel: attention_projector_forward.1
= control target key start
LH: loop header
LB: loop body
LE: loop exit
PB: predicated region body
PF: predicated region fallthrough
CT: control target
= control target key end

     0   :  { %vm342_vm0 = vcmask 261120   ;;  %s11866_s0 = inlined_call_operand.vmem [shape: bf16[128,288], index: 0, kind: input, shape index: {}]   ;;  %s11867_s1 = inlined_call_operand.vmem [shape: bf16[800,32], index: 1, kind: input, shape index: {}]   ;;  %s11868_s2 = inlined_call_operand.vmem [shape: bf16[512,64], index: 2, kind: input, shape index: {}]   ;;  %s11869_s3 = inlined_call_operand.vmem [shape: bf16[64,256], index: 3, kind: input, shape index: {}]   ;;  %s11870_s4 = inlined_call_operand.vmem [shape: f32[136,64], index: 4, kind: input, shape index: {}]   ;;  %s11871_s5 = inlined_call_operand.vmem [shape: f32[1,256], index: 5, kind: input, shape index: {}]   ;;  %s11872_s6 = inlined_call_operand.hbm [shape: f32[128,64], index: 6, kind: output, shape index: {}]  }
   0x1   :  { %v8141_v0 = vld [vmem:[%s11867_s1 + $0x40] sm:$0xff]   ;;  %v8143_v2 = vld [vmem:[%s11867_s1 + $0x48] sm:$0xff]   ;;  %v8145_v4 = vld [vmem:[%s11867_s1 + $0x50] sm:$0xff]  }
   0x2   :  { %v8142_v1 = vld [vmem:[%s11867_s1] sm:$0xff]   ;;  %6875 = vmatprep.subr.bf16.mxu0 %v8141_v0  ;;  %v8144_v3 = vld [vmem:[%s11867_s1 + $0x8] sm:$0xff]   ;;  %v8146_v5 = vld [vmem:[%s11867_s1 + $0x10] sm:$0xff]  }
   0x3   :  { %6876 = vmatpush3.bf16.msra.mxu0 %v8142_v1  ;;  %v8147_v6 = vld [vmem:[%s11867_s1 + $0x58] sm:$0xff]   ;;  %v8149_v8 = vld [vmem:[%s11867_s1 + $0x60] sm:$0xff]   ;;  %v8151_v11 = vld [vmem:[%s11867_s1 + $0x68] sm:$0xff]  }
   0x4   :  { %6877 = vmatprep.subr.bf16.mxu0 %v8143_v2  ;;  %v8148_v7 = vld [vmem:[%s11867_s1 + $0x18] sm:$0xff]   ;;  %v8155_v9 = vld [vmem:[%s11867_s1 + $0x80] sm:$0xff]   ;;  %v8152_v12 = vld [vmem:[%s11867_s1 + $0x28] sm:$0xff]  }
   0x5   :  { %v8150_v10 = vld [vmem:[%s11867_s1 + $0x20] sm:$0xff]   ;;  %7333 = vmatprep.subr.bf16.mxu1 %v8155_v9  ;;  %v8158_v13 = vld [vmem:[%s11867_s1 + $0x88] sm:$0xff]   ;;  %v8153_v14 = vld [vmem:[%s11867_s1 + $0x70] sm:$0xff]  }
   0x6   :  { %7334 = vmatpush3.bf16.msra.mxu1 %v8155_v9  ;;  %v8161_v15 = vld [vmem:[%s11866_s0 + $0x4] ss:$12 sps:$4 sm:$0xff]   ;;  %v8162_v16 = vld [vmem:[%s11866_s0 + $0x8] ss:$12 sps:$4 sm:$0xff]   ;;  %v8163_v17 = vld [vmem:[%s11866_s0 + $0x20] ss:$12 sps:$4 sm:$0xff]  }
   0x7   :  { %6878 = vmatpush3.bf16.msra.mxu0 %v8144_v3  ;;  %7335 = vmatprep.subr.bf16.mxu1 %v8158_v13  ;;  %v8154_v18 = vld [vmem:[%s11867_s1 + $0x30] sm:$0xff]   ;;  %v8156_v19 = vld [vmem:[%s11867_s1 + $0x78] sm:$0xff]   ;;  %v8159_v23 = vld [vmem:[%s11866_s0] ss:$12 sps:$4 sm:$0xff]  }
   0x8   :  { %6879 = vmatprep.subr.bf16.mxu0 %v8145_v4  ;;  %399 = vmatprep.mubr.bf16.mxu0 %v8161_v15  ;;  %v8170_v20 = vld [vmem:[%s11866_s0 + $0x38] ss:$12 sps:$4 sm:$0xff]   ;;  %v8171_v22 = vld [vmem:[%s11866_s0 + $0x50] ss:$12 sps:$4 sm:$0xff]   ;;  %v8167_v26 = vld [vmem:[%s11866_s0 + $0x34] ss:$12 sps:$4 sm:$0xff]  }
   0x9   :  { %7337 = vmatprep.mubr.msk.bf16.mxu1 %vm342_vm0, %v8162_v16  ;;  %v8157_v21 = vld [vmem:[%s11867_s1 + $0x38] sm:$0xff]   ;;  %v8174_v29 = vld [vmem:[%s11866_s0 + $0x48] ss:$12 sps:$4 sm:$0xff]  }
   0xa   :  { %7336 = vmatpush3.bf16.msra.mxu1 %v8158_v13  ;;  %v8164_v24 = vld [vmem:[%s11866_s0 + $0x1c] ss:$12 sps:$4 sm:$0xff]   ;;  %v8166_v25 = vld [vmem:[%s11866_s0 + $0x18] ss:$12 sps:$4 sm:$0xff]  }
   0xb   :  { %6880 = vmatpush3.bf16.msra.mxu0 %v8146_v5  ;;  %v8169_v27 = vld [vmem:[%s11866_s0 + $0x30] ss:$12 sps:$4 sm:$0xff]   ;;  %v8172_v28 = vld [vmem:[%s11866_s0 + $0x4c] ss:$12 sps:$4 sm:$0xff]  }
   0xc   :  { %6881 = vmatprep.subr.bf16.mxu0 %v8147_v6 }
   0xd   :  { %7338 = vmatmul.mubr.msk.bf16.vlgmr.msra.gmra.mrb[0].mxu1 %vm342_vm0, %v8163_v17 }
   0xe   :  { %7341 = vmatprep.mubr.msk.bf16.mxu1 %vm342_vm0, %v8170_v20 }
   0xf   :  { %6882 = vmatpush3.bf16.msra.mxu0 %v8148_v7 }
  0x10   :  { %6883 = vmatprep.subr.bf16.mxu0 %v8149_v8 }
  0x13   :  { %6884 = vmatpush3.bf16.msra.mxu0 %v8150_v10 }
  0x14   :  { %6885 = vmatprep.subr.bf16.mxu0 %v8151_v11 }
  0x15   :  { %7342 = vmatmul.mubr.msk.bf16.gmra.mrb[4].mxu1 %vm342_vm0, %v8171_v22 }
  0x17   :  { %6886 = vmatpush3.bf16.msra.mxu0 %v8152_v12 }
  0x18   :  { %6887 = vmatprep.subr.bf16.mxu0 %v8153_v14 }
  0x1b   :  { %6888 = vmatpush3.bf16.msra.mxu0 %v8154_v18 }
  0x1c   :  { %6889 = vmatprep.subr.bf16.mxu0 %v8156_v19 }
  0x1f   :  { %6890 = vmatpush3.bf16.msra.mxu0 %v8157_v21 }
  0x22   :  { %400 = vmatmul.mubr.bf16.vlgmr.msra.gmra.mrb[0].mxu0 %v8159_v23 }
  0x23   :  { %407 = vmatprep.mubr.bf16.mxu0 %v8164_v24 }
  0x2a   :  { %408 = vmatmul.mubr.bf16.gmra.mrb[4].mxu0 %v8166_v25 }
  0x2b   :  { %415 = vmatprep.mubr.bf16.mxu0 %v8167_v26 }
  0x32   :  { %416 = vmatmul.mubr.bf16.gmra.mrb[8].mxu0 %v8169_v27 }
  0x33   :  { %423 = vmatprep.mubr.bf16.mxu0 %v8172_v28 }
  0x3a   :  { %424 = vmatmul.mubr.bf16.gmra.mrb[12].mxu0 %v8174_v29 }
  0x3b   :  { %11 = vsyncpa [#allocation3], 0  ;;  %v8175_v30 = vld [vmem:[%s11866_s0 + $0x64] ss:$12 sps:$4 sm:$0xff]   ;;  %v8177_v31 = vld [vmem:[%s11866_s0 + $0x60] ss:$12 sps:$4 sm:$0xff]   ;;  %v110_v43 = vlaneseq }
  0x3c   :  { %431 = vmatprep.mubr.bf16.mxu0 %v8175_v30  ;;  %v8178_v32 = vld [vmem:[%s11866_s0 + $0x68] ss:$12 sps:$4 sm:$0xff]   ;;  %v8179_v33 = vld [vmem:[%s11866_s0 + $0x80] ss:$12 sps:$4 sm:$0xff]   ;;  %v8182_v35 = vld [vmem:[%s11866_s0 + $0x78] ss:$12 sps:$4 sm:$0xff]  }
  0x3d   :  { %7345 = vmatprep.mubr.msk.bf16.mxu1 %vm342_vm0, %v8178_v32  ;;  %v8180_v34 = vld [vmem:[%s11866_s0 + $0x7c] ss:$12 sps:$4 sm:$0xff]   ;;  %v8183_v36 = vld [vmem:[%s11866_s0 + $0x94] ss:$12 sps:$4 sm:$0xff]   ;;  %v8186_v38 = vld [vmem:[%s11866_s0 + $0x98] ss:$12 sps:$4 sm:$0xff]  }
  0x3e   :  { %7346 = vmatmul.mubr.msk.bf16.gmra.mrb[8].mxu1 %vm342_vm0, %v8179_v33  ;;  %v8185_v37 = vld [vmem:[%s11866_s0 + $0x90] ss:$12 sps:$4 sm:$0xff]   ;;  %v8188_v40 = vld [vmem:[%s11866_s0 + $0xac] ss:$12 sps:$4 sm:$0xff]   ;;  %v8190_v41 = vld [vmem:[%s11866_s0 + $0xa8] ss:$12 sps:$4 sm:$0xff]  }
  0x3f   :  { %v8187_v39 = vld [vmem:[%s11866_s0 + $0xb0] ss:$12 sps:$4 sm:$0xff]   ;;  %7349 = vmatprep.mubr.msk.bf16.mxu1 %vm342_vm0, %v8186_v38  ;;  %v9057_v46 = vshrl.u32 %v110_v43, 7  ;;  %v25_v50 = vld [vmem:[%s11870_s4] sm:$0xff]  ;;  %v26_v4 = vld [vmem:[%s11870_s4 + $0x8] sm:$0xff]  ;;  %vm790_vm1 = vcmask 523264  }
  0x40   :  { %v9053_v42 = vld [vmem:[%s11867_s1 + $0x90] sm:$0xff]   ;;  %v28_v22 = vld [vmem:[%s11870_s4 + $0x18] sm:$0xff]  ;;  %v29_v23 = vld [vmem:[%s11870_s4 + $0x20] sm:$0xff] }
  0x41   :  { %11940 = vst [vmem:[#allocation5_spill] sm:$0xff] %v9057_v46  ;;  %v11873_v49 = vsub.s32 0, %v9057_v46  ;;  %v27_v5 = vld [vmem:[%s11870_s4 + $0x10] sm:$0xff] }
  0x42   :  { %432 = vmatmul.mubr.bf16.gmra.mrb[16].mxu0 %v8177_v31 }
  0x43   :  { %439 = vmatprep.mubr.bf16.mxu0 %v8180_v34  ;;  %v9067_v54 = vrot.slane %v25_v50, %v11873_v49 }
  0x46   :  { %7350 = vmatmul.mubr.msk.bf16.gmra.mrb[12].mxu1 %vm342_vm0, %v8187_v39 }
  0x47   :  { %7361 = vmatprep.mubr.msk.bf16.mxu1 %vm342_vm0, %v9053_v42 }
  0x4a   :  { %440 = vmatmul.mubr.bf16.gmra.mrb[20].mxu0 %v8182_v35 }
  0x4b   :  { %447 = vmatprep.mubr.bf16.mxu0 %v8183_v36 }
  0x52   :  { %448 = vmatmul.mubr.bf16.gmra.mrb[24].mxu0 %v8185_v37 }
  0x53   :  { %455 = vmatprep.mubr.bf16.mxu0 %v8188_v40  ;;  %v30_v40 = vld [vmem:[%s11870_s4 + $0x28] sm:$0xff] }
  0x5a   :  { %456 = vmatmul.mubr.bf16.gmra.mrb[28].mxu0 %v8190_v41  ;;  %v31_v41 = vld [vmem:[%s11870_s4 + $0x30] sm:$0xff] }
  0xe0   :  { %v7339_v44 = vpop.f32.mrb[0].mxu1 }
  0xe1   :  { %v498_v45 = vpop.f32.mrb[1].mxu1 }
  0xe2   :  { %v7340_v47 = vpop.f32.mrb[2].mxu1 }
  0xe3   :  { %v501_v48 = vpop.f32.mrb[3].mxu1 }
  0xe8   :  { %v9063_v51 = vpop.f32.mrb[4].mxu1 }
  0xe9   :  { %v514_v52 = vpop.f32.mrb[5].mxu1 }
  0xea   :  { %v9069_v55 = vpop.f32.mrb[6].mxu1 }
  0xeb   :  { %v517_v57 = vpop.f32.mrb[7].mxu1 }
  0xf5   :  { %v6891_v53 = vpop.f32.mrb[0].mxu0 }
  0xf6   :  { %v6892_v56 = vpop.f32.mrb[1].mxu0 }
  0xf7   :  { %v6893_v58 = vadd.f32 %v6892_v56, %v6891_v53  ;;  %v6894_v59 = vpop.f32.mrb[2].mxu0 }
  0xf8   :  { %v6895_v60 = vpop.f32.mrb[3].mxu0 }
  0xf9   :  { %v402_v61 = vadd.f32 %v6893_v58, %v9067_v54  ;;  %v6896_v62 = vadd.f32 %v6895_v60, %v6894_v59 }
  0xfb   :  { %v499_v63 = vadd.f32 %v498_v45, %v402_v61  ;;  %v405_v0 = vadd.f32 %v6896_v62, %v9067_v54 }
  0xfd   :  { %v561_v1 = vmax.f32 %v499_v63, 0.0  ;;  %v502_v2 = vadd.f32 %v501_v48, %v405_v0  ;;  %v6897_v3 = vpop.f32.mrb[4].mxu0  ;;  %v32_v63 = vld [vmem:[%s11870_s4 + $0x38] sm:$0xff] }
  0xfe   :  { %v6898_v6 = vpop.f32.mrb[5].mxu0 }
  0xff   :  { %v562_v7 = vmax.f32 %v502_v2, 0.0  ;;  %v6899_v8 = vadd.f32 %v6898_v6, %v6897_v3  ;;  %v6900_v9 = vpop.f32.mrb[6].mxu0  ;;  %v577_v11 = vadd.f32 %v561_v1, %v26_v4  ;;  %v8198_v3 = vld [vmem:[%s11868_s2] sm:$0xff]  }
 0x100   :  { %v6901_v10 = vpop.f32.mrb[7].mxu0  ;;  %v9152_v6 = vld [vmem:[%s11867_s1 + $0xa0] sm:$0xff]  }
 0x101   :  { %v578_v12 = vadd.f32 %v562_v7, %v27_v5  ;;  %v410_v13 = vadd.f32 %v6899_v8, %v9067_v54  ;;  %v6902_v14 = vadd.f32 %v6901_v10, %v6900_v9  ;;  %v9147_v5 = vld [vmem:[%s11867_s1 + $0x98] sm:$0xff]   ;;  %v8200_v7 = vld [vmem:[%s11868_s2 + $0x8] sm:$0xff]   ;;  %v8201_v8 = vld [vmem:[%s11868_s2 + $0x10] sm:$0xff]  }
 0x102   :  { %v9167_v9 = vld [vmem:[%s11867_s1 + $0xa8] sm:$0xff]   ;;  %v9172_v10 = vld [vmem:[%s11867_s1 + $0xb0] sm:$0xff]  }
 0x103   :  { %v9080_v15 = vpack.c.bf16 %v578_v12, %v577_v11  ;;  %v507_v16 = vadd.f32 %v7339_v44, %v410_v13  ;;  %v413_v17 = vadd.f32 %v6902_v14, %v9067_v54  ;;  %v9181_v11 = vld [vmem:[%s11867_s1 + $0xb8] sm:$0xff]   ;;  %v9186_v12 = vld [vmem:[%s11867_s1 + $0xc0] sm:$0xff]   ;;  %v9195_v13 = vld [vmem:[%s11867_s1 + $0xc8] sm:$0xff]  }
 0x104   :  { %v8202_v14 = vld [vmem:[%s11868_s2 + $0x18] sm:$0xff]  }
 0x105   :  { %v563_v18 = vmax.f32 %v507_v16, 0.0  ;;  %v510_v19 = vadd.f32 %v7340_v47, %v413_v17  ;;  %v6903_v20 = vpop.f32.mrb[8].mxu0  ;;  %8105 = vmatprep.subr.msk.bf16.mxu1 %vm342_vm0, %v9080_v15  ;;  %v9087_v21 = vsel %vm342_vm0, %v9080_v15, 0 }
 0x106   :  { %v6904_v24 = vpop.f32.mrb[9].mxu0  ;;  %7354 = vmatpush3.bf16.xpose.msra.mxu1 %v9087_v21 }
 0x107   :  { %v564_v25 = vmax.f32 %v510_v19, 0.0  ;;  %v6905_v26 = vadd.f32 %v6904_v24, %v6903_v20  ;;  %v6906_v27 = vpop.f32.mrb[10].mxu0  ;;  %v579_v29 = vadd.f32 %v563_v18, %v28_v22 }
 0x108   :  { %v6907_v28 = vpop.f32.mrb[11].mxu0 }
 0x109   :  { %v580_v30 = vadd.f32 %v564_v25, %v29_v23  ;;  %v418_v31 = vadd.f32 %v6905_v26, %v9067_v54  ;;  %v6908_v32 = vadd.f32 %v6907_v28, %v6906_v27 }
 0x10b   :  { %v9097_v33 = vpack.c.bf16 %v580_v30, %v579_v29  ;;  %v515_v34 = vadd.f32 %v514_v52, %v418_v31  ;;  %v421_v35 = vadd.f32 %v6908_v32, %v9067_v54  ;;  %v34_v30 = vld [vmem:[%s11870_s4 + $0x48] sm:$0xff] }
 0x10d   :  { %v565_v36 = vmax.f32 %v515_v34, 0.0  ;;  %v518_v37 = vadd.f32 %v517_v57, %v421_v35  ;;  %v6909_v38 = vpop.f32.mrb[12].mxu0  ;;  %8106 = vmatprep.subr.msk.bf16.mxu1 %vm342_vm0, %v9097_v33  ;;  %v9104_v39 = vsel %vm342_vm0, %v9097_v33, 0  ;;  %v8203_v34 = vld [vmem:[%s11867_s1 + $0xd0] sm:$0xff]  }
 0x10e   :  { %v6910_v43 = vpop.f32.mrb[13].mxu0  ;;  %7356 = vmatpush3.bf16.xpose.msra.mxu1 %v9104_v39 }
 0x10f   :  { %v566_v44 = vmax.f32 %v518_v37, 0.0  ;;  %v6911_v45 = vadd.f32 %v6910_v43, %v6909_v38  ;;  %v6912_v47 = vpop.f32.mrb[14].mxu0  ;;  %v581_v50 = vadd.f32 %v565_v36, %v30_v40  ;;  %v35_v36 = vld [vmem:[%s11870_s4 + $0x50] sm:$0xff] }
 0x110   :  { %v6913_v48 = vpop.f32.mrb[15].mxu0 }
 0x111   :  { %v582_v52 = vadd.f32 %v566_v44, %v31_v41  ;;  %v426_v53 = vadd.f32 %v6911_v45, %v9067_v54  ;;  %v6914_v56 = vadd.f32 %v6913_v48, %v6912_v47  ;;  %v7347_v23 = vpop.f32.mrb[8].mxu1 }
 0x112   :  { %v530_v25 = vpop.f32.mrb[9].mxu1 }
 0x113   :  { %v9114_v57 = vpack.c.bf16 %v582_v52, %v581_v50  ;;  %v523_v58 = vadd.f32 %v9063_v51, %v426_v53  ;;  %v429_v59 = vadd.f32 %v6914_v56, %v9067_v54  ;;  %v33_v51 = vld [vmem:[%s11870_s4 + $0x40] sm:$0xff]  ;;  %v7348_v26 = vpop.f32.mrb[10].mxu1  ;;  %v36_v56 = vld [vmem:[%s11870_s4 + $0x58] sm:$0xff] }
 0x114   :  { %v533_v29 = vpop.f32.mrb[11].mxu1 }
 0x115   :  { %v567_v60 = vmax.f32 %v523_v58, 0.0  ;;  %v526_v61 = vadd.f32 %v9069_v55, %v429_v59  ;;  %8107 = vmatprep.subr.msk.bf16.mxu1 %vm342_vm0, %v9114_v57  ;;  %v9123_v62 = vsel %vm342_vm0, %v9114_v57, 0  ;;  %v6915_v16 = vpop.f32.mrb[16].mxu0 }
 0x116   :  { %7358 = vmatpush3.bf16.xpose.msra.mxu1 %v9123_v62  ;;  %v6916_v17 = vpop.f32.mrb[17].mxu0 }
 0x117   :  { %v568_v0 = vmax.f32 %v526_v61, 0.0  ;;  %v583_v1 = vadd.f32 %v567_v60, %v32_v63  ;;  %v6917_v18 = vadd.f32 %v6916_v17, %v6915_v16  ;;  %v6918_v19 = vpop.f32.mrb[18].mxu0  ;;  %v37_v61 = vld [vmem:[%s11870_s4 + $0x60] sm:$0xff] }
 0x118   :  { %v6919_v20 = vpop.f32.mrb[19].mxu0 }
 0x119   :  { %v584_v55 = vadd.f32 %v568_v0, %v33_v51  ;;  %v6920_v22 = vadd.f32 %v6919_v20, %v6918_v19  ;;  %v434_v24 = vadd.f32 %v6917_v18, %v9067_v54 }
 0x11b   :  { %v9132_v2 = vpack.c.bf16 %v584_v55, %v583_v1  ;;  %v437_v27 = vadd.f32 %v6920_v22, %v9067_v54  ;;  %v531_v28 = vadd.f32 %v530_v25, %v434_v24 }
 0x11d   :  { %8108 = vmatprep.subr.msk.bf16.mxu1 %vm342_vm0, %v9132_v2  ;;  %v9141_v4 = vsel %vm342_vm0, %v9132_v2, 0  ;;  %v534_v31 = vadd.f32 %v533_v29, %v437_v27  ;;  %v6921_v32 = vpop.f32.mrb[20].mxu0  ;;  %v569_v35 = vmax.f32 %v531_v28, 0.0  ;;  %v39_v28 = vld [vmem:[%s11870_s4 + $0x70] sm:$0xff] }
 0x11e   :  { %7360 = vmatpush3.bf16.xpose.msra.mxu1 %v9141_v4  ;;  %v6922_v37 = vpop.f32.mrb[21].mxu0 }
 0x11f   :  { %7377 = vmatprep.subr.bf16.mxu1 %v8198_v3  ;;  %v570_v38 = vmax.f32 %v534_v31, 0.0  ;;  %v6923_v40 = vadd.f32 %v6922_v37, %v6921_v32  ;;  %v6924_v41 = vpop.f32.mrb[22].mxu0  ;;  %v585_v43 = vadd.f32 %v569_v35, %v34_v30 }
 0x120   :  { %v6925_v44 = vpop.f32.mrb[23].mxu0 }
 0x121   :  { %v586_v45 = vadd.f32 %v570_v38, %v35_v36  ;;  %v442_v47 = vadd.f32 %v6923_v40, %v9067_v54  ;;  %v6926_v48 = vadd.f32 %v6925_v44, %v6924_v41  ;;  %v40_v44 = vld [vmem:[%s11870_s4 + $0x78] sm:$0xff] }
 0x123   :  { %v9239_v50 = vpack.c.bf16 %v586_v45, %v585_v43  ;;  %v539_v52 = vadd.f32 %v7347_v23, %v442_v47  ;;  %v445_v53 = vadd.f32 %v6926_v48, %v9067_v54  ;;  %v38_v23 = vld [vmem:[%s11870_s4 + $0x68] sm:$0xff]  ;;  %v8204_v45 = vld [vmem:[%s11867_s1 + $0xd8] sm:$0xff]  }
 0x125   :  { %7362 = vmatmul.mubr.msk.bf16.vlgmr.msra.gmra.mrb[16].mxu1 %vm342_vm0, %v9147_v5  ;;  %11941 = vst [vmem:[#allocation6_spill] sm:$0xff] %v9239_v50  ;;  %v571_v58 = vmax.f32 %v539_v52, 0.0  ;;  %v542_v59 = vadd.f32 %v7348_v26, %v445_v53  ;;  %v6927_v60 = vpop.f32.mrb[24].mxu0  ;;  %v8205_v52 = vld [vmem:[%s11867_s1 + $0xe0] sm:$0xff]  }
 0x126   :  { %7365 = vmatprep.mubr.msk.bf16.mxu1 %vm342_vm0, %v9152_v6  ;;  %7378 = vmatpush3.bf16.msra.mxu1 %v8198_v3  ;;  %v6928_v63 = vpop.f32.mrb[25].mxu0  ;;  %v41_v53 = vld [vmem:[%s11870_s4 + $0x80] sm:$0xff] }
 0x127   :  { %7379 = vmatprep.subr.bf16.mxu1 %v8200_v7  ;;  %v587_v51 = vadd.f32 %v571_v58, %v36_v56  ;;  %v572_v0 = vmax.f32 %v542_v59, 0.0  ;;  %v6929_v1 = vadd.f32 %v6928_v63, %v6927_v60  ;;  %v6930_v55 = vpop.f32.mrb[26].mxu0  ;;  %v8206_v60 = vld [vmem:[%s11867_s1 + $0xe8] sm:$0xff]   ;;  %v8208_v63 = vld [vmem:[%s11867_s1 + $0xf8] sm:$0xff]  }
 0x128   :  { %v6931_v3 = vpop.f32.mrb[27].mxu0 }
 0x129   :  { %v450_v16 = vadd.f32 %v6929_v1, %v9067_v54  ;;  %v8211_v1 = vld [vmem:[%s11867_s1 + $0x110] sm:$0xff]  }
 0x12a   :  { %7380 = vmatpush3.bf16.msra.mxu1 %v8200_v7  ;;  %v588_v7 = vadd.f32 %v572_v0, %v37_v61  ;;  %v8207_v61 = vld [vmem:[%s11867_s1 + $0xf0] sm:$0xff]   ;;  %v8210_v0 = vld [vmem:[%s11867_s1 + $0x108] sm:$0xff]  }
 0x12b   :  { %7389 = vmatprep.subr.bf16.mxu1 %v8201_v8 }
 0x12c   :  { %v9252_v18 = vpack.c.bf16 %v588_v7, %v587_v51  ;;  %v8209_v51 = vld [vmem:[%s11867_s1 + $0x100] sm:$0xff]   ;;  %v8214_v7 = vld [vmem:[%s11867_s1 + $0x128] sm:$0xff]  }
 0x12d   :  { %7366 = vmatmul.mubr.msk.bf16.gmra.mrb[20].mxu1 %vm342_vm0, %v9167_v9  ;;  %v6933_v27 = vpop.f32.mrb[28].mxu0 }
 0x12e   :  { %7369 = vmatprep.mubr.msk.bf16.mxu1 %vm342_vm0, %v9172_v10  ;;  %11942 = vst [vmem:[#allocation7_spill] sm:$0xff] %v9252_v18  ;;  %v6934_v29 = vpop.f32.mrb[29].mxu0 }
 0x12f   :  { %v6935_v32 = vadd.f32 %v6934_v29, %v6933_v27  ;;  %v9413_v27 = vsel %vm342_vm0, %v9252_v18, 0 }
 0x130   :  { %11946 = vst [vmem:[#allocation11_spill] sm:$0xff] %v9413_v27 }
 0x131   :  { %v458_v37 = vadd.f32 %v6935_v32, %v9067_v54 }
 0x135   :  { %7370 = vmatmul.mubr.msk.bf16.gmra.mrb[24].mxu1 %vm342_vm0, %v9181_v11 }
 0x136   :  { %7373 = vmatprep.mubr.msk.bf16.mxu1 %vm342_vm0, %v9186_v12 }
 0x13d   :  { %7374 = vmatmul.mubr.msk.bf16.gmra.mrb[28].mxu1 %vm342_vm0, %v9195_v13 }
 0x13e   :  { %7381 = vmatprep.mubr.msk.bf16.mxu1 %vm342_vm0, %v9080_v15 }
 0x145   :  { %7382 = vmatmul.mubr.msk.bf16.vlgmr.msra.gmra.mrb[32].mxu1 %vm342_vm0, %v9097_v33 }
 0x146   :  { %7390 = vmatpush3.bf16.msra.mxu1 %v8201_v8  ;;  %7385 = vmatprep.mubr.msk.bf16.mxu1 %vm342_vm0, %v9114_v57  ;;  %v6932_v8 = vadd.f32 %v6931_v3, %v6930_v55  ;;  %v8212_v55 = vld [vmem:[%s11867_s1 + $0x118] sm:$0xff]   ;;  %v8213_v3 = vld [vmem:[%s11867_s1 + $0x120] sm:$0xff]  }
 0x147   :  { %7391 = vmatprep.subr.bf16.mxu1 %v8202_v14 }
 0x148   :  { %v453_v22 = vadd.f32 %v6932_v8, %v9067_v54  ;;  %v8215_v8 = vld [vmem:[%s11867_s1 + $0x130] sm:$0xff]  }
 0x14a   :  { %7392 = vmatpush3.bf16.msra.mxu1 %v8202_v14  ;;  %v7351_v14 = vpop.f32.mrb[12].mxu1 }
 0x14b   :  { %8109 = vmatprep.subr.msk.bf16.mxu1 %vm342_vm0, %v9080_v15  ;;  %v546_v17 = vpop.f32.mrb[13].mxu1  ;;  %v555_v41 = vadd.f32 %v7351_v14, %v458_v37  ;;  %v8217_v14 = vld [vmem:[%s11867_s1 + $0x140] sm:$0xff]  }
 0x14c   :  { %v547_v19 = vadd.f32 %v546_v17, %v450_v16  ;;  %v7352_v20 = vpop.f32.mrb[14].mxu1  ;;  %v8219_v16 = vld [vmem:[%s11867_s1 + $0x150] sm:$0xff]  }
 0x14d   :  { %7386 = vmatmul.mubr.msk.bf16.gmra.mrb[36].mxu1 %vm342_vm0, %v9132_v2  ;;  %v549_v24 = vpop.f32.mrb[15].mxu1  ;;  %v575_v47 = vmax.f32 %v555_v41, 0.0  ;;  %v8227_v17 = vld [vmem:[%s11868_s2 + $0x70] sm:$0xff]  }
 0x14e   :  { %7393 = vmatprep.mubr.msk.bf16.mxu1 %vm342_vm0, %v9080_v15  ;;  %v573_v25 = vmax.f32 %v547_v19, 0.0  ;;  %v550_v26 = vadd.f32 %v549_v24, %v453_v22  ;;  %v8221_v19 = vld [vmem:[%s11867_s1 + $0x160] sm:$0xff]   ;;  %v8223_v22 = vld [vmem:[%s11867_s1 + $0x170] sm:$0xff]  }
 0x14f   :  { %v591_v56 = vadd.f32 %v575_v47, %v40_v44  ;;  %v8225_v24 = vld [vmem:[%s11867_s1 + $0x180] sm:$0xff]  }
 0x150   :  { %v589_v30 = vadd.f32 %v573_v25, %v38_v23  ;;  %v574_v31 = vmax.f32 %v550_v26, 0.0  ;;  %v8224_v23 = vld [vmem:[%s11867_s1 + $0x178] sm:$0xff]   ;;  %v8226_v25 = vld [vmem:[%s11867_s1 + $0x188] sm:$0xff]   ;;  %v9402_v26 = vsel %vm342_vm0, %v9239_v50, 0 }
 0x151   :  { %11945 = vst [vmem:[#allocation10_spill] sm:$0xff] %v9402_v26 }
 0x152   :  { %v590_v36 = vadd.f32 %v574_v31, %v39_v28 }
 0x154   :  { %v9265_v40 = vpack.c.bf16 %v590_v36, %v589_v30 }
 0x155   :  { %7394 = vmatmul.mubr.msk.bf16.vlgmr.msra.gmra.mrb[40].mxu1 %vm342_vm0, %v9097_v33 }
 0x156   :  { %7434 = vmatpush3.bf16.xpose.msra.mxu1 %v9087_v21  ;;  %7397 = vmatprep.mubr.msk.bf16.mxu1 %vm342_vm0, %v9114_v57  ;;  %11943 = vst [vmem:[#allocation8_spill] sm:$0xff] %v9265_v40  ;;  %v9424_v28 = vsel %vm342_vm0, %v9265_v40, 0 }
 0x157   :  { %8110 = vmatprep.subr.msk.bf16.mxu1 %vm342_vm0, %v9097_v33  ;;  %11947 = vst [vmem:[#allocation12_spill] sm:$0xff] %v9424_v28 }
 0x15d   :  { %7398 = vmatmul.mubr.msk.bf16.gmra.mrb[44].mxu1 %vm342_vm0, %v9132_v2 }
 0x15e   :  { %7436 = vmatpush3.bf16.xpose.msra.mxu1 %v9104_v39  ;;  %7441 = vmatprep.mubr.msk.bf16.mxu1 %vm342_vm0, %v8203_v34  ;;  %v6936_v34 = vpop.f32.mrb[30].mxu0 }
 0x15f   :  { %8111 = vmatprep.subr.msk.bf16.mxu1 %vm342_vm0, %v9114_v57  ;;  %v6937_v35 = vpop.f32.mrb[31].mxu0 }
 0x160   :  { %v6938_v38 = vadd.f32 %v6937_v35, %v6936_v34 }
 0x162   :  { %v461_v43 = vadd.f32 %v6938_v38, %v9067_v54 }
 0x164   :  { %v558_v48 = vadd.f32 %v7352_v20, %v461_v43  ;;  %v8228_v20 = vld [vmem:[%s11868_s2 + $0x78] sm:$0xff]  }
 0x166   :  { %7438 = vmatpush3.bf16.xpose.msra.mxu1 %v9123_v62  ;;  %v576_v54 = vmax.f32 %v558_v48, 0.0 }
 0x167   :  { %8112 = vmatprep.subr.msk.bf16.mxu1 %vm342_vm0, %v9132_v2 }
 0x168   :  { %v592_v58 = vadd.f32 %v576_v54, %v41_v53 }
 0x16a   :  { %v9285_v59 = vpack.c.bf16 %v592_v58, %v591_v56 }
 0x16c   :  { %11944 = vst [vmem:[#allocation9_spill] sm:$0xff] %v9285_v59  ;;  %v9431_v29 = vsel %vm342_vm0, %v9285_v59, 0 }
 0x16d   :  { %11948 = vst [vmem:[#allocation13_spill] sm:$0xff] %v9431_v29 }
 0x16e   :  { %7440 = vmatpush3.bf16.xpose.msra.mxu1 %v9141_v4 }
 0x16f   :  { %8113 = vmatprep.subr.msk.bf16.mxu1 %vm342_vm0, %v9080_v15 }
 0x175   :  { %7442 = vmatmul.mubr.msk.bf16.vlgmr.msra.gmra.mrb[48].mxu1 %vm342_vm0, %v8204_v45 }
 0x176   :  { %7514 = vmatpush3.bf16.xpose.msra.mxu1 %v9087_v21  ;;  %7445 = vmatprep.mubr.msk.bf16.mxu1 %vm342_vm0, %v8205_v52 }
 0x177   :  { %8114 = vmatprep.subr.msk.bf16.mxu1 %vm342_vm0, %v9097_v33 }
 0x17d   :  { %7446 = vmatmul.mubr.msk.bf16.gmra.mrb[52].mxu1 %vm342_vm0, %v8206_v60 }
 0x17e   :  { %7516 = vmatpush3.bf16.xpose.msra.mxu1 %v9104_v39  ;;  %7449 = vmatprep.mubr.msk.bf16.mxu1 %vm342_vm0, %v8207_v61 }
 0x17f   :  { %8115 = vmatprep.subr.msk.bf16.mxu1 %vm342_vm0, %v9114_v57 }
 0x185   :  { %7450 = vmatmul.mubr.msk.bf16.gmra.mrb[56].mxu1 %vm342_vm0, %v8208_v63 }
 0x186   :  { %7518 = vmatpush3.bf16.xpose.msra.mxu1 %v9123_v62  ;;  %7453 = vmatprep.mubr.msk.bf16.mxu1 %vm342_vm0, %v8209_v51 }
 0x187   :  { %8116 = vmatprep.subr.msk.bf16.mxu1 %vm342_vm0, %v9132_v2 }
 0x18d   :  { %7454 = vmatmul.mubr.msk.bf16.gmra.mrb[60].mxu1 %vm342_vm0, %v8210_v0 }
 0x18e   :  { %7520 = vmatpush3.bf16.xpose.msra.mxu1 %v9141_v4  ;;  %7521 = vmatprep.mubr.msk.bf16.mxu1 %vm342_vm0, %v8211_v1 }
 0x18f   :  { %8117 = vmatprep.subr.msk.bf16.mxu1 %vm342_vm0, %v9080_v15 }
 0x195   :  { %7522 = vmatmul.mubr.msk.bf16.vlgmr.msra.gmra.mrb[64].mxu1 %vm342_vm0, %v8212_v55 }
 0x196   :  { %7594 = vmatpush3.bf16.xpose.msra.mxu1 %v9087_v21  ;;  %7525 = vmatprep.mubr.msk.bf16.mxu1 %vm342_vm0, %v8213_v3  ;;  %v8216_v21 = vld [vmem:[%s11867_s1 + $0x138] sm:$0xff]  }
 0x197   :  { %8118 = vmatprep.subr.msk.bf16.mxu1 %vm342_vm0, %v9097_v33 }
 0x19d   :  { %7526 = vmatmul.mubr.msk.bf16.gmra.mrb[68].mxu1 %vm342_vm0, %v8214_v7 }
 0x19e   :  { %7596 = vmatpush3.bf16.xpose.msra.mxu1 %v9104_v39  ;;  %7529 = vmatprep.mubr.msk.bf16.mxu1 %vm342_vm0, %v8215_v8  ;;  %v8218_v39 = vld [vmem:[%s11867_s1 + $0x148] sm:$0xff]  }
 0x19f   :  { %8119 = vmatprep.subr.msk.bf16.mxu1 %vm342_vm0, %v9114_v57 }
 0x1a5   :  { %7530 = vmatmul.mubr.msk.bf16.gmra.mrb[72].mxu1 %vm342_vm0, %v8216_v21 }
 0x1a6   :  { %7598 = vmatpush3.bf16.xpose.msra.mxu1 %v9123_v62  ;;  %7533 = vmatprep.mubr.msk.bf16.mxu1 %vm342_vm0, %v8217_v14  ;;  %v8220_v62 = vld [vmem:[%s11867_s1 + $0x158] sm:$0xff]  }
 0x1a7   :  { %8120 = vmatprep.subr.msk.bf16.mxu1 %vm342_vm0, %v9132_v2 }
 0x1ad   :  { %7534 = vmatmul.mubr.msk.bf16.gmra.mrb[76].mxu1 %vm342_vm0, %v8218_v39 }
 0x1ae   :  { %7600 = vmatpush3.bf16.xpose.msra.mxu1 %v9141_v4  ;;  %7601 = vmatprep.mubr.msk.bf16.mxu1 %vm342_vm0, %v8219_v16  ;;  %v8222_v4 = vld [vmem:[%s11867_s1 + $0x168] sm:$0xff]  }
 0x1af   :  { %7645 = vmatprep.subr.bf16.mxu1 %v8227_v17 }
 0x1b5   :  { %7602 = vmatmul.mubr.msk.bf16.vlgmr.msra.gmra.mrb[80].mxu1 %vm342_vm0, %v8220_v62 }
 0x1b6   :  { %7605 = vmatprep.mubr.msk.bf16.mxu1 %vm342_vm0, %v8221_v19  ;;  %7646 = vmatpush3.bf16.msra.mxu1 %v8227_v17 }
 0x1b7   :  { %7647 = vmatprep.subr.bf16.mxu1 %v8228_v20 }
 0x1ba   :  { %7648 = vmatpush3.bf16.msra.mxu1 %v8228_v20 }
 0x1bb   :  { %8121 = vmatprep.subr.msk.bf16.mxu1 %vm342_vm0, %v9239_v50 }
 0x1bd   :  { %7606 = vmatmul.mubr.msk.bf16.gmra.mrb[84].mxu1 %vm342_vm0, %v8222_v4 }
 0x1be   :  { %7609 = vmatprep.mubr.msk.bf16.mxu1 %vm342_vm0, %v8223_v22 }
 0x1c5   :  { %7610 = vmatmul.mubr.msk.bf16.gmra.mrb[88].mxu1 %vm342_vm0, %v8224_v23 }
 0x1c6   :  { %7613 = vmatprep.mubr.msk.bf16.mxu1 %vm342_vm0, %v8225_v24 }
 0x1cd   :  { %7614 = vmatmul.mubr.msk.bf16.gmra.mrb[92].mxu1 %vm342_vm0, %v8226_v25 }
 0x1ce   :  { %7649 = vmatprep.mubr.msk.bf16.mxu1 %vm342_vm0, %v9080_v15 }
 0x1d5   :  { %7650 = vmatmul.mubr.msk.bf16.vlgmr.msra.gmra.mrb[96].mxu1 %vm342_vm0, %v9097_v33 }
 0x1d6   :  { %7653 = vmatprep.mubr.msk.bf16.mxu1 %vm342_vm0, %v9114_v57  ;;  %7674 = vmatpush3.bf16.xpose.msra.mxu1 %v9402_v26 }
 0x1d7   :  { %8122 = vmatprep.subr.msk.bf16.mxu1 %vm342_vm0, %v9252_v18 }
 0x1dd   :  { %7654 = vmatmul.mubr.msk.bf16.gmra.mrb[100].mxu1 %vm342_vm0, %v9132_v2 }
 0x1de   :  { %7676 = vmatpush3.bf16.xpose.msra.mxu1 %v9413_v27  ;;  %7681 = vmatprep.mubr.msk.bf16.mxu1 %vm342_vm0, %v9053_v42 }
 0x1df   :  { %8123 = vmatprep.subr.msk.bf16.mxu1 %vm342_vm0, %v9265_v40 }
 0x1e6   :  { %7678 = vmatpush3.bf16.xpose.msra.mxu1 %v9424_v28 }
 0x1e7   :  { %8124 = vmatprep.subr.msk.bf16.mxu1 %vm342_vm0, %v9285_v59 }
 0x1ee   :  { %7680 = vmatpush3.bf16.xpose.msra.mxu1 %v9431_v29 }
 0x1f5   :  { %7682 = vmatmul.mubr.msk.bf16.vlgmr.msra.gmra.mrb[104].mxu1 %vm342_vm0, %v9147_v5 }
 0x1f6   :  { %7685 = vmatprep.mubr.msk.bf16.mxu1 %vm342_vm0, %v9152_v6 }
 0x1f8   :  { %v9438_v42 = vpop.f32.mrb[16].mxu1 }
 0x1f9   :  { %v9440_v30 = vpop.f32.mrb[17].mxu1  ;;  %v797_v1 = vsel %vm790_vm1, %v9438_v42, -inf }
 0x1fa   :  { %v9442_v31 = vpop.f32.mrb[18].mxu1  ;;  %v791_v60 = vsel %vm790_vm1, %v9440_v30, -inf }
 0x1fb   :  { %v9444_v32 = vpop.f32.mrb[19].mxu1  ;;  %v800_v3 = vsel %vm790_vm1, %v9442_v31, -inf }
 0x1fc   :  { %v794_v0 = vsel %vm790_vm1, %v9444_v32, -inf }
 0x1fd   :  { %7686 = vmatmul.mubr.msk.bf16.gmra.mrb[108].mxu1 %vm342_vm0, %v9167_v9 }
 0x1fe   :  { %7689 = vmatprep.mubr.msk.bf16.mxu1 %vm342_vm0, %v9172_v10 }
 0x200   :  { %v9450_v34 = vpop.f32.mrb[20].mxu1 }
 0x201   :  { %v9452_v5 = vpop.f32.mrb[21].mxu1  ;;  %v809_v62 = vsel %vm790_vm1, %v9450_v34, -inf }
 0x202   :  { %v9454_v35 = vpop.f32.mrb[22].mxu1  ;;  %v803_v21 = vsel %vm790_vm1, %v9452_v5, -inf }
 0x203   :  { %v9456_v6 = vpop.f32.mrb[23].mxu1  ;;  %v812_v20 = vsel %vm790_vm1, %v9454_v35, -inf }
 0x204   :  { %v806_v17 = vsel %vm790_vm1, %v9456_v6, -inf }
 0x205   :  { %7690 = vmatmul.mubr.msk.bf16.gmra.mrb[112].mxu1 %vm342_vm0, %v9181_v11 }
 0x206   :  { %7693 = vmatprep.mubr.msk.bf16.mxu1 %vm342_vm0, %v9186_v12 }
 0x208   :  { %v9462_v36 = vpop.f32.mrb[24].mxu1 }
 0x209   :  { %v9464_v9 = vpop.f32.mrb[25].mxu1  ;;  %v821_v10 = vsel %vm790_vm1, %v9462_v36, -inf }
 0x20a   :  { %822 = vmax.xlane.f32.xlu1 %v821_v10  ;;  %v9468_v37 = vpop.f32.mrb[26].mxu1  ;;  %v815_v38 = vsel %vm790_vm1, %v9464_v9, -inf }
 0x20b   :  { %816 = vmax.xlane.f32.xlu0 %v815_v38  ;;  %v9472_v41 = vpop.f32.mrb[27].mxu1  ;;  %v824_v11 = vsel %vm790_vm1, %v9468_v37, -inf }
 0x20c   :  { %v818_v12 = vsel %vm790_vm1, %v9472_v41, -inf }
 0x20d   :  { %7694 = vmatmul.mubr.msk.bf16.gmra.mrb[116].mxu1 %vm342_vm0, %v9195_v13 }
 0x20e   :  { %825 = vmax.xlane.f32.xlu1 %v824_v11 }
 0x20f   :  { %819 = vmax.xlane.f32.xlu0 %v818_v12 }
 0x210   :  { %v9480_v43 = vpop.f32.mrb[28].mxu1 }
 0x211   :  { %v9482_v44 = vpop.f32.mrb[29].mxu1  ;;  %v833_v52 = vsel %vm790_vm1, %v9480_v43, -inf }
 0x212   :  { %v9484_v45 = vpop.f32.mrb[30].mxu1  ;;  %v827_v47 = vsel %vm790_vm1, %v9482_v44, -inf }
 0x213   :  { %828 = vmax.xlane.f32.xlu0 %v827_v47  ;;  %v9488_v48 = vpop.f32.mrb[31].mxu1  ;;  %v836_v56 = vsel %vm790_vm1, %v9484_v45, -inf }
 0x214   :  { %v830_v13 = vsel %vm790_vm1, %v9488_v48, -inf }
 0x215   :  { %831 = vmax.xlane.f32.xlu1 %v830_v13 }
 0x217   :  { %834 = vmax.xlane.f32.xlu0 %v833_v52 }
 0x218   :  { %v7383_v53 = vpop.f32.mrb[32].mxu1 }
 0x219   :  { %v1025_v54 = vpop.f32.mrb[33].mxu1  ;;  %837 = vmax.xlane.f32.xlu1 %v836_v56 }
 0x21a   :  { %v7384_v58 = vpop.f32.mrb[34].mxu1 }
 0x21b   :  { %v9498_v61 = vpack.c.bf16 %v7384_v58, %v7383_v53  ;;  %792 = vmax.xlane.f32.xlu0 %v791_v60  ;;  %v1028_v63 = vpop.f32.mrb[35].mxu1 }
 0x21c   :  { %v9500_v51 = vpack.c.bf16 %v1028_v63, %v1025_v54 }
 0x21d   :  { %795 = vmax.xlane.f32.xlu1 %v794_v0 }
 0x21f   :  { %798 = vmax.xlane.f32.xlu0 %v797_v1 }
 0x220   :  { %v7387_v55 = vpop.f32.mrb[36].mxu1 }
 0x221   :  { %v1041_v7 = vpop.f32.mrb[37].mxu1  ;;  %801 = vmax.xlane.f32.xlu1 %v800_v3 }
 0x222   :  { %v7388_v8 = vpop.f32.mrb[38].mxu1 }
 0x223   :  { %v9510_v14 = vpack.c.bf16 %v7388_v8, %v7387_v55  ;;  %804 = vmax.xlane.f32.xlu0 %v803_v21  ;;  %v1044_v39 = vpop.f32.mrb[39].mxu1 }
 0x224   :  { %v9512_v16 = vpack.c.bf16 %v1044_v39, %v1041_v7 }
 0x225   :  { %807 = vmax.xlane.f32.xlu1 %v806_v17 }
 0x227   :  { %810 = vmax.xlane.f32.xlu0 %v809_v62 }
 0x228   :  { %v7395_v19 = vpop.f32.mrb[40].mxu1 }
 0x229   :  { %v1110_v4 = vpop.f32.mrb[41].mxu1  ;;  %813 = vmax.xlane.f32.xlu1 %v812_v20 }
 0x22a   :  { %v7396_v22 = vpop.f32.mrb[42].mxu1 }
 0x22b   :  { %v1142_v23 = vpack.c.bf16 %v7396_v22, %v7395_v19  ;;  %v1113_v24 = vpop.f32.mrb[43].mxu1 }
 0x22c   :  { %v1141_v25 = vpack.c.bf16 %v1113_v24, %v1110_v4 }
 0x22e   :  { %7401 = vmatprep.subr.bf16.mxu0 %v1141_v25 }
 0x22f   :  { %7402 = vmatpush3.bf16.msra.mxu0 %v1141_v25 }
 0x230   :  { %v7399_v10 = vpop.f32.mrb[44].mxu1  ;;  %7403 = vmatprep.subr.bf16.mxu0 %v1142_v23 }
 0x231   :  { %v1126_v38 = vpop.f32.mrb[45].mxu1 }
 0x232   :  { %v7400_v11 = vpop.f32.mrb[46].mxu1 }
 0x233   :  { %v1144_v12 = vpack.c.bf16 %v7400_v11, %v7399_v10  ;;  %v1129_v47 = vpop.f32.mrb[47].mxu1  ;;  %7404 = vmatpush3.bf16.msra.mxu0 %v1142_v23 }
 0x234   :  { %v1143_v13 = vpack.c.bf16 %v1129_v47, %v1126_v38 }
 0x236   :  { %7405 = vmatprep.subr.bf16.mxu0 %v1143_v13 }
 0x237   :  { %7406 = vmatpush3.bf16.msra.mxu0 %v1143_v13 }
 0x238   :  { %7407 = vmatprep.subr.bf16.mxu0 %v1144_v12 }
 0x23b   :  { %7408 = vmatpush3.bf16.msra.mxu0 %v1144_v12 }
 0x23c   :  { %7417 = vmatprep.subr.bf16.mxu0 %v9500_v51 }
 0x248   :  { %v9521_v52 = vpop.f32.mrb[48].mxu1 }
 0x249   :  { %v9523_v53 = vpop.f32.mrb[49].mxu1 }
 0x24a   :  { %v9525_v56 = vpop.f32.mrb[50].mxu1 }
 0x24b   :  { %v9527_v54 = vpop.f32.mrb[51].mxu1 }
 0x250   :  { %v9529_v58 = vpop.f32.mrb[52].mxu1 }
 0x251   :  { %v9531_v60 = vpop.f32.mrb[53].mxu1 }
 0x252   :  { %v9533_v63 = vpop.f32.mrb[54].mxu1 }
 0x253   :  { %v9535_v0 = vpop.f32.mrb[55].mxu1 }
 0x258   :  { %v9537_v1 = vpop.f32.mrb[56].mxu1 }
 0x259   :  { %v9539_v55 = vpop.f32.mrb[57].mxu1 }
 0x25a   :  { %v9541_v3 = vpop.f32.mrb[58].mxu1 }
 0x25b   :  { %v9543_v7 = vpop.f32.mrb[59].mxu1 }
 0x260   :  { %v9545_v8 = vpop.f32.mrb[60].mxu1 }
 0x261   :  { %v9547_v21 = vpop.f32.mrb[61].mxu1 }
 0x262   :  { %v9549_v39 = vpop.f32.mrb[62].mxu1 }
 0x263   :  { %v9551_v17 = vpop.f32.mrb[63].mxu1 }
 0x268   :  { %v9553_v62 = vpop.f32.mrb[64].mxu1 }
 0x269   :  { %v9555_v19 = vpop.f32.mrb[65].mxu1 }
 0x26a   :  { %v9557_v20 = vpop.f32.mrb[66].mxu1 }
 0x26b   :  { %v9559_v4 = vpop.f32.mrb[67].mxu1 }
 0x270   :  { %v9561_v22 = vpop.f32.mrb[68].mxu1 }
 0x271   :  { %v9563_v23 = vpop.f32.mrb[69].mxu1 }
 0x272   :  { %v9565_v24 = vpop.f32.mrb[70].mxu1 }
 0x273   :  { %v9567_v25 = vpop.f32.mrb[71].mxu1 }
 0x278   :  { %v9569_v10 = vpop.f32.mrb[72].mxu1 }
 0x279   :  { %11949 = vst [vmem:[#allocation14_spill] sm:$0xff] %v9569_v10  ;;  %v9571_v38 = vpop.f32.mrb[73].mxu1 }
 0x27a   :  { %v9573_v11 = vpop.f32.mrb[74].mxu1 }
 0x27b   :  { %11950 = vst [vmem:[#allocation15_spill] sm:$0xff] %v9573_v11  ;;  %v9575_v12 = vpop.f32.mrb[75].mxu1 }
 0x27c   :  { %11951 = vst [vmem:[#allocation16_spill] sm:$0xff] %v9575_v12 }
 0x280   :  { %v9577_v47 = vpop.f32.mrb[76].mxu1 }
 0x281   :  { %11952 = vst [vmem:[#allocation17_spill] sm:$0xff] %v9577_v47  ;;  %v9579_v13 = vpop.f32.mrb[77].mxu1 }
 0x282   :  { %11953 = vst [vmem:[#allocation18_spill] sm:$0xff] %v9579_v13  ;;  %v9581_v49 = vpop.f32.mrb[78].mxu1 }
 0x283   :  { %11954 = vst [vmem:[#allocation19_spill] sm:$0xff] %v9581_v49  ;;  %v9583_v46 = vpop.f32.mrb[79].mxu1 }
 0x284   :  { %11955 = vst [vmem:[#allocation20_spill] sm:$0xff] %v9583_v46 }
 0x288   :  { %v9585_v29 = vpop.f32.mrb[80].mxu1 }
 0x289   :  { %11956 = vst [vmem:[#allocation21_spill] sm:$0xff] %v9585_v29  ;;  %v9587_v28 = vpop.f32.mrb[81].mxu1 }
 0x28a   :  { %11957 = vst [vmem:[#allocation22_spill] sm:$0xff] %v9587_v28  ;;  %v9589_v27 = vpop.f32.mrb[82].mxu1 }
 0x28b   :  { %11958 = vst [vmem:[#allocation23_spill] sm:$0xff] %v9589_v27  ;;  %v9591_v26 = vpop.f32.mrb[83].mxu1 }
 0x28c   :  { %11959 = vst [vmem:[#allocation24_spill] sm:$0xff] %v9591_v26 }
 0x290   :  { %v9593_v59 = vpop.f32.mrb[84].mxu1 }
 0x291   :  { %11960 = vst [vmem:[#allocation25_spill] sm:$0xff] %v9593_v59  ;;  %v9595_v40 = vpop.f32.mrb[85].mxu1 }
 0x292   :  { %11961 = vst [vmem:[#allocation26_spill] sm:$0xff] %v9595_v40  ;;  %v9597_v18 = vpop.f32.mrb[86].mxu1 }
 0x293   :  { %11962 = vst [vmem:[#allocation27_spill] sm:$0xff] %v9597_v18  ;;  %v9599_v50 = vpop.f32.mrb[87].mxu1 }
 0x294   :  { %11963 = vst [vmem:[#allocation28_spill] sm:$0xff] %v9599_v50 }
 0x297   :  { %v823_v47 = vpop.xlane.xlu1 %822 }
 0x298   :  { %v849_v49 = vsub.f32 %v9462_v36, %v823_v47  ;;  %v817_v46 = vpop.xlane.xlu0 %816  ;;  %v9602_v11 = vpop.f32.mrb[88].mxu1 }
 0x299   :  { %11964 = vst [vmem:[#allocation29_spill] sm:$0xff] %v9602_v11  ;;  %v847_v29 = vsub.f32 %v9464_v9, %v817_v46  ;;  %v9605_v28 = vpop.f32.mrb[89].mxu1 }
 0x29a   :  { %11965 = vst [vmem:[#allocation30_spill] sm:$0xff] %v9605_v28  ;;  %v9607_v27 = vpop.f32.mrb[90].mxu1  ;;  %v875_v26 = vmul.f32 1.442695, %v849_v49 }
 0x29b   :  { %11966 = vst [vmem:[#allocation31_spill] sm:$0xff] %v9607_v27  ;;  %v871_v59 = vmul.f32 1.442695, %v847_v29  ;;  %v826_v13 = vpop.xlane.xlu1 %825  ;;  %v9609_v40 = vpop.f32.mrb[91].mxu1 }
 0x29c   :  { %11967 = vst [vmem:[#allocation32_spill] sm:$0xff] %v9609_v40  ;;  %v850_v18 = vsub.f32 %v9468_v37, %v826_v13  ;;  %v820_v50 = vpop.xlane.xlu0 %819 }
 0x29d   :  { %8267 = vpow2.f32 %v871_v59  ;;  %v848_v36 = vsub.f32 %v9472_v41, %v820_v50 }
 0x29e   :  { %8269 = vpow2.f32 %v875_v26  ;;  %v877_v47 = vmul.f32 1.442695, %v850_v18 }
 0x29f   :  { %v873_v11 = vmul.f32 1.442695, %v848_v36 }
 0x2a0   :  { %v829_v12 = vpop.xlane.xlu0 %828  ;;  %v9613_v46 = vpop.f32.mrb[92].mxu1 }
 0x2a1   :  { %11968 = vst [vmem:[#allocation33_spill] sm:$0xff] %v9613_v46  ;;  %8271 = vpow2.f32 %v873_v11  ;;  %v851_v9 = vsub.f32 %v9482_v44, %v829_v12  ;;  %v9616_v49 = vpop.f32.mrb[93].mxu1 }
 0x2a2   :  { %11969 = vst [vmem:[#allocation34_spill] sm:$0xff] %v9616_v49  ;;  %v832_v29 = vpop.xlane.xlu1 %831  ;;  %v9618_v27 = vpop.f32.mrb[94].mxu1  ;;  %8273 = vpow2.f32 %v877_v47 }
 0x2a3   :  { %11970 = vst [vmem:[#allocation35_spill] sm:$0xff] %v9618_v27  ;;  %v879_v37 = vmul.f32 1.442695, %v851_v9  ;;  %v852_v59 = vsub.f32 %v9488_v48, %v832_v29  ;;  %v9621_v13 = vpop.f32.mrb[95].mxu1 }
 0x2a4   :  { %11971 = vst [vmem:[#allocation36_spill] sm:$0xff] %v9621_v13  ;;  %v835_v50 = vpop.xlane.xlu0 %834 }
 0x2a5   :  { %8275 = vpow2.f32 %v879_v37  ;;  %v881_v18 = vmul.f32 1.442695, %v852_v59  ;;  %v853_v26 = vsub.f32 %v9480_v43, %v835_v50 }
 0x2a6   :  { %v838_v41 = vpop.xlane.xlu1 %837 }
 0x2a7   :  { %v9624_v11 = vpop.eup %8267  ;;  %8277 = vpow2.f32 %v881_v18  ;;  %v883_v44 = vmul.f32 1.442695, %v853_v26  ;;  %v854_v12 = vsub.f32 %v9484_v45, %v838_v41 }
 0x2a8   :  { %v7651_v36 = vpop.f32.mrb[96].mxu1  ;;  %v793_v27 = vpop.xlane.xlu0 %792  ;;  %v911_v47 = vsel %vm790_vm1, %v9624_v11, 0.0 }
 0x2a9   :  { %v9629_v48 = vpop.eup %8269  ;;  %8279 = vpow2.f32 %v883_v44  ;;  %v885_v9 = vmul.f32 1.442695, %v854_v12  ;;  %v839_v29 = vsub.f32 %v9440_v30, %v793_v27  ;;  %v3282_v37 = vpop.f32.mrb[97].mxu1  ;;  %912 = vadd.xlane.f32.xlu0 %v911_v47 }
 0x2aa   :  { %v7652_v43 = vpop.f32.mrb[98].mxu1  ;;  %v796_v59 = vpop.xlane.xlu1 %795  ;;  %v917_v44 = vsel %vm790_vm1, %v9629_v48, 0.0 }
 0x2ab   :  { %v9632_v50 = vpop.eup %8271  ;;  %8281 = vpow2.f32 %v885_v9  ;;  %v855_v18 = vmul.f32 1.442695, %v839_v29  ;;  %v9634_v45 = vpack.c.bf16 %v7652_v43, %v7651_v36  ;;  %v3285_v26 = vpop.f32.mrb[99].mxu1  ;;  %v840_v41 = vsub.f32 %v9444_v32, %v796_v59 }
 0x2ac   :  { %v9637_v13 = vpack.c.bf16 %v3285_v26, %v3282_v37  ;;  %v799_v46 = vpop.xlane.xlu0 %798  ;;  %v914_v27 = vsel %vm790_vm1, %v9632_v50, 0.0  ;;  %v9643_v30 = vpop.eup %8273 }
 0x2ad   :  { %11972 = vst [vmem:[#allocation37_spill] sm:$0xff] %v9634_v45  ;;  %8283 = vpow2.f32 %v855_v18  ;;  %v857_v12 = vmul.f32 1.442695, %v840_v41  ;;  %v841_v47 = vsub.f32 %v9438_v42, %v799_v46  ;;  %918 = vadd.xlane.f32.xlu0 %v917_v44  ;;  %915 = vadd.xlane.f32.xlu1 %v914_v27  ;;  %v920_v18 = vsel %vm790_vm1, %v9643_v30, 0.0 }
 0x2ae   :  { %11973 = vst [vmem:[#allocation38_spill] sm:$0xff] %v9637_v13  ;;  %v802_v36 = vpop.xlane.xlu1 %801 }
 0x2af   :  { %v9646_v9 = vpop.eup %8275  ;;  %8285 = vpow2.f32 %v857_v12  ;;  %v859_v32 = vmul.f32 1.442695, %v841_v47  ;;  %v842_v29 = vsub.f32 %v9442_v31, %v802_v36 }
 0x2b0   :  { %v7655_v37 = vpop.f32.mrb[100].mxu1  ;;  %v805_v43 = vpop.xlane.xlu0 %804  ;;  %v923_v59 = vsel %vm790_vm1, %v9646_v9, 0.0 }
 0x2b1   :  { %v9653_v26 = vpop.eup %8277  ;;  %8287 = vpow2.f32 %v859_v32  ;;  %v861_v42 = vmul.f32 1.442695, %v842_v29  ;;  %v843_v46 = vsub.f32 %v9452_v5, %v805_v43  ;;  %v3298_v41 = vpop.f32.mrb[101].mxu1  ;;  %924 = vadd.xlane.f32.xlu0 %v923_v59  ;;  %921 = vadd.xlane.f32.xlu1 %v920_v18 }
 0x2b2   :  { %v7656_v44 = vpop.f32.mrb[102].mxu1  ;;  %v808_v27 = vpop.xlane.xlu1 %807  ;;  %v926_v29 = vsel %vm790_vm1, %v9653_v26, 0.0 }
 0x2b3   :  { %v9656_v31 = vpop.eup %8279  ;;  %8289 = vpow2.f32 %v861_v42  ;;  %v863_v12 = vmul.f32 1.442695, %v843_v46  ;;  %v9658_v47 = vpack.c.bf16 %v7656_v44, %v7655_v37  ;;  %v3301_v36 = vpop.f32.mrb[103].mxu1  ;;  %v844_v45 = vsub.f32 %v9456_v6, %v808_v27 }
 0x2b4   :  { %v9661_v13 = vpack.c.bf16 %v3301_v36, %v3298_v41  ;;  %v811_v32 = vpop.xlane.xlu0 %810  ;;  %v929_v5 = vsel %vm790_vm1, %v9656_v31, 0.0 }
 0x2b5   :  { %11974 = vst [vmem:[#allocation39_spill] sm:$0xff] %v9658_v47  ;;  %v9667_v43 = vpop.eup %8281  ;;  %8291 = vpow2.f32 %v863_v12  ;;  %v865_v59 = vmul.f32 1.442695, %v844_v45  ;;  %v845_v18 = vsub.f32 %v9450_v34, %v811_v32  ;;  %930 = vadd.xlane.f32.xlu0 %v929_v5  ;;  %927 = vadd.xlane.f32.xlu1 %v926_v29 }
 0x2b6   :  { %11975 = vst [vmem:[#allocation40_spill] sm:$0xff] %v9661_v13  ;;  %v814_v37 = vpop.xlane.xlu1 %813  ;;  %v932_v44 = vsel %vm790_vm1, %v9667_v43, 0.0 }
 0x2b7   :  { %v9670_v42 = vpop.eup %8283  ;;  %8293 = vpow2.f32 %v865_v59  ;;  %v867_v6 = vmul.f32 1.442695, %v845_v18  ;;  %v846_v46 = vsub.f32 %v9454_v35, %v814_v37 }
 0x2b8   :  { %v887_v41 = vsel %vm790_vm1, %v9670_v42, 0.0 }
 0x2b9   :  { %v9677_v27 = vpop.eup %8285  ;;  %8295 = vpow2.f32 %v867_v6  ;;  %v869_v45 = vmul.f32 1.442695, %v846_v46  ;;  %888 = vadd.xlane.f32.xlu0 %v887_v41  ;;  %933 = vadd.xlane.f32.xlu1 %v932_v44  ;;  %v1476_v41 = vsel %vm790_vm1, %v9523_v53, -inf }
 0x2ba   :  { %v890_v35 = vsel %vm790_vm1, %v9677_v27, 0.0 }
 0x2bb   :  { %v9679_v34 = vpop.eup %8287  ;;  %8297 = vpow2.f32 %v869_v45  ;;  %v1482_v45 = vsel %vm790_vm1, %v9521_v52, -inf }
 0x2bc   :  { %v893_v12 = vsel %vm790_vm1, %v9679_v34, 0.0 }
 0x2bd   :  { %v9685_v36 = vpop.eup %8289  ;;  %894 = vadd.xlane.f32.xlu0 %v893_v12  ;;  %891 = vadd.xlane.f32.xlu1 %v890_v35  ;;  %v1479_v12 = vsel %vm790_vm1, %v9527_v54, -inf  ;;  %v1488_v35 = vsel %vm790_vm1, %v9531_v60, -inf }
 0x2be   :  { %v896_v29 = vsel %vm790_vm1, %v9685_v36, 0.0 }
 0x2bf   :  { %v9687_v32 = vpop.eup %8291 }
 0x2c0   :  { %v899_v5 = vsel %vm790_vm1, %v9687_v32, 0.0 }
 0x2c1   :  { %v9693_v59 = vpop.eup %8293  ;;  %900 = vadd.xlane.f32.xlu0 %v899_v5  ;;  %897 = vadd.xlane.f32.xlu1 %v896_v29  ;;  %v1485_v5 = vsel %vm790_vm1, %v9525_v56, -inf  ;;  %v1494_v29 = vsel %vm790_vm1, %v9529_v58, -inf }
 0x2c2   :  { %v902_v6 = vsel %vm790_vm1, %v9693_v59, 0.0 }
 0x2c3   :  { %v9695_v18 = vpop.eup %8295 }
 0x2c4   :  { %v905_v37 = vsel %vm790_vm1, %v9695_v18, 0.0 }
 0x2c5   :  { %v9701_v46 = vpop.eup %8297  ;;  %906 = vadd.xlane.f32.xlu0 %v905_v37  ;;  %903 = vadd.xlane.f32.xlu1 %v902_v6  ;;  %v1491_v37 = vsel %vm790_vm1, %v9535_v0, -inf  ;;  %v1497_v6 = vsel %vm790_vm1, %v9533_v63, -inf }
 0x2c6   :  { %v908_v44 = vsel %vm790_vm1, %v9701_v46, 0.0 }
 0x2c9   :  { %1477 = vmax.xlane.f32.xlu0 %v1476_v41  ;;  %909 = vadd.xlane.f32.xlu1 %v908_v44 }
 0x2cd   :  { %1483 = vmax.xlane.f32.xlu0 %v1482_v45  ;;  %1480 = vmax.xlane.f32.xlu1 %v1479_v12 }
 0x2d1   :  { %1489 = vmax.xlane.f32.xlu0 %v1488_v35  ;;  %1486 = vmax.xlane.f32.xlu1 %v1485_v5 }
 0x2d5   :  { %1495 = vmax.xlane.f32.xlu0 %v1494_v29  ;;  %1492 = vmax.xlane.f32.xlu1 %v1491_v37 }
 0x2d9   :  { %1498 = vmax.xlane.f32.xlu1 %v1497_v6 }
 0x336   :  { %v913_v41 = vpop.xlane.xlu0 %912 }
 0x337   :  { %8299 = vrcp.f32 %v913_v41 }
 0x33a   :  { %v919_v44 = vpop.xlane.xlu0 %918  ;;  %v916_v45 = vpop.xlane.xlu1 %915 }
 0x33b   :  { %8301 = vrcp.f32 %v916_v45 }
 0x33c   :  { %8303 = vrcp.f32 %v919_v44 }
 0x33e   :  { %v925_v12 = vpop.xlane.xlu0 %924  ;;  %v922_v35 = vpop.xlane.xlu1 %921 }
 0x33f   :  { %8305 = vrcp.f32 %v922_v35 }
 0x340   :  { %8307 = vrcp.f32 %v925_v12 }
 0x341   :  { %v8300_v13 = vpop.eup %8299 }
 0x342   :  { %v931_v5 = vpop.xlane.xlu0 %930  ;;  %v928_v47 = vpop.xlane.xlu1 %927  ;;  %v959_v6 = vmul.f32 %v8300_v13, %v9624_v11 }
 0x343   :  { %8309 = vrcp.f32 %v928_v47 }
 0x344   :  { %8311 = vrcp.f32 %v931_v5 }
 0x345   :  { %v8302_v29 = vpop.eup %8301 }
 0x346   :  { %v889_v37 = vpop.xlane.xlu0 %888  ;;  %v934_v49 = vpop.xlane.xlu1 %933  ;;  %v960_v41 = vmul.f32 %v8302_v29, %v9632_v50 }
 0x347   :  { %v8304_v40 = vpop.eup %8303  ;;  %8313 = vrcp.f32 %v934_v49 }
 0x348   :  { %v971_v45 = vpack.c.bf16 %v960_v41, %v959_v6  ;;  %8315 = vrcp.f32 %v889_v37  ;;  %v961_v12 = vmul.f32 %v8304_v40, %v9629_v48 }
 0x349   :  { %v8306_v44 = vpop.eup %8305 }
 0x34a   :  { %v895_v28 = vpop.xlane.xlu0 %894  ;;  %v892_v35 = vpop.xlane.xlu1 %891  ;;  %v962_v10 = vmul.f32 %v8306_v44, %v9643_v30  ;;  %7409 = vmatprep.mubr.msk.bf16.mxu0 %vm790_vm1, %v971_v45 }
 0x34b   :  { %v8308_v47 = vpop.eup %8307  ;;  %8317 = vrcp.f32 %v892_v35 }
 0x34c   :  { %v972_v5 = vpack.c.bf16 %v962_v10, %v961_v12  ;;  %8319 = vrcp.f32 %v895_v28  ;;  %v963_v49 = vmul.f32 %v8308_v47, %v9646_v9  ;;  %v8229_v47 = vld [vmem:[%s11868_s2 + $0x20] sm:$0xff]  }
 0x34d   :  { %v8310_v13 = vpop.eup %8309 }
 0x34e   :  { %v901_v11 = vpop.xlane.xlu0 %900  ;;  %v898_v50 = vpop.xlane.xlu1 %897  ;;  %7410 = vmatmul.mubr.msk.bf16.vlgmr.msra.gmra.mrb[32].mxu0 %vm790_vm1, %v972_v5  ;;  %v964_v29 = vmul.f32 %v8310_v13, %v9653_v26 }
 0x34f   :  { %v8312_v37 = vpop.eup %8311  ;;  %7418 = vmatpush3.bf16.msra.mxu0 %v9500_v51  ;;  %8321 = vrcp.f32 %v898_v50 }
 0x350   :  { %8323 = vrcp.f32 %v901_v11  ;;  %7419 = vmatprep.subr.bf16.mxu0 %v9498_v61  ;;  %v973_v40 = vpack.c.bf16 %v964_v29, %v963_v49  ;;  %v965_v30 = vmul.f32 %v8312_v37, %v9656_v31 }
 0x351   :  { %v8314_v48 = vpop.eup %8313 }
 0x352   :  { %v907_v10 = vpop.xlane.xlu0 %906  ;;  %v904_v28 = vpop.xlane.xlu1 %903  ;;  %7413 = vmatprep.mubr.msk.bf16.mxu0 %vm790_vm1, %v973_v40  ;;  %v966_v6 = vmul.f32 %v8314_v48, %v9667_v43 }
 0x353   :  { %v8316_v9 = vpop.eup %8315  ;;  %7420 = vmatpush3.bf16.msra.mxu0 %v9498_v61  ;;  %8325 = vrcp.f32 %v904_v28 }
 0x354   :  { %8327 = vrcp.f32 %v907_v10  ;;  %7421 = vmatprep.subr.bf16.mxu0 %v9512_v16  ;;  %v974_v51 = vpack.c.bf16 %v966_v6, %v965_v30  ;;  %v951_v31 = vmul.f32 %v8316_v9, %v9670_v42 }
 0x355   :  { %v8318_v26 = vpop.eup %8317 }
 0x356   :  { %v1478_v41 = vpop.xlane.xlu0 %1477  ;;  %v910_v45 = vpop.xlane.xlu1 %909  ;;  %7414 = vmatmul.mubr.msk.bf16.gmra.mrb[36].mxu0 %vm790_vm1, %v974_v51  ;;  %v952_v43 = vmul.f32 %v8318_v26, %v9677_v27 }
 0x357   :  { %v8320_v44 = vpop.eup %8319  ;;  %v1524_v35 = vsub.f32 %v9523_v53, %v1478_v41  ;;  %8329 = vrcp.f32 %v910_v45  ;;  %7422 = vmatpush3.bf16.msra.mxu0 %v9512_v16 }
 0x358   :  { %7423 = vmatprep.subr.bf16.mxu0 %v9510_v14  ;;  %v967_v12 = vpack.c.bf16 %v952_v43, %v951_v31  ;;  %v953_v53 = vmul.f32 %v8320_v44, %v9679_v34  ;;  %v8230_v34 = vld [vmem:[%s11868_s2 + $0x28] sm:$0xff]  }
 0x359   :  { %v1540_v61 = vmul.f32 1.442695, %v1524_v35  ;;  %v8322_v5 = vpop.eup %8321 }
 0x35a   :  { %v1484_v13 = vpop.xlane.xlu0 %1483  ;;  %v1481_v11 = vpop.xlane.xlu1 %1480  ;;  %v954_v42 = vmul.f32 %v8322_v5, %v9685_v36  ;;  %7425 = vmatprep.mubr.msk.bf16.mxu0 %vm790_vm1, %v967_v12 }
 0x35b   :  { %v8324_v50 = vpop.eup %8323  ;;  %8331 = vpow2.f32 %v1540_v61  ;;  %v1526_v27 = vsub.f32 %v9521_v52, %v1484_v13  ;;  %v1525_v16 = vsub.f32 %v9527_v54, %v1481_v11  ;;  %7424 = vmatpush3.bf16.msra.mxu0 %v9510_v14 }
 0x35c   :  { %v968_v49 = vpack.c.bf16 %v954_v42, %v953_v53  ;;  %7457 = vmatprep.subr.bf16.mxu0 %v8229_v47  ;;  %v955_v10 = vmul.f32 %v8324_v50, %v9687_v32 }
 0x35d   :  { %v1544_v29 = vmul.f32 1.442695, %v1526_v27  ;;  %v1542_v37 = vmul.f32 1.442695, %v1525_v16  ;;  %v8326_v40 = vpop.eup %8325  ;;  %v1500_v16 = vsel %vm790_vm1, %v9539_v55, -inf }
 0x35e   :  { %v1490_v48 = vpop.xlane.xlu0 %1489  ;;  %v1487_v36 = vpop.xlane.xlu1 %1486  ;;  %7426 = vmatmul.mubr.msk.bf16.vlgmr.msra.gmra.mrb[32].mxu0 %vm790_vm1, %v968_v49  ;;  %v956_v54 = vmul.f32 %v8326_v40, %v9693_v59  ;;  %v1512_v40 = vsel %vm790_vm1, %v9547_v21, -inf }
 0x35f   :  { %v8328_v52 = vpop.eup %8327  ;;  %8333 = vpow2.f32 %v1544_v29  ;;  %v1528_v28 = vsub.f32 %v9531_v60, %v1490_v48  ;;  %v1527_v14 = vsub.f32 %v9525_v56, %v1487_v36  ;;  %7458 = vmatpush3.bf16.msra.mxu0 %v8229_v47  ;;  %v1509_v48 = vsel %vm790_vm1, %v9541_v3, -inf }
 0x360   :  { %8335 = vpow2.f32 %v1542_v37  ;;  %v969_v51 = vpack.c.bf16 %v956_v54, %v955_v10  ;;  %7459 = vmatprep.subr.bf16.mxu0 %v8230_v34  ;;  %v957_v32 = vmul.f32 %v8328_v52, %v9695_v18  ;;  %v1506_v37 = vsel %vm790_vm1, %v9537_v1, -inf }
 0x361   :  { %v8330_v30 = vpop.eup %8329  ;;  %v1548_v6 = vmul.f32 1.442695, %v1528_v28  ;;  %v1546_v9 = vmul.f32 1.442695, %v1527_v14  ;;  %v1518_v36 = vsel %vm790_vm1, %v9545_v8, -inf  ;;  %v1515_v10 = vsel %vm790_vm1, %v9551_v17, -inf }
 0x362   :  { %v1496_v26 = vpop.xlane.xlu0 %1495  ;;  %v1493_v41 = vpop.xlane.xlu1 %1492  ;;  %v958_v45 = vmul.f32 %v8330_v30, %v9701_v46  ;;  %7429 = vmatprep.mubr.msk.bf16.mxu0 %vm790_vm1, %v969_v51  ;;  %v1521_v52 = vsel %vm790_vm1, %v9549_v39, -inf }
 0x363   :  { %8337 = vpow2.f32 %v1548_v6  ;;  %v1530_v60 = vsub.f32 %v9529_v58, %v1496_v26  ;;  %v1529_v56 = vsub.f32 %v9535_v0, %v1493_v41  ;;  %7460 = vmatpush3.bf16.msra.mxu0 %v8230_v34  ;;  %v1503_v34 = vsel %vm790_vm1, %v9543_v7, -inf }
 0x364   :  { %8339 = vpow2.f32 %v1546_v9  ;;  %v970_v59 = vpack.c.bf16 %v958_v45, %v957_v32 }
 0x365   :  { %v9764_v44 = vpop.eup %8331  ;;  %v1552_v35 = vmul.f32 1.442695, %v1530_v60  ;;  %v1550_v31 = vmul.f32 1.442695, %v1529_v56 }
 0x366   :  { %v1499_v43 = vpop.xlane.xlu1 %1498  ;;  %v1572_v18 = vsel %vm790_vm1, %v9764_v44, 0.0  ;;  %7430 = vmatmul.mubr.msk.bf16.gmra.mrb[36].mxu0 %vm790_vm1, %v970_v59 }
 0x367   :  { %8341 = vpow2.f32 %v1552_v35  ;;  %v1531_v58 = vsub.f32 %v9533_v63, %v1499_v43  ;;  %1573 = vadd.xlane.f32.xlu0 %v1572_v18  ;;  %7461 = vmatprep.mubr.msk.bf16.mxu0 %vm342_vm0, %v9080_v15 }
 0x368   :  { %8343 = vpow2.f32 %v1550_v31 }
 0x369   :  { %v9772_v0 = vpop.eup %8333  ;;  %v1554_v46 = vmul.f32 1.442695, %v1531_v58 }
 0x36a   :  { %v8336_v61 = vpop.eup %8335  ;;  %v1578_v12 = vsel %vm790_vm1, %v9772_v0, 0.0 }
 0x36b   :  { %8345 = vpow2.f32 %v1554_v46  ;;  %1579 = vadd.xlane.f32.xlu0 %v1578_v12  ;;  %v1575_v47 = vsel %vm790_vm1, %v8336_v61, 0.0 }
 0x36c   :  { %1576 = vadd.xlane.f32.xlu1 %v1575_v47 }
 0x36d   :  { %v9777_v5 = vpop.eup %8337 }
 0x36e   :  { %v9779_v63 = vpop.eup %8339  ;;  %v1584_v53 = vsel %vm790_vm1, %v9777_v5, 0.0  ;;  %7462 = vmatmul.mubr.msk.bf16.vlgmr.msra.gmra.mrb[40].mxu0 %vm342_vm0, %v9097_v33 }
 0x36f   :  { %1585 = vadd.xlane.f32.xlu0 %v1584_v53  ;;  %v1581_v13 = vsel %vm790_vm1, %v9779_v63, 0.0  ;;  %7465 = vmatprep.mubr.msk.bf16.mxu0 %vm342_vm0, %v9114_v57 }
 0x370   :  { %1582 = vadd.xlane.f32.xlu1 %v1581_v13 }
 0x371   :  { %v9789_v11 = vpop.eup %8341 }
 0x372   :  { %v9791_v50 = vpop.eup %8343  ;;  %v1590_v42 = vsel %vm790_vm1, %v9789_v11, 0.0 }
 0x373   :  { %1591 = vadd.xlane.f32.xlu0 %v1590_v42  ;;  %v1587_v27 = vsel %vm790_vm1, %v9791_v50, 0.0 }
 0x374   :  { %1588 = vadd.xlane.f32.xlu1 %v1587_v27 }
 0x375   :  { %v9799_v49 = vpop.eup %8345 }
 0x376   :  { %v1593_v29 = vsel %vm790_vm1, %v9799_v49, 0.0  ;;  %7466 = vmatmul.mubr.msk.bf16.gmra.mrb[44].mxu0 %vm342_vm0, %v9132_v2 }
 0x377   :  { %1501 = vmax.xlane.f32.xlu0 %v1500_v16 }
 0x378   :  { %1594 = vadd.xlane.f32.xlu1 %v1593_v29 }
 0x37b   :  { %1507 = vmax.xlane.f32.xlu0 %v1506_v37 }
 0x37c   :  { %1504 = vmax.xlane.f32.xlu1 %v1503_v34 }
 0x37f   :  { %1513 = vmax.xlane.f32.xlu0 %v1512_v40 }
 0x380   :  { %1510 = vmax.xlane.f32.xlu1 %v1509_v48 }
 0x383   :  { %1519 = vmax.xlane.f32.xlu0 %v1518_v36 }
 0x384   :  { %1516 = vmax.xlane.f32.xlu1 %v1515_v10 }
 0x388   :  { %1522 = vmax.xlane.f32.xlu1 %v1521_v52 }
 0x3f4   :  { %v1574_v28 = vpop.xlane.xlu0 %1573 }
 0x3f5   :  { %8347 = vrcp.f32 %v1574_v28 }
 0x3f8   :  { %v9819_v14 = vpop.xlane.xlu0 %1579 }
 0x3f9   :  { %v1577_v54 = vpop.xlane.xlu1 %1576 }
 0x3fa   :  { %8349 = vrcp.f32 %v1577_v54 }
 0x3fc   :  { %v9821_v30 = vpop.xlane.xlu0 %1585 }
 0x3fd   :  { %v9823_v6 = vpop.xlane.xlu1 %1582 }
 0x3ff   :  { %v8348_v26 = vpop.eup %8347 }
 0x400   :  { %v9825_v9 = vpop.xlane.xlu0 %1591  ;;  %v1636_v56 = vmul.f32 %v8348_v26, %v9764_v44 }
 0x401   :  { %v9827_v51 = vpop.xlane.xlu1 %1588 }
 0x404   :  { %v8350_v41 = vpop.eup %8349  ;;  %v1502_v32 = vpop.xlane.xlu0 %1501 }
 0x405   :  { %v1532_v45 = vsub.f32 %v9539_v55, %v1502_v32  ;;  %v9830_v60 = vpop.xlane.xlu1 %1594  ;;  %v1637_v59 = vmul.f32 %v8350_v41, %v8336_v61 }
 0x407   :  { %v1556_v35 = vmul.f32 1.442695, %v1532_v45  ;;  %v1652_v31 = vpack.c.bf16 %v1637_v59, %v1636_v56  ;;  %v2177_v56 = vsel %vm790_vm1, %v9555_v19, -inf }
 0x408   :  { %v1508_v43 = vpop.xlane.xlu0 %1507 }
 0x409   :  { %8351 = vpow2.f32 %v1556_v35  ;;  %v1534_v18 = vsub.f32 %v9537_v1, %v1508_v43  ;;  %7477 = vmatprep.mubr.msk.bf16.mxu0 %vm790_vm1, %v1652_v31  ;;  %v1505_v58 = vpop.xlane.xlu1 %1504  ;;  %v2183_v31 = vsel %vm790_vm1, %v9553_v62, -inf  ;;  %v2180_v43 = vsel %vm790_vm1, %v9559_v4, -inf }
 0x40a   :  { %v1533_v46 = vsub.f32 %v9543_v7, %v1505_v58  ;;  %v2186_v58 = vsel %vm790_vm1, %v9557_v20, -inf }
 0x40b   :  { %v1560_v12 = vmul.f32 1.442695, %v1534_v18  ;;  %v2189_v18 = vsel %vm790_vm1, %v9563_v23, -inf }
 0x40c   :  { %v1558_v47 = vmul.f32 1.442695, %v1533_v46  ;;  %v1514_v53 = vpop.xlane.xlu0 %1513  ;;  %v2195_v46 = vsel %vm790_vm1, %v9561_v22, -inf }
 0x40d   :  { %8353 = vpow2.f32 %v1560_v12  ;;  %v1536_v55 = vsub.f32 %v9547_v21, %v1514_v53  ;;  %v1511_v13 = vpop.xlane.xlu1 %1510  ;;  %v2192_v12 = vsel %vm790_vm1, %v9567_v25, -inf }
 0x40e   :  { %8355 = vpow2.f32 %v1558_v47  ;;  %v1535_v44 = vsub.f32 %v9541_v3, %v1511_v13  ;;  %v2198_v47 = vsel %vm790_vm1, %v9565_v24, -inf }
 0x40f   :  { %v1564_v61 = vmul.f32 1.442695, %v1536_v55 }
 0x410   :  { %v1562_v42 = vmul.f32 1.442695, %v1535_v44  ;;  %v1520_v27 = vpop.xlane.xlu0 %1519 }
 0x411   :  { %8357 = vpow2.f32 %v1564_v61  ;;  %v1538_v1 = vsub.f32 %v9545_v8, %v1520_v27  ;;  %v1517_v16 = vpop.xlane.xlu1 %1516 }
 0x412   :  { %8359 = vpow2.f32 %v1562_v42  ;;  %v1537_v7 = vsub.f32 %v9551_v17, %v1517_v16 }
 0x413   :  { %v9840_v29 = vpop.eup %8351  ;;  %v1568_v37 = vmul.f32 1.442695, %v1538_v1 }
 0x414   :  { %v1566_v34 = vmul.f32 1.442695, %v1537_v7  ;;  %v1596_v21 = vsel %vm790_vm1, %v9840_v29, 0.0 }
 0x415   :  { %8361 = vpow2.f32 %v1568_v37  ;;  %v1523_v40 = vpop.xlane.xlu1 %1522  ;;  %1597 = vadd.xlane.f32.xlu0 %v1596_v21 }
 0x416   :  { %8363 = vpow2.f32 %v1566_v34  ;;  %v1539_v3 = vsub.f32 %v9549_v39, %v1523_v40  ;;  %v8231_v40 = vld [vmem:[%s11868_s2 + $0x30] sm:$0xff]  }
 0x417   :  { %v9845_v48 = vpop.eup %8353 }
 0x418   :  { %v9847_v8 = vpop.eup %8355  ;;  %v1570_v36 = vmul.f32 1.442695, %v1539_v3  ;;  %v1602_v17 = vsel %vm790_vm1, %v9845_v48, 0.0 }
 0x419   :  { %1603 = vadd.xlane.f32.xlu0 %v1602_v17  ;;  %v1599_v10 = vsel %vm790_vm1, %v9847_v8, 0.0  ;;  %v8232_v17 = vld [vmem:[%s11868_s2 + $0x38] sm:$0xff]  }
 0x41a   :  { %8365 = vpow2.f32 %v1570_v36  ;;  %1600 = vadd.xlane.f32.xlu1 %v1599_v10 }
 0x41b   :  { %v9853_v52 = vpop.eup %8357  ;;  %8367 = vrcp.f32 %v9823_v6 }
 0x41c   :  { %v9855_v28 = vpop.eup %8359  ;;  %v1608_v39 = vsel %vm790_vm1, %v9853_v52, 0.0  ;;  %8369 = vrcp.f32 %v9827_v51 }
 0x41d   :  { %1609 = vadd.xlane.f32.xlu0 %v1608_v39  ;;  %v1605_v54 = vsel %vm790_vm1, %v9855_v28, 0.0  ;;  %8371 = vrcp.f32 %v9819_v14 }
 0x41e   :  { %1606 = vadd.xlane.f32.xlu1 %v1605_v54  ;;  %8373 = vrcp.f32 %v9821_v30 }
 0x41f   :  { %v9861_v26 = vpop.eup %8361  ;;  %8375 = vrcp.f32 %v9830_v60 }
 0x420   :  { %v9863_v41 = vpop.eup %8363  ;;  %v1614_v32 = vsel %vm790_vm1, %v9861_v26, 0.0  ;;  %8377 = vrcp.f32 %v9825_v9 }
 0x421   :  { %1615 = vadd.xlane.f32.xlu0 %v1614_v32  ;;  %v1611_v45 = vsel %vm790_vm1, %v9863_v41, 0.0 }
 0x422   :  { %1612 = vadd.xlane.f32.xlu1 %v1611_v45 }
 0x424   :  { %v9871_v59 = vpop.eup %8365 }
 0x425   :  { %2178 = vmax.xlane.f32.xlu0 %v2177_v56  ;;  %v1617_v35 = vsel %vm790_vm1, %v9871_v59, 0.0  ;;  %v8368_v34 = vpop.eup %8367 }
 0x426   :  { %1618 = vadd.xlane.f32.xlu1 %v1617_v35  ;;  %v8370_v51 = vpop.eup %8369  ;;  %v1639_v21 = vmul.f32 %v8368_v34, %v9779_v63 }
 0x427   :  { %v8372_v14 = vpop.eup %8371  ;;  %v1641_v60 = vmul.f32 %v8370_v51, %v9791_v50 }
 0x428   :  { %v8374_v30 = vpop.eup %8373  ;;  %v1638_v3 = vmul.f32 %v8372_v14, %v9772_v0 }
 0x429   :  { %2184 = vmax.xlane.f32.xlu0 %v2183_v31  ;;  %v1640_v36 = vmul.f32 %v8374_v30, %v9777_v5  ;;  %v8376_v10 = vpop.eup %8375 }
 0x42a   :  { %2181 = vmax.xlane.f32.xlu1 %v2180_v43  ;;  %v1653_v9 = vpack.c.bf16 %v1639_v21, %v1638_v3  ;;  %v8378_v39 = vpop.eup %8377  ;;  %v1643_v50 = vmul.f32 %v8376_v10, %v9799_v49 }
 0x42b   :  { %v1654_v63 = vpack.c.bf16 %v1641_v60, %v1640_v36  ;;  %v1642_v0 = vmul.f32 %v8378_v39, %v9789_v11 }
 0x42d   :  { %2190 = vmax.xlane.f32.xlu0 %v2189_v18  ;;  %v1655_v5 = vpack.c.bf16 %v1643_v50, %v1642_v0  ;;  %v2201_v0 = vsel %vm790_vm1, %v9571_v38, -inf }
 0x42e   :  { %2187 = vmax.xlane.f32.xlu1 %v2186_v58 }
 0x431   :  { %2196 = vmax.xlane.f32.xlu0 %v2195_v46 }
 0x432   :  { %2193 = vmax.xlane.f32.xlu1 %v2192_v12 }
 0x436   :  { %2199 = vmax.xlane.f32.xlu1 %v2198_v47 }
 0x441   :  { %v7463_v53 = vpop.f32.mrb[40].mxu0 }
 0x442   :  { %v1710_v55 = vpop.f32.mrb[41].mxu0 }
 0x443   :  { %v7464_v13 = vpop.f32.mrb[42].mxu0 }
 0x444   :  { %v1742_v44 = vpack.c.bf16 %v7464_v13, %v7463_v53  ;;  %v1713_v61 = vpop.f32.mrb[43].mxu0 }
 0x445   :  { %v1741_v42 = vpack.c.bf16 %v1713_v61, %v1710_v55 }
 0x447   :  { %7469 = vmatprep.subr.bf16.mxu0 %v1741_v42 }
 0x448   :  { %7470 = vmatpush3.bf16.msra.mxu0 %v1741_v42 }
 0x449   :  { %v7467_v27 = vpop.f32.mrb[44].mxu0  ;;  %7471 = vmatprep.subr.bf16.mxu0 %v1742_v44 }
 0x44a   :  { %v1726_v1 = vpop.f32.mrb[45].mxu0 }
 0x44b   :  { %v7468_v16 = vpop.f32.mrb[46].mxu0 }
 0x44c   :  { %v1744_v7 = vpack.c.bf16 %v7468_v16, %v7467_v27  ;;  %v1729_v37 = vpop.f32.mrb[47].mxu0  ;;  %7472 = vmatpush3.bf16.msra.mxu0 %v1742_v44 }
 0x44d   :  { %v1743_v6 = vpack.c.bf16 %v1729_v37, %v1726_v1 }
 0x44f   :  { %7473 = vmatprep.subr.bf16.mxu0 %v1743_v6 }
 0x450   :  { %7474 = vmatpush3.bf16.msra.mxu0 %v1743_v6 }
 0x451   :  { %7475 = vmatprep.subr.bf16.mxu0 %v1744_v7 }
 0x454   :  { %7476 = vmatpush3.bf16.msra.mxu0 %v1744_v7 }
 0x455   :  { %7485 = vmatprep.subr.bf16.mxu0 %v8231_v40 }
 0x457   :  { %7478 = vmatmul.mubr.msk.bf16.vlgmr.msra.gmra.mrb[32].mxu0 %vm790_vm1, %v1653_v9 }
 0x458   :  { %7481 = vmatprep.mubr.msk.bf16.mxu0 %vm790_vm1, %v1654_v63  ;;  %7486 = vmatpush3.bf16.msra.mxu0 %v8231_v40 }
 0x459   :  { %7487 = vmatprep.subr.bf16.mxu0 %v8232_v17 }
 0x45c   :  { %7488 = vmatpush3.bf16.msra.mxu0 %v8232_v17 }
 0x45f   :  { %7482 = vmatmul.mubr.msk.bf16.gmra.mrb[36].mxu0 %vm790_vm1, %v1655_v5 }
 0x460   :  { %7489 = vmatprep.mubr.msk.bf16.mxu0 %vm342_vm0, %v9080_v15 }
 0x467   :  { %7490 = vmatmul.mubr.msk.bf16.vlgmr.msra.gmra.mrb[48].mxu0 %vm342_vm0, %v9097_v33 }
 0x468   :  { %7493 = vmatprep.mubr.msk.bf16.mxu0 %vm342_vm0, %v9114_v57 }
 0x46f   :  { %7494 = vmatmul.mubr.msk.bf16.gmra.mrb[52].mxu0 %vm342_vm0, %v9132_v2 }
 0x4a2   :  { %v1598_v49 = vpop.xlane.xlu0 %1597 }
 0x4a3   :  { %8379 = vrcp.f32 %v1598_v49 }
 0x4a6   :  { %v9918_v54 = vpop.xlane.xlu0 %1603 }
 0x4a7   :  { %v1601_v11 = vpop.xlane.xlu1 %1600 }
 0x4a8   :  { %8381 = vrcp.f32 %v1601_v11  ;;  %v11976_v11 = vld [vmem:[#allocation14_spill] sm:$0xff] }
 0x4aa   :  { %v9920_v32 = vpop.xlane.xlu0 %1609 }
 0x4ab   :  { %v9922_v45 = vpop.xlane.xlu1 %1606 }
 0x4ad   :  { %v8380_v31 = vpop.eup %8379 }
 0x4ae   :  { %v9924_v56 = vpop.xlane.xlu0 %1615  ;;  %v1644_v12 = vmul.f32 %v8380_v31, %v9840_v29  ;;  %v2207_v31 = vsel %vm790_vm1, %v11976_v11, -inf }
 0x4af   :  { %v9926_v35 = vpop.xlane.xlu1 %1612 }
 0x4b2   :  { %v8382_v43 = vpop.eup %8381  ;;  %v2179_v18 = vpop.xlane.xlu0 %2178 }
 0x4b3   :  { %v2225_v58 = vsub.f32 %v9555_v19, %v2179_v18  ;;  %v9929_v46 = vpop.xlane.xlu1 %1618  ;;  %v1645_v47 = vmul.f32 %v8382_v43, %v9847_v8  ;;  %v11977_v43 = vld [vmem:[#allocation16_spill] sm:$0xff] }
 0x4b4   :  { %v2204_v18 = vsel %vm790_vm1, %v11977_v43, -inf }
 0x4b5   :  { %v2241_v53 = vmul.f32 1.442695, %v2225_v58  ;;  %v1656_v55 = vpack.c.bf16 %v1645_v47, %v1644_v12  ;;  %v11978_v58 = vld [vmem:[#allocation18_spill] sm:$0xff]  ;;  %v11979_v47 = vld [vmem:[#allocation15_spill] sm:$0xff] }
 0x4b6   :  { %v2185_v13 = vpop.xlane.xlu0 %2184  ;;  %v2213_v12 = vsel %vm790_vm1, %v11978_v58, -inf }
 0x4b7   :  { %8383 = vpow2.f32 %v2241_v53  ;;  %v2227_v44 = vsub.f32 %v9553_v62, %v2185_v13  ;;  %7505 = vmatprep.mubr.msk.bf16.mxu0 %vm790_vm1, %v1656_v55  ;;  %v2182_v61 = vpop.xlane.xlu1 %2181  ;;  %v2210_v53 = vsel %vm790_vm1, %v11979_v47, -inf  ;;  %v11980_v55 = vld [vmem:[#allocation17_spill] sm:$0xff] }
 0x4b8   :  { %v2226_v42 = vsub.f32 %v9559_v4, %v2182_v61  ;;  %v2219_v13 = vsel %vm790_vm1, %v11980_v55, -inf }
 0x4b9   :  { %v2245_v27 = vmul.f32 1.442695, %v2227_v44  ;;  %v11981_v44 = vld [vmem:[#allocation20_spill] sm:$0xff] }
 0x4ba   :  { %v2243_v1 = vmul.f32 1.442695, %v2226_v42  ;;  %v2191_v19 = vpop.xlane.xlu0 %2190  ;;  %v2216_v61 = vsel %vm790_vm1, %v11981_v44, -inf  ;;  %v11982_v42 = vld [vmem:[#allocation19_spill] sm:$0xff] }
 0x4bb   :  { %8385 = vpow2.f32 %v2245_v27  ;;  %v2229_v16 = vsub.f32 %v9563_v23, %v2191_v19  ;;  %v2188_v29 = vpop.xlane.xlu1 %2187  ;;  %v2222_v27 = vsel %vm790_vm1, %v11982_v42, -inf }
 0x4bc   :  { %8387 = vpow2.f32 %v2243_v1  ;;  %v2228_v8 = vsub.f32 %v9557_v20, %v2188_v29 }
 0x4bd   :  { %v2249_v7 = vmul.f32 1.442695, %v2229_v16 }
 0x4be   :  { %v2247_v37 = vmul.f32 1.442695, %v2228_v8  ;;  %v2197_v6 = vpop.xlane.xlu0 %2196 }
 0x4bf   :  { %8389 = vpow2.f32 %v2249_v7  ;;  %v2231_v62 = vsub.f32 %v9561_v22, %v2197_v6  ;;  %v2194_v34 = vpop.xlane.xlu1 %2193 }
 0x4c0   :  { %8391 = vpow2.f32 %v2247_v37  ;;  %v2230_v4 = vsub.f32 %v9567_v25, %v2194_v34 }
 0x4c1   :  { %v9940_v51 = vpop.eup %8383  ;;  %v2253_v14 = vmul.f32 1.442695, %v2231_v62 }
 0x4c2   :  { %v2251_v30 = vmul.f32 1.442695, %v2230_v4  ;;  %v2273_v23 = vsel %vm790_vm1, %v9940_v51, 0.0 }
 0x4c3   :  { %8393 = vpow2.f32 %v2253_v14  ;;  %v2200_v21 = vpop.xlane.xlu1 %2199  ;;  %2274 = vadd.xlane.f32.xlu0 %v2273_v23  ;;  %v8233_v23 = vld [vmem:[%s11868_s2 + $0x40] sm:$0xff]  }
 0x4c4   :  { %8395 = vpow2.f32 %v2251_v30  ;;  %v2232_v20 = vsub.f32 %v9565_v24, %v2200_v21 }
 0x4c5   :  { %v9945_v40 = vpop.eup %8385 }
 0x4c6   :  { %v9947_v22 = vpop.eup %8387  ;;  %v2255_v60 = vmul.f32 1.442695, %v2232_v20  ;;  %v2279_v25 = vsel %vm790_vm1, %v9945_v40, 0.0 }
 0x4c7   :  { %2280 = vadd.xlane.f32.xlu0 %v2279_v25  ;;  %v2276_v3 = vsel %vm790_vm1, %v9947_v22, 0.0 }
 0x4c8   :  { %8397 = vpow2.f32 %v2255_v60  ;;  %2277 = vadd.xlane.f32.xlu1 %v2276_v3  ;;  %v8234_v60 = vld [vmem:[%s11868_s2 + $0x48] sm:$0xff]  }
 0x4c9   :  { %v9953_v36 = vpop.eup %8389  ;;  %8399 = vrcp.f32 %v9922_v45 }
 0x4ca   :  { %v9955_v9 = vpop.eup %8391  ;;  %v2285_v24 = vsel %vm790_vm1, %v9953_v36, 0.0  ;;  %8401 = vrcp.f32 %v9926_v35 }
 0x4cb   :  { %2286 = vadd.xlane.f32.xlu0 %v2285_v24  ;;  %v2282_v17 = vsel %vm790_vm1, %v9955_v9, 0.0  ;;  %8403 = vrcp.f32 %v9918_v54 }
 0x4cc   :  { %2283 = vadd.xlane.f32.xlu1 %v2282_v17  ;;  %8405 = vrcp.f32 %v9920_v32 }
 0x4cd   :  { %v9961_v10 = vpop.eup %8393  ;;  %8407 = vrcp.f32 %v9929_v46 }
 0x4ce   :  { %v9963_v63 = vpop.eup %8395  ;;  %v2291_v39 = vsel %vm790_vm1, %v9961_v10, 0.0  ;;  %8409 = vrcp.f32 %v9924_v56 }
 0x4cf   :  { %2292 = vadd.xlane.f32.xlu0 %v2291_v39  ;;  %v2288_v50 = vsel %vm790_vm1, %v9963_v63, 0.0 }
 0x4d0   :  { %2289 = vadd.xlane.f32.xlu1 %v2288_v50 }
 0x4d2   :  { %v9971_v5 = vpop.eup %8397 }
 0x4d3   :  { %2202 = vmax.xlane.f32.xlu0 %v2201_v0  ;;  %v2294_v49 = vsel %vm790_vm1, %v9971_v5, 0.0  ;;  %v8400_v14 = vpop.eup %8399 }
 0x4d4   :  { %2295 = vadd.xlane.f32.xlu1 %v2294_v49  ;;  %v8402_v35 = vpop.eup %8401  ;;  %v1647_v30 = vmul.f32 %v8400_v14, %v9855_v28 }
 0x4d5   :  { %v8404_v54 = vpop.eup %8403  ;;  %v1649_v46 = vmul.f32 %v8402_v35, %v9863_v41 }
 0x4d6   :  { %v8406_v32 = vpop.eup %8405  ;;  %v1646_v21 = vmul.f32 %v8404_v54, %v9845_v48 }
 0x4d7   :  { %2208 = vmax.xlane.f32.xlu0 %v2207_v31  ;;  %v1648_v20 = vmul.f32 %v8406_v32, %v9853_v52  ;;  %v8408_v25 = vpop.eup %8407 }
 0x4d8   :  { %2205 = vmax.xlane.f32.xlu1 %v2204_v18  ;;  %v1657_v56 = vpack.c.bf16 %v1647_v30, %v1646_v21  ;;  %v8410_v24 = vpop.eup %8409  ;;  %v1651_v48 = vmul.f32 %v8408_v25, %v9871_v59 }
 0x4d9   :  { %v1658_v3 = vpack.c.bf16 %v1649_v46, %v1648_v20  ;;  %v1650_v17 = vmul.f32 %v8410_v24, %v9861_v26  ;;  %v11983_v24 = vld [vmem:[#allocation22_spill] sm:$0xff] }
 0x4db   :  { %2214 = vmax.xlane.f32.xlu0 %v2213_v12  ;;  %v1659_v39 = vpack.c.bf16 %v1651_v48, %v1650_v17  ;;  %v2878_v48 = vsel %vm790_vm1, %v11983_v24, -inf }
 0x4dc   :  { %2211 = vmax.xlane.f32.xlu1 %v2210_v53 }
 0x4df   :  { %2220 = vmax.xlane.f32.xlu0 %v2219_v13 }
 0x4e0   :  { %2217 = vmax.xlane.f32.xlu1 %v2216_v61 }
 0x4e4   :  { %2223 = vmax.xlane.f32.xlu1 %v2222_v27 }
 0x53a   :  { %v7491_v1 = vpop.f32.mrb[48].mxu0 }
 0x53b   :  { %v1880_v19 = vpop.f32.mrb[49].mxu0 }
 0x53c   :  { %v7492_v16 = vpop.f32.mrb[50].mxu0 }
 0x53d   :  { %v1912_v29 = vpack.c.bf16 %v7492_v16, %v7491_v1  ;;  %v1883_v8 = vpop.f32.mrb[51].mxu0 }
 0x53e   :  { %v1911_v7 = vpack.c.bf16 %v1883_v8, %v1880_v19 }
 0x540   :  { %7497 = vmatprep.subr.bf16.mxu0 %v1911_v7 }
 0x541   :  { %7498 = vmatpush3.bf16.msra.mxu0 %v1911_v7 }
 0x542   :  { %v7495_v37 = vpop.f32.mrb[52].mxu0  ;;  %7499 = vmatprep.subr.bf16.mxu0 %v1912_v29 }
 0x543   :  { %v1896_v6 = vpop.f32.mrb[53].mxu0 }
 0x544   :  { %v7496_v62 = vpop.f32.mrb[54].mxu0 }
 0x545   :  { %v1914_v34 = vpack.c.bf16 %v7496_v62, %v7495_v37  ;;  %v1899_v4 = vpop.f32.mrb[55].mxu0  ;;  %7500 = vmatpush3.bf16.msra.mxu0 %v1912_v29 }
 0x546   :  { %v1913_v45 = vpack.c.bf16 %v1899_v4, %v1896_v6 }
 0x548   :  { %7501 = vmatprep.subr.bf16.mxu0 %v1913_v45 }
 0x549   :  { %7502 = vmatpush3.bf16.msra.mxu0 %v1913_v45 }
 0x54a   :  { %7503 = vmatprep.subr.bf16.mxu0 %v1914_v34 }
 0x54d   :  { %7504 = vmatpush3.bf16.msra.mxu0 %v1914_v34 }
 0x54e   :  { %7537 = vmatprep.subr.bf16.mxu0 %v8233_v23 }
 0x550   :  { %v2275_v28 = vpop.xlane.xlu0 %2274  ;;  %7506 = vmatmul.mubr.msk.bf16.vlgmr.msra.gmra.mrb[32].mxu0 %vm790_vm1, %v1657_v56 }
 0x551   :  { %7509 = vmatprep.mubr.msk.bf16.mxu0 %vm790_vm1, %v1658_v3  ;;  %7538 = vmatpush3.bf16.msra.mxu0 %v8233_v23 }
 0x552   :  { %7539 = vmatprep.subr.bf16.mxu0 %v8234_v60 }
 0x554   :  { %v10008_v41 = vpop.xlane.xlu0 %2280 }
 0x555   :  { %v2278_v52 = vpop.xlane.xlu1 %2277  ;;  %7540 = vmatpush3.bf16.msra.mxu0 %v8234_v60 }
 0x556   :  { %8411 = vrcp.f32 %v2278_v52 }
 0x557   :  { %8413 = vrcp.f32 %v2275_v28 }
 0x558   :  { %v10011_v50 = vpop.xlane.xlu0 %2286  ;;  %7510 = vmatmul.mubr.msk.bf16.gmra.mrb[36].mxu0 %vm790_vm1, %v1659_v39  ;;  %v11984_v39 = vld [vmem:[#allocation21_spill] sm:$0xff] }
 0x559   :  { %v10014_v0 = vpop.xlane.xlu1 %2283  ;;  %7541 = vmatprep.mubr.msk.bf16.mxu0 %vm342_vm0, %v9080_v15 }
 0x55c   :  { %v10018_v59 = vpop.xlane.xlu0 %2292 }
 0x55d   :  { %v10020_v49 = vpop.xlane.xlu1 %2289 }
 0x560   :  { %v2203_v31 = vpop.xlane.xlu0 %2202  ;;  %v8412_v18 = vpop.eup %8411  ;;  %7542 = vmatmul.mubr.msk.bf16.vlgmr.msra.gmra.mrb[56].mxu0 %vm342_vm0, %v9097_v33 }
 0x561   :  { %v2233_v26 = vsub.f32 %v9571_v38, %v2203_v31  ;;  %v10025_v12 = vpop.xlane.xlu1 %2295  ;;  %7545 = vmatprep.mubr.msk.bf16.mxu0 %vm342_vm0, %v9114_v57  ;;  %v8414_v53 = vpop.eup %8413  ;;  %v2338_v27 = vmul.f32 %v8412_v18, %v9947_v22  ;;  %v2884_v31 = vsel %vm790_vm1, %v11984_v39, -inf  ;;  %v11985_v18 = vld [vmem:[#allocation24_spill] sm:$0xff] }
 0x562   :  { %v2337_v38 = vmul.f32 %v8414_v53, %v9940_v51  ;;  %v11986_v53 = vld [vmem:[#allocation26_spill] sm:$0xff] }
 0x563   :  { %v2257_v13 = vmul.f32 1.442695, %v2233_v26  ;;  %v2881_v26 = vsel %vm790_vm1, %v11985_v18, -inf }
 0x564   :  { %v2209_v61 = vpop.xlane.xlu0 %2208  ;;  %v2353_v37 = vpack.c.bf16 %v2338_v27, %v2337_v38 }
 0x565   :  { %8415 = vpow2.f32 %v2257_v13  ;;  %v2235_v1 = vsub.f32 %v11976_v11, %v2209_v61  ;;  %v2206_v19 = vpop.xlane.xlu1 %2205  ;;  %v2890_v13 = vsel %vm790_vm1, %v11986_v53, -inf  ;;  %v11987_v61 = vld [vmem:[#allocation23_spill] sm:$0xff] }
 0x566   :  { %v2234_v16 = vsub.f32 %v11977_v43, %v2206_v19  ;;  %v2887_v27 = vsel %vm790_vm1, %v11987_v61, -inf }
 0x567   :  { %v2261_v29 = vmul.f32 1.442695, %v2235_v1  ;;  %v11988_v1 = vld [vmem:[#allocation25_spill] sm:$0xff] }
 0x568   :  { %v2259_v8 = vmul.f32 1.442695, %v2234_v16  ;;  %v2215_v7 = vpop.xlane.xlu0 %2214  ;;  %7546 = vmatmul.mubr.msk.bf16.gmra.mrb[60].mxu0 %vm342_vm0, %v9132_v2  ;;  %v2896_v19 = vsel %vm790_vm1, %v11988_v1, -inf  ;;  %v11989_v16 = vld [vmem:[#allocation28_spill] sm:$0xff] }
 0x569   :  { %8417 = vpow2.f32 %v2261_v29  ;;  %v2237_v6 = vsub.f32 %v11978_v58, %v2215_v7  ;;  %v2212_v62 = vpop.xlane.xlu1 %2211  ;;  %7557 = vmatprep.mubr.msk.bf16.mxu0 %vm790_vm1, %v2353_v37  ;;  %v2893_v38 = vsel %vm790_vm1, %v11989_v16, -inf  ;;  %v11990_v29 = vld [vmem:[#allocation30_spill] sm:$0xff]  ;;  %v11991_v7 = vld [vmem:[#allocation27_spill] sm:$0xff] }
 0x56a   :  { %8419 = vpow2.f32 %v2259_v8  ;;  %v2236_v22 = vsub.f32 %v11979_v47, %v2212_v62  ;;  %v2902_v8 = vsel %vm790_vm1, %v11990_v29, -inf  ;;  %v2899_v37 = vsel %vm790_vm1, %v11991_v7, -inf }
 0x56b   :  { %v2265_v11 = vmul.f32 1.442695, %v2237_v6  ;;  %v11992_v6 = vld [vmem:[#allocation29_spill] sm:$0xff] }
 0x56c   :  { %v2263_v43 = vmul.f32 1.442695, %v2236_v22  ;;  %v2221_v34 = vpop.xlane.xlu0 %2220  ;;  %v2908_v62 = vsel %vm790_vm1, %v11992_v6, -inf  ;;  %v11993_v22 = vld [vmem:[#allocation32_spill] sm:$0xff] }
 0x56d   :  { %8421 = vpow2.f32 %v2265_v11  ;;  %v2239_v51 = vsub.f32 %v11980_v55, %v2221_v34  ;;  %v2218_v4 = vpop.xlane.xlu1 %2217  ;;  %v2905_v11 = vsel %vm790_vm1, %v11993_v22, -inf }
 0x56e   :  { %8423 = vpow2.f32 %v2263_v43  ;;  %v2238_v45 = vsub.f32 %v11981_v44, %v2218_v4  ;;  %v11994_v43 = vld [vmem:[#allocation34_spill] sm:$0xff] }
 0x56f   :  { %v10040_v58 = vpop.eup %8415  ;;  %v2269_v14 = vmul.f32 1.442695, %v2239_v51  ;;  %v2914_v34 = vsel %vm790_vm1, %v11994_v43, -inf  ;;  %v11995_v51 = vld [vmem:[#allocation31_spill] sm:$0xff] }
 0x570   :  { %v2267_v35 = vmul.f32 1.442695, %v2238_v45  ;;  %v2297_v54 = vsel %vm790_vm1, %v10040_v58, 0.0  ;;  %v2911_v4 = vsel %vm790_vm1, %v11995_v51, -inf  ;;  %v11996_v45 = vld [vmem:[#allocation33_spill] sm:$0xff] }
 0x571   :  { %8425 = vpow2.f32 %v2269_v14  ;;  %v2224_v47 = vpop.xlane.xlu1 %2223  ;;  %2298 = vadd.xlane.f32.xlu0 %v2297_v54  ;;  %v2920_v14 = vsel %vm790_vm1, %v11996_v45, -inf }
 0x572   :  { %8427 = vpow2.f32 %v2267_v35  ;;  %v2240_v32 = vsub.f32 %v11982_v42, %v2224_v47  ;;  %v11997_v35 = vld [vmem:[#allocation36_spill] sm:$0xff]  ;;  %v11998_v47 = vld [vmem:[#allocation35_spill] sm:$0xff] }
 0x573   :  { %v10045_v30 = vpop.eup %8417  ;;  %v2917_v54 = vsel %vm790_vm1, %v11997_v35, -inf }
 0x574   :  { %v10047_v55 = vpop.eup %8419  ;;  %v2271_v23 = vmul.f32 1.442695, %v2240_v32  ;;  %v2303_v44 = vsel %vm790_vm1, %v10045_v30, 0.0  ;;  %v2923_v32 = vsel %vm790_vm1, %v11998_v47, -inf }
 0x575   :  { %2304 = vadd.xlane.f32.xlu0 %v2303_v44  ;;  %v2300_v46 = vsel %vm790_vm1, %v10047_v55, 0.0 }
 0x576   :  { %8429 = vpow2.f32 %v2271_v23  ;;  %2301 = vadd.xlane.f32.xlu1 %v2300_v46 }
 0x577   :  { %v10053_v21 = vpop.eup %8421 }
 0x578   :  { %v10055_v20 = vpop.eup %8423  ;;  %v2309_v42 = vsel %vm790_vm1, %v10053_v21, 0.0 }
 0x579   :  { %2310 = vadd.xlane.f32.xlu0 %v2309_v42  ;;  %v2306_v56 = vsel %vm790_vm1, %v10055_v20, 0.0 }
 0x57a   :  { %2307 = vadd.xlane.f32.xlu1 %v2306_v56 }
 0x57b   :  { %v10061_v60 = vpop.eup %8425 }
 0x57c   :  { %v10063_v25 = vpop.eup %8427  ;;  %v2315_v28 = vsel %vm790_vm1, %v10061_v60, 0.0 }
 0x57d   :  { %2316 = vadd.xlane.f32.xlu0 %v2315_v28  ;;  %v2312_v3 = vsel %vm790_vm1, %v10063_v25, 0.0 }
 0x57e   :  { %2313 = vadd.xlane.f32.xlu1 %v2312_v3 }
 0x580   :  { %v10071_v52 = vpop.eup %8429 }
 0x581   :  { %v2318_v17 = vsel %vm790_vm1, %v10071_v52, 0.0  ;;  %2879 = vmax.xlane.f32.xlu0 %v2878_v48 }
 0x582   :  { %2319 = vadd.xlane.f32.xlu1 %v2318_v17 }
 0x585   :  { %2885 = vmax.xlane.f32.xlu0 %v2884_v31 }
 0x586   :  { %2882 = vmax.xlane.f32.xlu1 %v2881_v26 }
 0x589   :  { %2891 = vmax.xlane.f32.xlu0 %v2890_v13 }
 0x58a   :  { %2888 = vmax.xlane.f32.xlu1 %v2887_v27 }
 0x58d   :  { %2897 = vmax.xlane.f32.xlu0 %v2896_v19 }
 0x58e   :  { %2894 = vmax.xlane.f32.xlu1 %v2893_v38 }
 0x591   :  { %2903 = vmax.xlane.f32.xlu0 %v2902_v8 }
 0x592   :  { %2900 = vmax.xlane.f32.xlu1 %v2899_v37 }
 0x595   :  { %2909 = vmax.xlane.f32.xlu0 %v2908_v62 }
 0x596   :  { %2906 = vmax.xlane.f32.xlu1 %v2905_v11 }
 0x599   :  { %2915 = vmax.xlane.f32.xlu0 %v2914_v34 }
 0x59a   :  { %2912 = vmax.xlane.f32.xlu1 %v2911_v4 }
 0x59d   :  { %2921 = vmax.xlane.f32.xlu0 %v2920_v14 }
 0x59e   :  { %2918 = vmax.xlane.f32.xlu1 %v2917_v54 }
 0x5a2   :  { %2924 = vmax.xlane.f32.xlu1 %v2923_v32 }
 0x5fe   :  { %v10105_v23 = vpop.xlane.xlu0 %2298 }
 0x602   :  { %v10107_v44 = vpop.xlane.xlu0 %2304 }
 0x603   :  { %v10109_v46 = vpop.xlane.xlu1 %2301 }
 0x606   :  { %v10111_v42 = vpop.xlane.xlu0 %2310 }
 0x607   :  { %v10113_v56 = vpop.xlane.xlu1 %2307 }
 0x60a   :  { %v10115_v28 = vpop.xlane.xlu0 %2316 }
 0x60b   :  { %v10117_v3 = vpop.xlane.xlu1 %2313 }
 0x60e   :  { %v2880_v48 = vpop.xlane.xlu0 %2879 }
 0x60f   :  { %v10119_v17 = vpop.xlane.xlu1 %2319  ;;  %v2926_v31 = vsub.f32 %v11983_v24, %v2880_v48 }
 0x611   :  { %v2942_v26 = vmul.f32 1.442695, %v2926_v31 }
 0x612   :  { %v2886_v13 = vpop.xlane.xlu0 %2885 }
 0x613   :  { %8431 = vpow2.f32 %v2942_v26  ;;  %v2883_v27 = vpop.xlane.xlu1 %2882  ;;  %v2928_v19 = vsub.f32 %v11984_v39, %v2886_v13 }
 0x614   :  { %v2927_v38 = vsub.f32 %v11985_v18, %v2883_v27 }
 0x615   :  { %v2946_v8 = vmul.f32 1.442695, %v2928_v19 }
 0x616   :  { %v2944_v37 = vmul.f32 1.442695, %v2927_v38  ;;  %v2892_v62 = vpop.xlane.xlu0 %2891 }
 0x617   :  { %8433 = vpow2.f32 %v2946_v8  ;;  %v2889_v11 = vpop.xlane.xlu1 %2888  ;;  %v2930_v34 = vsub.f32 %v11986_v53, %v2892_v62 }
 0x618   :  { %8435 = vpow2.f32 %v2944_v37  ;;  %v2929_v4 = vsub.f32 %v11987_v61, %v2889_v11 }
 0x619   :  { %v2950_v14 = vmul.f32 1.442695, %v2930_v34 }
 0x61a   :  { %v2948_v24 = vmul.f32 1.442695, %v2929_v4  ;;  %v2898_v54 = vpop.xlane.xlu0 %2897 }
 0x61b   :  { %8437 = vpow2.f32 %v2950_v14  ;;  %v2895_v32 = vpop.xlane.xlu1 %2894  ;;  %v2932_v48 = vsub.f32 %v11988_v1, %v2898_v54 }
 0x61c   :  { %8439 = vpow2.f32 %v2948_v24  ;;  %v2931_v39 = vsub.f32 %v11989_v16, %v2895_v32 }
 0x61d   :  { %v10128_v18 = vpop.eup %8431  ;;  %v2954_v31 = vmul.f32 1.442695, %v2932_v48 }
 0x61e   :  { %v2952_v26 = vmul.f32 1.442695, %v2931_v39  ;;  %v2904_v13 = vpop.xlane.xlu0 %2903  ;;  %v2974_v53 = vsel %vm790_vm1, %v10128_v18, 0.0 }
 0x61f   :  { %8441 = vpow2.f32 %v2954_v31  ;;  %v2901_v61 = vpop.xlane.xlu1 %2900  ;;  %v2934_v27 = vsub.f32 %v11990_v29, %v2904_v13  ;;  %2975 = vadd.xlane.f32.xlu0 %v2974_v53 }
 0x620   :  { %8443 = vpow2.f32 %v2952_v26  ;;  %v2933_v19 = vsub.f32 %v11991_v7, %v2901_v61 }
 0x621   :  { %v10134_v1 = vpop.eup %8433  ;;  %v2958_v38 = vmul.f32 1.442695, %v2934_v27 }
 0x622   :  { %v10136_v16 = vpop.eup %8435  ;;  %v2956_v8 = vmul.f32 1.442695, %v2933_v19  ;;  %v2910_v37 = vpop.xlane.xlu0 %2909  ;;  %v2980_v62 = vsel %vm790_vm1, %v10134_v1, 0.0 }
 0x623   :  { %8445 = vpow2.f32 %v2958_v38  ;;  %v2907_v11 = vpop.xlane.xlu1 %2906  ;;  %v2977_v34 = vsel %vm790_vm1, %v10136_v16, 0.0  ;;  %v2936_v29 = vsub.f32 %v11992_v6, %v2910_v37  ;;  %2981 = vadd.xlane.f32.xlu0 %v2980_v62 }
 0x624   :  { %8447 = vpow2.f32 %v2956_v8  ;;  %v2935_v7 = vsub.f32 %v11993_v22, %v2907_v11  ;;  %2978 = vadd.xlane.f32.xlu1 %v2977_v34 }
 0x625   :  { %v10144_v4 = vpop.eup %8437  ;;  %v2962_v14 = vmul.f32 1.442695, %v2936_v29 }
 0x626   :  { %v10146_v24 = vpop.eup %8439  ;;  %v2960_v54 = vmul.f32 1.442695, %v2935_v7  ;;  %v2916_v32 = vpop.xlane.xlu0 %2915  ;;  %v2986_v48 = vsel %vm790_vm1, %v10144_v4, 0.0 }
 0x627   :  { %8449 = vpow2.f32 %v2962_v14  ;;  %v2913_v39 = vpop.xlane.xlu1 %2912  ;;  %v2983_v6 = vsel %vm790_vm1, %v10146_v24, 0.0  ;;  %v2938_v31 = vsub.f32 %v11994_v43, %v2916_v32  ;;  %2987 = vadd.xlane.f32.xlu0 %v2986_v48 }
 0x628   :  { %8451 = vpow2.f32 %v2960_v54  ;;  %v2937_v22 = vsub.f32 %v11995_v51, %v2913_v39  ;;  %2984 = vadd.xlane.f32.xlu1 %v2983_v6 }
 0x629   :  { %v10154_v26 = vpop.eup %8441  ;;  %v2966_v13 = vmul.f32 1.442695, %v2938_v31 }
 0x62a   :  { %11999 = vst [vmem:[#allocation14_spill] sm:$0xff] %v10154_v26  ;;  %v10156_v53 = vpop.eup %8443  ;;  %v2964_v61 = vmul.f32 1.442695, %v2937_v22  ;;  %v2922_v27 = vpop.xlane.xlu0 %2921  ;;  %v2992_v19 = vsel %vm790_vm1, %v10154_v26, 0.0 }
 0x62b   :  { %8453 = vpow2.f32 %v2966_v13  ;;  %v2919_v38 = vpop.xlane.xlu1 %2918  ;;  %v2989_v43 = vsel %vm790_vm1, %v10156_v53, 0.0  ;;  %v2940_v8 = vsub.f32 %v11996_v45, %v2922_v27  ;;  %2993 = vadd.xlane.f32.xlu0 %v2992_v19 }
 0x62c   :  { %8455 = vpow2.f32 %v2964_v61  ;;  %v2939_v51 = vsub.f32 %v11997_v35, %v2919_v38  ;;  %2990 = vadd.xlane.f32.xlu1 %v2989_v43 }
 0x62d   :  { %v10164_v37 = vpop.eup %8445  ;;  %v2970_v62 = vmul.f32 1.442695, %v2940_v8 }
 0x62e   :  { %12000 = vst [vmem:[#allocation16_spill] sm:$0xff] %v10164_v37  ;;  %v10166_v11 = vpop.eup %8447  ;;  %v2968_v34 = vmul.f32 1.442695, %v2939_v51  ;;  %v2998_v29 = vsel %vm790_vm1, %v10164_v37, 0.0 }
 0x62f   :  { %12001 = vst [vmem:[#allocation18_spill] sm:$0xff] %v10166_v11  ;;  %8457 = vpow2.f32 %v2970_v62  ;;  %v2925_v7 = vpop.xlane.xlu1 %2924  ;;  %v2995_v14 = vsel %vm790_vm1, %v10166_v11, 0.0  ;;  %2999 = vadd.xlane.f32.xlu0 %v2998_v29 }
 0x630   :  { %8459 = vpow2.f32 %v2968_v34  ;;  %v2941_v45 = vsub.f32 %v11998_v47, %v2925_v7  ;;  %2996 = vadd.xlane.f32.xlu1 %v2995_v14 }
 0x631   :  { %v10173_v35 = vpop.eup %8449 }
 0x632   :  { %12002 = vst [vmem:[#allocation15_spill] sm:$0xff] %v10173_v35  ;;  %v10175_v54 = vpop.eup %8451  ;;  %v2972_v32 = vmul.f32 1.442695, %v2941_v45  ;;  %v3004_v48 = vsel %vm790_vm1, %v10173_v35, 0.0 }
 0x633   :  { %12003 = vst [vmem:[#allocation17_spill] sm:$0xff] %v10175_v54  ;;  %v3001_v39 = vsel %vm790_vm1, %v10175_v54, 0.0  ;;  %3005 = vadd.xlane.f32.xlu0 %v3004_v48  ;;  %v7543_v6 = vpop.f32.mrb[56].mxu0 }
 0x634   :  { %8461 = vpow2.f32 %v2972_v32  ;;  %3002 = vadd.xlane.f32.xlu1 %v3001_v39  ;;  %v2411_v22 = vpop.f32.mrb[57].mxu0 }
 0x635   :  { %v10181_v31 = vpop.eup %8453  ;;  %v7544_v13 = vpop.f32.mrb[58].mxu0  ;;  %8463 = vrcp.f32 %v10014_v0 }
 0x636   :  { %12004 = vst [vmem:[#allocation20_spill] sm:$0xff] %v10181_v31  ;;  %v10183_v47 = vpop.eup %8455  ;;  %v3010_v61 = vsel %vm790_vm1, %v10181_v31, 0.0  ;;  %v2443_v27 = vpack.c.bf16 %v7544_v13, %v7543_v6  ;;  %v2414_v19 = vpop.f32.mrb[59].mxu0  ;;  %8465 = vrcp.f32 %v10020_v49  ;;  %v8235_v13 = vld [vmem:[%s11868_s2 + $0x50] sm:$0xff]  }
 0x637   :  { %12005 = vst [vmem:[#allocation19_spill] sm:$0xff] %v10183_v47  ;;  %v3007_v38 = vsel %vm790_vm1, %v10183_v47, 0.0  ;;  %3011 = vadd.xlane.f32.xlu0 %v3010_v61  ;;  %v2442_v43 = vpack.c.bf16 %v2414_v19, %v2411_v22  ;;  %8467 = vrcp.f32 %v10008_v41  ;;  %v10207_v6 = vpop.f32.mrb[104].mxu1 }
 0x638   :  { %3008 = vadd.xlane.f32.xlu1 %v3007_v38  ;;  %8469 = vrcp.f32 %v10011_v50  ;;  %v10213_v61 = vpop.f32.mrb[105].mxu1 }
 0x639   :  { %v10191_v8 = vpop.eup %8457  ;;  %7549 = vmatprep.subr.bf16.mxu0 %v2442_v43  ;;  %8471 = vrcp.f32 %v10025_v12  ;;  %v10216_v19 = vpop.f32.mrb[106].mxu1 }
 0x63a   :  { %12006 = vst [vmem:[#allocation22_spill] sm:$0xff] %v10191_v8  ;;  %v10194_v51 = vpop.eup %8459  ;;  %v3016_v0 = vsel %vm790_vm1, %v10191_v8, 0.0  ;;  %7550 = vmatpush3.bf16.msra.mxu0 %v2442_v43  ;;  %8473 = vrcp.f32 %v10018_v59  ;;  %v10219_v38 = vpop.f32.mrb[107].mxu1 }
 0x63b   :  { %12007 = vst [vmem:[#allocation21_spill] sm:$0xff] %v10194_v51  ;;  %v3013_v62 = vsel %vm790_vm1, %v10194_v51, 0.0  ;;  %3017 = vadd.xlane.f32.xlu0 %v3016_v0  ;;  %v7547_v49 = vpop.f32.mrb[60].mxu0  ;;  %7551 = vmatprep.subr.bf16.mxu0 %v2443_v27  ;;  %v10222_v0 = vpop.f32.mrb[108].mxu1  ;;  %8475 = vrcp.f32 %v10105_v23 }
 0x63c   :  { %3014 = vadd.xlane.f32.xlu1 %v3013_v62  ;;  %v2427_v34 = vpop.f32.mrb[61].mxu0  ;;  %v8236_v62 = vld [vmem:[%s11868_s2 + $0x58] sm:$0xff]   ;;  %8477 = vrcp.f32 %v10109_v46 }
 0x63d   :  { %v7548_v41 = vpop.f32.mrb[62].mxu0 }
 0x63e   :  { %v10201_v29 = vpop.eup %8461  ;;  %v2445_v7 = vpack.c.bf16 %v7548_v41, %v7547_v49  ;;  %v2430_v50 = vpop.f32.mrb[63].mxu0  ;;  %7552 = vmatpush3.bf16.msra.mxu0 %v2443_v27 }
 0x63f   :  { %12008 = vst [vmem:[#allocation24_spill] sm:$0xff] %v10201_v29  ;;  %v3019_v14 = vsel %vm790_vm1, %v10201_v29, 0.0  ;;  %v2444_v45 = vpack.c.bf16 %v2430_v50, %v2427_v34  ;;  %v8464_v32 = vpop.eup %8463  ;;  %v10227_v49 = vpop.f32.mrb[109].mxu1 }
 0x640   :  { %3020 = vadd.xlane.f32.xlu1 %v3019_v14  ;;  %v8466_v48 = vpop.eup %8465  ;;  %v2340_v12 = vmul.f32 %v8464_v32, %v9955_v9  ;;  %v10229_v41 = vpop.f32.mrb[110].mxu1 }
 0x641   :  { %7553 = vmatprep.subr.bf16.mxu0 %v2444_v45  ;;  %v8468_v39 = vpop.eup %8467  ;;  %v2342_v27 = vmul.f32 %v8466_v48, %v9963_v63 }
 0x642   :  { %7554 = vmatpush3.bf16.msra.mxu0 %v2444_v45  ;;  %v8470_v22 = vpop.eup %8469  ;;  %v2339_v59 = vmul.f32 %v8468_v39, %v9945_v40  ;;  %v10232_v40 = vpop.f32.mrb[111].mxu1 }
 0x643   :  { %7555 = vmatprep.subr.bf16.mxu0 %v2445_v7  ;;  %v2341_v43 = vmul.f32 %v8470_v22, %v9953_v36  ;;  %v8472_v63 = vpop.eup %8471  ;;  %v10235_v36 = vpop.f32.mrb[112].mxu1 }
 0x644   :  { %v2354_v9 = vpack.c.bf16 %v2340_v12, %v2339_v59  ;;  %v2344_v50 = vmul.f32 %v8472_v63, %v9971_v5  ;;  %v10238_v14 = vpop.f32.mrb[113].mxu1 }
 0x645   :  { %v2355_v34 = vpack.c.bf16 %v2342_v27, %v2341_v43  ;;  %v10240_v45 = vpop.f32.mrb[114].mxu1  ;;  %v3535_v32 = vsel %vm790_vm1, %v10238_v14, -inf }
 0x646   :  { %7556 = vmatpush3.bf16.msra.mxu0 %v2445_v7  ;;  %v8474_v7 = vpop.eup %8473  ;;  %v10245_v39 = vpop.f32.mrb[115].mxu1  ;;  %3536 = vmax.xlane.f32.xlu0 %v3535_v32  ;;  %v3544_v23 = vsel %vm790_vm1, %v10240_v45, -inf  ;;  %v3511_v32 = vsel %vm790_vm1, %v10213_v61, -inf }
 0x647   :  { %7565 = vmatprep.subr.bf16.mxu0 %v8235_v13  ;;  %v2343_v48 = vmul.f32 %v8474_v7, %v9961_v10  ;;  %v3538_v22 = vsel %vm790_vm1, %v10245_v39, -inf  ;;  %v10254_v12 = vpop.f32.mrb[116].mxu1  ;;  %v3541_v10 = vsel %vm790_vm1, %v10235_v36, -inf }
 0x648   :  { %3539 = vmax.xlane.f32.xlu1 %v3538_v22 }
 0x649   :  { %7558 = vmatmul.mubr.msk.bf16.vlgmr.msra.gmra.mrb[32].mxu0 %vm790_vm1, %v2354_v9  ;;  %v2356_v5 = vpack.c.bf16 %v2344_v50, %v2343_v48  ;;  %v8476_v9 = vpop.eup %8475  ;;  %v3514_v48 = vsel %vm790_vm1, %v10219_v38, -inf }
 0x64a   :  { %7561 = vmatprep.mubr.msk.bf16.mxu0 %vm790_vm1, %v2355_v34  ;;  %7566 = vmatpush3.bf16.msra.mxu0 %v8235_v13  ;;  %v10260_v13 = vpop.f32.mrb[117].mxu1  ;;  %v8478_v34 = vpop.eup %8477  ;;  %v2345_v7 = vmul.f32 %v8476_v9, %v10040_v58  ;;  %v3523_v58 = vsel %vm790_vm1, %v10227_v49, -inf }
 0x64b   :  { %7567 = vmatprep.subr.bf16.mxu0 %v8236_v62  ;;  %3542 = vmax.xlane.f32.xlu0 %v3541_v10  ;;  %v10262_v46 = vpop.f32.mrb[118].mxu1  ;;  %v3547_v27 = vsel %vm790_vm1, %v10260_v13, -inf  ;;  %v2346_v50 = vmul.f32 %v8478_v34, %v10047_v55  ;;  %v3520_v10 = vsel %vm790_vm1, %v10216_v19, -inf  ;;  %v3526_v55 = vsel %vm790_vm1, %v10232_v40, -inf }
 0x64c   :  { %3545 = vmax.xlane.f32.xlu1 %v3544_v23  ;;  %v10266_v59 = vpop.f32.mrb[119].mxu1  ;;  %v3556_v63 = vsel %vm790_vm1, %v10262_v46, -inf  ;;  %v3529_v23 = vsel %vm790_vm1, %v10222_v0, -inf }
 0x64d   :  { %v3550_v43 = vsel %vm790_vm1, %v10266_v59, -inf  ;;  %v2357_v22 = vpack.c.bf16 %v2346_v50, %v2345_v7 }
 0x64e   :  { %7568 = vmatpush3.bf16.msra.mxu0 %v8236_v62  ;;  %v3553_v62 = vsel %vm790_vm1, %v10254_v12, -inf }
 0x64f   :  { %3548 = vmax.xlane.f32.xlu0 %v3547_v27  ;;  %v3532_v27 = vsel %vm790_vm1, %v10229_v41, -inf }
 0x650   :  { %3551 = vmax.xlane.f32.xlu1 %v3550_v43 }
 0x651   :  { %7562 = vmatmul.mubr.msk.bf16.gmra.mrb[36].mxu0 %vm790_vm1, %v2356_v5  ;;  %v3517_v5 = vsel %vm790_vm1, %v10207_v6, -inf }
 0x652   :  { %7569 = vmatprep.mubr.msk.bf16.mxu0 %vm342_vm0, %v9080_v15 }
 0x653   :  { %3554 = vmax.xlane.f32.xlu0 %v3553_v62 }
 0x654   :  { %3557 = vmax.xlane.f32.xlu1 %v3556_v63 }
 0x657   :  { %3512 = vmax.xlane.f32.xlu0 %v3511_v32 }
 0x658   :  { %3515 = vmax.xlane.f32.xlu1 %v3514_v48 }
 0x659   :  { %7570 = vmatmul.mubr.msk.bf16.vlgmr.msra.gmra.mrb[64].mxu0 %vm342_vm0, %v9097_v33 }
 0x65a   :  { %7573 = vmatprep.mubr.msk.bf16.mxu0 %vm342_vm0, %v9114_v57 }
 0x65b   :  { %3518 = vmax.xlane.f32.xlu0 %v3517_v5 }
 0x65c   :  { %3521 = vmax.xlane.f32.xlu1 %v3520_v10 }
 0x65f   :  { %3524 = vmax.xlane.f32.xlu0 %v3523_v58 }
 0x660   :  { %3527 = vmax.xlane.f32.xlu1 %v3526_v55 }
 0x661   :  { %7574 = vmatmul.mubr.msk.bf16.gmra.mrb[68].mxu0 %vm342_vm0, %v9132_v2 }
 0x662   :  { %7585 = vmatprep.mubr.msk.bf16.mxu0 %vm790_vm1, %v2357_v22 }
 0x663   :  { %3530 = vmax.xlane.f32.xlu0 %v3529_v23 }
 0x664   :  { %3533 = vmax.xlane.f32.xlu1 %v3532_v27 }
 0x6ac   :  { %v10299_v43 = vpop.xlane.xlu0 %2975 }
 0x6b0   :  { %v10303_v62 = vpop.xlane.xlu0 %2981 }
 0x6b1   :  { %v10301_v9 = vpop.xlane.xlu1 %2978 }
 0x6b4   :  { %v10307_v34 = vpop.xlane.xlu0 %2987 }
 0x6b5   :  { %v10305_v63 = vpop.xlane.xlu1 %2984 }
 0x6b8   :  { %v10311_v50 = vpop.xlane.xlu0 %2993 }
 0x6b9   :  { %v10309_v7 = vpop.xlane.xlu1 %2990 }
 0x6bc   :  { %v10315_v48 = vpop.xlane.xlu0 %2999 }
 0x6bd   :  { %v10313_v32 = vpop.xlane.xlu1 %2996 }
 0x6c0   :  { %v10319_v5 = vpop.xlane.xlu0 %3005 }
 0x6c1   :  { %v10317_v22 = vpop.xlane.xlu1 %3002 }
 0x6c4   :  { %v10323_v58 = vpop.xlane.xlu0 %3011 }
 0x6c5   :  { %v10321_v10 = vpop.xlane.xlu1 %3008 }
 0x6c6   :  { %12009 = vst [vmem:[#allocation26_spill] sm:$0xff] %v10321_v10 }
 0x6c8   :  { %v10327_v23 = vpop.xlane.xlu0 %3017 }
 0x6c9   :  { %v10325_v55 = vpop.xlane.xlu1 %3014  ;;  %12011 = vst [vmem:[#allocation25_spill] sm:$0xff] %v10327_v23 }
 0x6ca   :  { %12010 = vst [vmem:[#allocation23_spill] sm:$0xff] %v10325_v55 }
 0x6cd   :  { %v10329_v27 = vpop.xlane.xlu1 %3020 }
 0x6ce   :  { %12012 = vst [vmem:[#allocation28_spill] sm:$0xff] %v10329_v27 }
 0x6d3   :  { %v3537_v29 = vpop.xlane.xlu0 %3536 }
 0x6d4   :  { %v3567_v8 = vsub.f32 %v10238_v14, %v3537_v29 }
 0x6d5   :  { %v3540_v51 = vpop.xlane.xlu1 %3539 }
 0x6d6   :  { %v3568_v31 = vsub.f32 %v10245_v39, %v3540_v51  ;;  %v3591_v47 = vmul.f32 1.442695, %v3567_v8 }
 0x6d8   :  { %v3593_v35 = vmul.f32 1.442695, %v3568_v31  ;;  %8479 = vpow2.f32 %v3591_v47  ;;  %v3543_v54 = vpop.xlane.xlu0 %3542 }
 0x6d9   :  { %v3546_v37 = vpop.xlane.xlu1 %3545  ;;  %v3569_v11 = vsub.f32 %v10235_v36, %v3543_v54 }
 0x6da   :  { %8481 = vpow2.f32 %v3593_v35  ;;  %v3570_v26 = vsub.f32 %v10240_v45, %v3546_v37 }
 0x6db   :  { %v3595_v55 = vmul.f32 1.442695, %v3569_v11 }
 0x6dc   :  { %v3597_v23 = vmul.f32 1.442695, %v3570_v26  ;;  %v3549_v10 = vpop.xlane.xlu0 %3548 }
 0x6dd   :  { %v3552_v27 = vpop.xlane.xlu1 %3551  ;;  %8483 = vpow2.f32 %v3595_v55  ;;  %v3571_v29 = vsub.f32 %v10260_v13, %v3549_v10 }
 0x6de   :  { %v3572_v14 = vsub.f32 %v10266_v59, %v3552_v27  ;;  %8485 = vpow2.f32 %v3597_v23 }
 0x6df   :  { %v3599_v8 = vmul.f32 1.442695, %v3571_v29 }
 0x6e0   :  { %v3601_v31 = vmul.f32 1.442695, %v3572_v14  ;;  %v3555_v47 = vpop.xlane.xlu0 %3554 }
 0x6e1   :  { %v3558_v51 = vpop.xlane.xlu1 %3557  ;;  %8487 = vpow2.f32 %v3599_v8  ;;  %v3573_v35 = vsub.f32 %v10254_v12, %v3555_v47 }
 0x6e2   :  { %v3574_v54 = vsub.f32 %v10262_v46, %v3558_v51  ;;  %v10339_v37 = vpop.eup %8479  ;;  %8489 = vpow2.f32 %v3601_v31 }
 0x6e3   :  { %v3603_v11 = vmul.f32 1.442695, %v3573_v35  ;;  %v3631_v45 = vsel %vm790_vm1, %v10339_v37, 0.0 }
 0x6e4   :  { %v10341_v26 = vpop.eup %8481  ;;  %v3605_v36 = vmul.f32 1.442695, %v3574_v54  ;;  %v3513_v39 = vpop.xlane.xlu0 %3512  ;;  %3632 = vadd.xlane.f32.xlu0 %v3631_v45 }
 0x6e5   :  { %v3516_v13 = vpop.xlane.xlu1 %3515  ;;  %v3634_v59 = vsel %vm790_vm1, %v10341_v26, 0.0  ;;  %8491 = vpow2.f32 %v3603_v11  ;;  %v3559_v12 = vsub.f32 %v10213_v61, %v3513_v39 }
 0x6e6   :  { %v3560_v46 = vsub.f32 %v10219_v38, %v3516_v13  ;;  %3635 = vadd.xlane.f32.xlu1 %v3634_v59  ;;  %8493 = vpow2.f32 %v3605_v36 }
 0x6e7   :  { %v10349_v10 = vpop.eup %8483  ;;  %v3575_v55 = vmul.f32 1.442695, %v3559_v12 }
 0x6e8   :  { %v3577_v23 = vmul.f32 1.442695, %v3560_v46  ;;  %v10351_v27 = vpop.eup %8485  ;;  %v3519_v29 = vpop.xlane.xlu0 %3518  ;;  %v3637_v8 = vsel %vm790_vm1, %v10349_v10, 0.0 }
 0x6e9   :  { %v3522_v14 = vpop.xlane.xlu1 %3521  ;;  %8495 = vpow2.f32 %v3575_v55  ;;  %v3561_v31 = vsub.f32 %v10207_v6, %v3519_v29  ;;  %3638 = vadd.xlane.f32.xlu0 %v3637_v8  ;;  %v3640_v38 = vsel %vm790_vm1, %v10351_v27, 0.0 }
 0x6ea   :  { %v3562_v61 = vsub.f32 %v10216_v19, %v3522_v14  ;;  %8497 = vpow2.f32 %v3577_v23  ;;  %3641 = vadd.xlane.f32.xlu1 %v3640_v38 }
 0x6eb   :  { %v10359_v47 = vpop.eup %8487  ;;  %v3579_v51 = vmul.f32 1.442695, %v3561_v31 }
 0x6ec   :  { %v3581_v35 = vmul.f32 1.442695, %v3562_v61  ;;  %v10361_v54 = vpop.eup %8489  ;;  %v3525_v11 = vpop.xlane.xlu0 %3524  ;;  %v3643_v45 = vsel %vm790_vm1, %v10359_v47, 0.0 }
 0x6ed   :  { %v3528_v36 = vpop.xlane.xlu1 %3527  ;;  %8499 = vpow2.f32 %v3579_v51  ;;  %v3563_v6 = vsub.f32 %v10227_v49, %v3525_v11  ;;  %3644 = vadd.xlane.f32.xlu0 %v3643_v45  ;;  %v3646_v39 = vsel %vm790_vm1, %v10361_v54, 0.0 }
 0x6ee   :  { %v3564_v19 = vsub.f32 %v10232_v40, %v3528_v36  ;;  %8501 = vpow2.f32 %v3581_v35  ;;  %3647 = vadd.xlane.f32.xlu1 %v3646_v39 }
 0x6ef   :  { %v10369_v13 = vpop.eup %8491  ;;  %v3583_v59 = vmul.f32 1.442695, %v3563_v6 }
 0x6f0   :  { %v3585_v12 = vmul.f32 1.442695, %v3564_v19  ;;  %v10371_v46 = vpop.eup %8493  ;;  %v3531_v55 = vpop.xlane.xlu0 %3530  ;;  %v3649_v29 = vsel %vm790_vm1, %v10369_v13, 0.0 }
 0x6f1   :  { %v3534_v23 = vpop.xlane.xlu1 %3533  ;;  %8503 = vpow2.f32 %v3583_v59  ;;  %v3565_v49 = vsub.f32 %v10222_v0, %v3531_v55  ;;  %3650 = vadd.xlane.f32.xlu0 %v3649_v29  ;;  %v3652_v14 = vsel %vm790_vm1, %v10371_v46, 0.0 }
 0x6f2   :  { %v3566_v40 = vsub.f32 %v10229_v41, %v3534_v23  ;;  %8505 = vpow2.f32 %v3585_v12  ;;  %3653 = vadd.xlane.f32.xlu1 %v3652_v14 }
 0x6f3   :  { %v10379_v8 = vpop.eup %8495  ;;  %v3587_v31 = vmul.f32 1.442695, %v3565_v49 }
 0x6f4   :  { %v3589_v61 = vmul.f32 1.442695, %v3566_v40  ;;  %v10381_v38 = vpop.eup %8497  ;;  %v3607_v51 = vsel %vm790_vm1, %v10379_v8, 0.0 }
 0x6f5   :  { %8507 = vpow2.f32 %v3587_v31  ;;  %3608 = vadd.xlane.f32.xlu0 %v3607_v51  ;;  %v3610_v0 = vsel %vm790_vm1, %v10381_v38, 0.0 }
 0x6f6   :  { %8509 = vpow2.f32 %v3589_v61  ;;  %3611 = vadd.xlane.f32.xlu1 %v3610_v0 }
 0x6f7   :  { %v10387_v41 = vpop.eup %8499  ;;  %8511 = vrcp.f32 %v10111_v42 }
 0x6f8   :  { %v10389_v35 = vpop.eup %8501  ;;  %v3613_v11 = vsel %vm790_vm1, %v10387_v41, 0.0  ;;  %8513 = vrcp.f32 %v10113_v56 }
 0x6f9   :  { %3614 = vadd.xlane.f32.xlu0 %v3613_v11  ;;  %v3616_v36 = vsel %vm790_vm1, %v10389_v35, 0.0  ;;  %8515 = vrcp.f32 %v10117_v3 }
 0x6fa   :  { %3617 = vadd.xlane.f32.xlu1 %v3616_v36  ;;  %8517 = vrcp.f32 %v10107_v44 }
 0x6fb   :  { %v10395_v45 = vpop.eup %8503  ;;  %8519 = vrcp.f32 %v10119_v17 }
 0x6fc   :  { %v10397_v6 = vpop.eup %8505  ;;  %v3619_v19 = vsel %vm790_vm1, %v10395_v45, 0.0  ;;  %8521 = vrcp.f32 %v10115_v28  ;;  %v8238_v28 = vld [vmem:[%s11868_s2 + $0x68] sm:$0xff]  }
 0x6fd   :  { %3620 = vadd.xlane.f32.xlu0 %v3619_v19  ;;  %v3622_v39 = vsel %vm790_vm1, %v10397_v6, 0.0  ;;  %8523 = vrcp.f32 %v10299_v43 }
 0x6fe   :  { %3623 = vadd.xlane.f32.xlu1 %v3622_v39  ;;  %8525 = vrcp.f32 %v10301_v9 }
 0x6ff   :  { %v10403_v59 = vpop.eup %8507 }
 0x700   :  { %v10405_v12 = vpop.eup %8509  ;;  %v3625_v55 = vsel %vm790_vm1, %v10403_v59, 0.0 }
 0x701   :  { %3626 = vadd.xlane.f32.xlu0 %v3625_v55  ;;  %v3628_v23 = vsel %vm790_vm1, %v10405_v12, 0.0  ;;  %v8512_v19 = vpop.eup %8511 }
 0x702   :  { %3629 = vadd.xlane.f32.xlu1 %v3628_v23  ;;  %v8514_v39 = vpop.eup %8513  ;;  %v8237_v23 = vld [vmem:[%s11868_s2 + $0x60] sm:$0xff]   ;;  %v2349_v17 = vmul.f32 %v8512_v19, %v10053_v21 }
 0x703   :  { %v8516_v3 = vpop.eup %8515  ;;  %v2348_v44 = vmul.f32 %v8514_v39, %v10055_v20 }
 0x704   :  { %v8518_v55 = vpop.eup %8517 }
 0x72c   :  { %v7571_v29 = vpop.f32.mrb[64].mxu0 }
 0x72d   :  { %v2581_v49 = vpop.f32.mrb[65].mxu0 }
 0x72e   :  { %v7572_v40 = vpop.f32.mrb[66].mxu0 }
 0x72f   :  { %v2613_v14 = vpack.c.bf16 %v7572_v40, %v7571_v29  ;;  %v2584_v31 = vpop.f32.mrb[67].mxu0  ;;  %v2350_v29 = vmul.f32 %v8516_v3, %v10063_v25 }
 0x730   :  { %v2612_v61 = vpack.c.bf16 %v2584_v31, %v2581_v49  ;;  %v2347_v49 = vmul.f32 %v8518_v55, %v10045_v30 }
 0x731   :  { %v2359_v20 = vpack.c.bf16 %v2350_v29, %v2349_v17 }
 0x732   :  { %7577 = vmatprep.subr.bf16.mxu0 %v2612_v61  ;;  %v2358_v40 = vpack.c.bf16 %v2348_v44, %v2347_v49 }
 0x733   :  { %7578 = vmatpush3.bf16.msra.mxu0 %v2612_v61 }
 0x734   :  { %v7575_v51 = vpop.f32.mrb[68].mxu0  ;;  %7579 = vmatprep.subr.bf16.mxu0 %v2613_v14 }
 0x735   :  { %v2597_v0 = vpop.f32.mrb[69].mxu0 }
 0x736   :  { %v7576_v11 = vpop.f32.mrb[70].mxu0 }
 0x737   :  { %v2615_v36 = vpack.c.bf16 %v7576_v11, %v7575_v51  ;;  %v2600_v42 = vpop.f32.mrb[71].mxu0  ;;  %7580 = vmatpush3.bf16.msra.mxu0 %v2613_v14  ;;  %v8520_v14 = vpop.eup %8519 }
 0x738   :  { %v2614_v56 = vpack.c.bf16 %v2600_v42, %v2597_v0  ;;  %v8522_v31 = vpop.eup %8521  ;;  %v2352_v21 = vmul.f32 %v8520_v14, %v10071_v52 }
 0x739   :  { %v2351_v30 = vmul.f32 %v8522_v31, %v10061_v60  ;;  %v8524_v61 = vpop.eup %8523  ;;  %v12019_v31 = vld [vmem:[#allocation16_spill] sm:$0xff] }
 0x73a   :  { %7581 = vmatprep.subr.bf16.mxu0 %v2614_v56  ;;  %v8526_v51 = vpop.eup %8525  ;;  %v3038_v60 = vmul.f32 %v8524_v61, %v10128_v18  ;;  %v12021_v61 = vld [vmem:[#allocation25_spill] sm:$0xff] }
 0x73b   :  { %7582 = vmatpush3.bf16.msra.mxu0 %v2614_v56  ;;  %v2360_v25 = vpack.c.bf16 %v2352_v21, %v2351_v30  ;;  %v3039_v52 = vmul.f32 %v8526_v51, %v10136_v16  ;;  %v12020_v30 = vld [vmem:[#allocation17_spill] sm:$0xff] }
 0x73c   :  { %7583 = vmatprep.subr.bf16.mxu0 %v2615_v36 }
 0x73d   :  { %v3054_v43 = vpack.c.bf16 %v3039_v52, %v3038_v60  ;;  %v12022_v60 = vld [vmem:[#allocation28_spill] sm:$0xff] }
 0x73f   :  { %7584 = vmatpush3.bf16.msra.mxu0 %v2615_v36 }
 0x740   :  { %7617 = vmatprep.subr.bf16.mxu0 %v8237_v23 }
 0x742   :  { %7586 = vmatmul.mubr.msk.bf16.vlgmr.msra.gmra.mrb[32].mxu0 %vm790_vm1, %v2358_v40  ;;  %v12014_v40 = vld [vmem:[#allocation23_spill] sm:$0xff] }
 0x743   :  { %7589 = vmatprep.mubr.msk.bf16.mxu0 %vm790_vm1, %v2359_v20  ;;  %7618 = vmatpush3.bf16.msra.mxu0 %v8237_v23 }
 0x744   :  { %7619 = vmatprep.subr.bf16.mxu0 %v8238_v28 }
 0x747   :  { %7620 = vmatpush3.bf16.msra.mxu0 %v8238_v28 }
 0x74a   :  { %7590 = vmatmul.mubr.msk.bf16.gmra.mrb[36].mxu0 %vm790_vm1, %v2360_v25 }
 0x74b   :  { %7621 = vmatprep.mubr.msk.bf16.mxu0 %vm342_vm0, %v9080_v15 }
 0x752   :  { %7622 = vmatmul.mubr.msk.bf16.vlgmr.msra.gmra.mrb[72].mxu0 %vm342_vm0, %v9097_v33 }
 0x753   :  { %7625 = vmatprep.mubr.msk.bf16.mxu0 %vm342_vm0, %v9114_v57 }
 0x75a   :  { %7626 = vmatmul.mubr.msk.bf16.gmra.mrb[76].mxu0 %vm342_vm0, %v9132_v2 }
 0x75b   :  { %7637 = vmatprep.mubr.msk.bf16.mxu0 %vm790_vm1, %v3054_v43  ;;  %v12023_v43 = vld [vmem:[#allocation40_spill] sm:$0xff] }
 0x771   :  { %v3633_v9 = vpop.xlane.xlu0 %3632 }
 0x772   :  { %8527 = vrcp.f32 %v3633_v9 }
 0x773   :  { %v3636_v15 = vpop.xlane.xlu1 %3635 }
 0x774   :  { %8529 = vrcp.f32 %v3636_v15 }
 0x775   :  { %8531 = vrcp.f32 %v10303_v62 }
 0x776   :  { %8533 = vrcp.f32 %v10307_v34 }
 0x777   :  { %8535 = vrcp.f32 %v10305_v63 }
 0x778   :  { %8537 = vrcp.f32 %v10309_v7 }
 0x779   :  { %8539 = vrcp.f32 %v10311_v50 }
 0x77a   :  { %8541 = vrcp.f32 %v10315_v48 }
 0x77b   :  { %8543 = vrcp.f32 %v10313_v32 }
 0x77c   :  { %v8528_v0 = vpop.eup %8527  ;;  %8545 = vrcp.f32 %v10317_v22  ;;  %v12013_v22 = vld [vmem:[#allocation26_spill] sm:$0xff] }
 0x77d   :  { %v3679_v33 = vmul.f32 %v8528_v0, %v10339_v37  ;;  %8547 = vrcp.f32 %v10319_v5 }
 0x77e   :  { %v8530_v11 = vpop.eup %8529  ;;  %8549 = vrcp.f32 %v10323_v58  ;;  %v12018_v58 = vld [vmem:[#allocation18_spill] sm:$0xff] }
 0x77f   :  { %v3680_v57 = vmul.f32 %v8530_v11, %v10341_v26  ;;  %v8532_v39 = vpop.eup %8531  ;;  %8551 = vrcp.f32 %v12013_v22  ;;  %v8814_v22 = vld [vmem:[%s11868_s2 + $0x18] sm:$0xff]  }
 0x780   :  { %v8534_v3 = vpop.eup %8533  ;;  %v3040_v50 = vmul.f32 %v8532_v39, %v10134_v1  ;;  %8553 = vrcp.f32 %v12014_v40  ;;  %v12015_v1 = vld [vmem:[#allocation38_spill] sm:$0xff]  ;;  %v12036_v40 = vld [vmem:[#allocation11_spill] sm:$0xff] }
 0x781   :  { %v3691_v36 = vpack.c.bf16 %v3680_v57, %v3679_v33  ;;  %v8536_v55 = vpop.eup %8535  ;;  %v3042_v32 = vmul.f32 %v8534_v3, %v10144_v4  ;;  %v12016_v4 = vld [vmem:[#allocation37_spill] sm:$0xff]  ;;  %8555 = vrcp.f32 %v12021_v61  ;;  %v12024_v33 = vld [vmem:[#allocation15_spill] sm:$0xff]  ;;  %v8826_v61 = vld [vmem:[%s11867_s1 + $0x118] sm:$0xff]  }
 0x782   :  { %v8538_v44 = vpop.eup %8537  ;;  %v3041_v23 = vmul.f32 %v8536_v55, %v10146_v24  ;;  %8557 = vrcp.f32 %v12022_v60  ;;  %v8828_v60 = vld [vmem:[%s11867_s1 + $0x128] sm:$0xff]  }
 0x783   :  { %7729 = vmatprep.mubr.msk.bf16.mxu1 %vm790_vm1, %v3691_v36  ;;  %v3043_v48 = vmul.f32 %v8538_v44, %v10156_v53  ;;  %v8540_v17 = vpop.eup %8539  ;;  %v12017_v53 = vld [vmem:[#allocation14_spill] sm:$0xff]  ;;  %v12025_v36 = vld [vmem:[#allocation19_spill] sm:$0xff] }
 0x784   :  { %v8542_v29 = vpop.eup %8541  ;;  %v3055_v49 = vpack.c.bf16 %v3041_v23, %v3040_v50  ;;  %v3044_v5 = vmul.f32 %v8540_v17, %v12017_v53  ;;  %v8812_v44 = vld [vmem:[%s11868_s2 + $0x8] sm:$0xff]   ;;  %v8813_v23 = vld [vmem:[%s11868_s2 + $0x10] sm:$0xff]   ;;  %v12033_v17 = vld [vmem:[#allocation8_spill] sm:$0xff] }
 0x785   :  { %v8544_v24 = vpop.eup %8543  ;;  %v3056_v28 = vpack.c.bf16 %v3043_v48, %v3042_v32  ;;  %v3046_v21 = vmul.f32 %v8542_v29, %v12019_v31  ;;  %v12031_v32 = vld [vmem:[#allocation6_spill] sm:$0xff]  ;;  %v12032_v48 = vld [vmem:[#allocation7_spill] sm:$0xff]  ;;  %v12034_v29 = vld [vmem:[#allocation9_spill] sm:$0xff] }
 0x786   :  { %v8546_v14 = vpop.eup %8545  ;;  %v3045_v20 = vmul.f32 %v8544_v24, %v12018_v58  ;;  %v12037_v24 = vld [vmem:[#allocation12_spill] sm:$0xff]  ;;  %v8818_v53 = vld [vmem:[%s11867_s1 + $0xe0] sm:$0xff]   ;;  %v8820_v58 = vld [vmem:[%s11867_s1 + $0xe8] sm:$0xff]  }
 0x787   :  { %v3047_v25 = vmul.f32 %v8546_v14, %v12020_v30  ;;  %v8548_v51 = vpop.eup %8547  ;;  %v8816_v14 = vld [vmem:[%s11868_s2 + $0x30] sm:$0xff]   ;;  %v8822_v31 = vld [vmem:[%s11867_s1 + $0xf8] sm:$0xff]   ;;  %v8824_v30 = vld [vmem:[%s11867_s1 + $0x108] sm:$0xff]  }
 0x788   :  { %v8550_v52 = vpop.eup %8549  ;;  %v3057_v9 = vpack.c.bf16 %v3045_v20, %v3044_v5  ;;  %v3048_v57 = vmul.f32 %v8548_v51, %v12024_v33  ;;  %v8819_v5 = vld [vmem:[%s11868_s2 + $0x38] sm:$0xff]   ;;  %v8821_v20 = vld [vmem:[%s11867_s1 + $0xf0] sm:$0xff]   ;;  %v8827_v51 = vld [vmem:[%s11867_s1 + $0x120] sm:$0xff]  }
 0x789   :  { %v8552_v15 = vpop.eup %8551  ;;  %v3058_v0 = vpack.c.bf16 %v3047_v25, %v3046_v21  ;;  %v8823_v21 = vld [vmem:[%s11867_s1 + $0x100] sm:$0xff]   ;;  %v8825_v25 = vld [vmem:[%s11867_s1 + $0x110] sm:$0xff]   ;;  %v8835_v33 = vld [vmem:[%s11867_s1 + $0x158] sm:$0xff]  }
 0x78a   :  { %v8554_v11 = vpop.eup %8553 }
 0x825   :  { %v7623_v18 = vpop.f32.mrb[72].mxu0 }
 0x826   :  { %v3112_v16 = vpop.f32.mrb[73].mxu0 }
 0x827   :  { %v7624_v2 = vpop.f32.mrb[74].mxu0 }
 0x828   :  { %v3144_v42 = vpack.c.bf16 %v7624_v2, %v7623_v18  ;;  %v3115_v19 = vpop.f32.mrb[75].mxu0  ;;  %v3049_v18 = vmul.f32 %v8552_v15, %v12025_v36  ;;  %v12027_v2 = vld [vmem:[#allocation20_spill] sm:$0xff]  ;;  %v8832_v15 = vld [vmem:[%s11867_s1 + $0x148] sm:$0xff]  }
 0x829   :  { %v3143_v56 = vpack.c.bf16 %v3115_v19, %v3112_v16  ;;  %v12026_v16 = vld [vmem:[#allocation39_spill] sm:$0xff]  ;;  %v12028_v19 = vld [vmem:[#allocation21_spill] sm:$0xff]  ;;  %v8837_v36 = vld [vmem:[%s11868_s2 + $0x78] sm:$0xff]  }
 0x82b   :  { %7629 = vmatprep.subr.bf16.mxu0 %v3143_v56 }
 0x82c   :  { %7630 = vmatpush3.bf16.msra.mxu0 %v3143_v56  ;;  %v3051_v56 = vmul.f32 %v8554_v11, %v12028_v19  ;;  %v8834_v11 = vld [vmem:[%s11868_s2 + $0x70] sm:$0xff]   ;;  %v8842_v19 = vld [vmem:[%s11867_s1 + $0x188] sm:$0xff]  }
 0x82d   :  { %v7627_v37 = vpop.f32.mrb[76].mxu0  ;;  %7631 = vmatprep.subr.bf16.mxu0 %v3144_v42 }
 0x82e   :  { %v3128_v26 = vpop.f32.mrb[77].mxu0 }
 0x82f   :  { %v7628_v62 = vpop.f32.mrb[78].mxu0 }
 0x830   :  { %v3146_v34 = vpack.c.bf16 %v7628_v62, %v7627_v37  ;;  %v3131_v63 = vpop.f32.mrb[79].mxu0  ;;  %7632 = vmatpush3.bf16.msra.mxu0 %v3144_v42  ;;  %v3050_v42 = vmul.f32 %v8550_v52, %v12027_v2  ;;  %v8556_v37 = vpop.eup %8555  ;;  %v8811_v62 = vld [vmem:[%s11868_s2] sm:$0xff]   ;;  %v8829_v52 = vld [vmem:[%s11867_s1 + $0x130] sm:$0xff]   ;;  %v8840_v2 = vld [vmem:[%s11867_s1 + $0x178] sm:$0xff]  }
 0x831   :  { %v3145_v7 = vpack.c.bf16 %v3131_v63, %v3128_v26  ;;  %v3059_v26 = vpack.c.bf16 %v3049_v18, %v3048_v57  ;;  %v8558_v39 = vpop.eup %8557  ;;  %v12029_v63 = vld [vmem:[#allocation22_spill] sm:$0xff]  ;;  %v8836_v57 = vld [vmem:[%s11867_s1 + $0x160] sm:$0xff]  }
 0x832   :  { %v3052_v3 = vmul.f32 %v8556_v37, %v12029_v63  ;;  %v8838_v18 = vld [vmem:[%s11867_s1 + $0x168] sm:$0xff]  }
 0x833   :  { %7633 = vmatprep.subr.bf16.mxu0 %v3145_v7 }
 0x834   :  { %7634 = vmatpush3.bf16.msra.mxu0 %v3145_v7  ;;  %v12030_v7 = vld [vmem:[#allocation24_spill] sm:$0xff] }
 0x835   :  { %7635 = vmatprep.subr.bf16.mxu0 %v3146_v34  ;;  %v3053_v55 = vmul.f32 %v8558_v39, %v12030_v7 }
 0x837   :  { %v3061_v50 = vpack.c.bf16 %v3053_v55, %v3052_v3 }
 0x838   :  { %7636 = vmatpush3.bf16.msra.mxu0 %v3146_v34  ;;  %v3060_v34 = vpack.c.bf16 %v3051_v56, %v3050_v42  ;;  %v8841_v42 = vld [vmem:[%s11867_s1 + $0x180] sm:$0xff]  }
 0x839   :  { %7657 = vmatprep.subr.bf16.mxu0 %v12015_v1 }
 0x83b   :  { %7638 = vmatmul.mubr.msk.bf16.vlgmr.msra.gmra.mrb[32].mxu0 %vm790_vm1, %v3055_v49  ;;  %v12035_v49 = vld [vmem:[#allocation10_spill] sm:$0xff] }
 0x83c   :  { %7641 = vmatprep.mubr.msk.bf16.mxu0 %vm790_vm1, %v3056_v28  ;;  %7658 = vmatpush3.bf16.msra.mxu0 %v12015_v1  ;;  %v8815_v1 = vld [vmem:[%s11867_s1 + $0xd0] sm:$0xff]   ;;  %v12038_v28 = vld [vmem:[#allocation13_spill] sm:$0xff] }
 0x83d   :  { %7659 = vmatprep.subr.bf16.mxu0 %v12016_v4 }
 0x840   :  { %7660 = vmatpush3.bf16.msra.mxu0 %v12016_v4  ;;  %v8817_v4 = vld [vmem:[%s11867_s1 + $0xd8] sm:$0xff]  }
 0x841   :  { %7661 = vmatprep.subr.bf16.mxu0 %v12023_v43 }
 0x843   :  { %7642 = vmatmul.mubr.msk.bf16.gmra.mrb[36].mxu0 %vm790_vm1, %v3057_v9  ;;  %v8831_v9 = vld [vmem:[%s11867_s1 + $0x140] sm:$0xff]  }
 0x844   :  { %7662 = vmatpush3.bf16.msra.mxu0 %v12023_v43  ;;  %7665 = vmatprep.mubr.msk.bf16.mxu0 %vm790_vm1, %v3058_v0  ;;  %v8830_v43 = vld [vmem:[%s11867_s1 + $0x138] sm:$0xff]   ;;  %v8833_v0 = vld [vmem:[%s11867_s1 + $0x150] sm:$0xff]  }
 0x845   :  { %7663 = vmatprep.subr.bf16.mxu0 %v12026_v16 }
 0x848   :  { %7664 = vmatpush3.bf16.msra.mxu0 %v12026_v16  ;;  %v8839_v16 = vld [vmem:[%s11867_s1 + $0x170] sm:$0xff]  }
 0x849   :  { %7697 = vmatprep.subr.bf16.mxu0 %v8811_v62 }
 0x84b   :  { %7666 = vmatmul.mubr.msk.bf16.vlgmr.msra.gmra.mrb[32].mxu0 %vm790_vm1, %v3059_v26 }
 0x84c   :  { %7669 = vmatprep.mubr.msk.bf16.mxu0 %vm790_vm1, %v3060_v34  ;;  %7698 = vmatpush3.bf16.msra.mxu0 %v8811_v62 }
 0x84d   :  { %7699 = vmatprep.subr.bf16.mxu0 %v8812_v44 }
 0x850   :  { %7700 = vmatpush3.bf16.msra.mxu0 %v8812_v44 }
 0x851   :  { %7709 = vmatprep.subr.bf16.mxu0 %v8813_v23 }
 0x853   :  { %7670 = vmatmul.mubr.msk.bf16.gmra.mrb[36].mxu0 %vm790_vm1, %v3061_v50  ;;  %v3639_v50 = vpop.xlane.xlu0 %3638 }
 0x854   :  { %7701 = vmatprep.mubr.msk.bf16.mxu0 %vm342_vm0, %v12031_v32  ;;  %8559 = vrcp.f32 %v3639_v50 }
 0x85b   :  { %7702 = vmatmul.mubr.msk.bf16.vlgmr.msra.gmra.mrb[80].mxu0 %vm342_vm0, %v12032_v48 }
 0x85c   :  { %7710 = vmatpush3.bf16.msra.mxu0 %v8813_v23  ;;  %7705 = vmatprep.mubr.msk.bf16.mxu0 %vm342_vm0, %v12033_v17 }
 0x85d   :  { %7711 = vmatprep.subr.bf16.mxu0 %v8814_v22 }
 0x860   :  { %7712 = vmatpush3.bf16.msra.mxu0 %v8814_v22 }
 0x861   :  { %8125 = vmatprep.subr.msk.bf16.mxu0 %vm342_vm0, %v12031_v32 }
 0x863   :  { %7706 = vmatmul.mubr.msk.bf16.gmra.mrb[84].mxu0 %vm342_vm0, %v12034_v29 }
 0x864   :  { %7713 = vmatprep.mubr.msk.bf16.mxu0 %vm342_vm0, %v12031_v32 }
 0x86b   :  { %7714 = vmatmul.mubr.msk.bf16.vlgmr.msra.gmra.mrb[88].mxu0 %vm342_vm0, %v12032_v48 }
 0x86c   :  { %7754 = vmatpush3.bf16.xpose.msra.mxu0 %v12035_v49  ;;  %7717 = vmatprep.mubr.msk.bf16.mxu0 %vm342_vm0, %v12033_v17 }
 0x86d   :  { %8126 = vmatprep.subr.msk.bf16.mxu0 %vm342_vm0, %v12032_v48 }
 0x873   :  { %7718 = vmatmul.mubr.msk.bf16.gmra.mrb[92].mxu0 %vm342_vm0, %v12034_v29 }
 0x874   :  { %7756 = vmatpush3.bf16.xpose.msra.mxu0 %v12036_v40  ;;  %7761 = vmatprep.mubr.msk.bf16.mxu0 %vm342_vm0, %v8815_v1 }
 0x875   :  { %8127 = vmatprep.subr.msk.bf16.mxu0 %vm342_vm0, %v12033_v17 }
 0x87c   :  { %7758 = vmatpush3.bf16.xpose.msra.mxu0 %v12037_v24 }
 0x87d   :  { %8128 = vmatprep.subr.msk.bf16.mxu0 %vm342_vm0, %v12034_v29 }
 0x884   :  { %7760 = vmatpush3.bf16.xpose.msra.mxu0 %v12038_v28 }
 0x885   :  { %7805 = vmatprep.subr.bf16.mxu0 %v8816_v14 }
 0x88b   :  { %7762 = vmatmul.mubr.msk.bf16.vlgmr.msra.gmra.mrb[96].mxu0 %vm342_vm0, %v8817_v4 }
 0x88c   :  { %7806 = vmatpush3.bf16.msra.mxu0 %v8816_v14  ;;  %7765 = vmatprep.mubr.msk.bf16.mxu0 %vm342_vm0, %v8818_v53 }
 0x88d   :  { %7807 = vmatprep.subr.bf16.mxu0 %v8819_v5 }
 0x890   :  { %7808 = vmatpush3.bf16.msra.mxu0 %v8819_v5 }
 0x891   :  { %8129 = vmatprep.subr.msk.bf16.mxu0 %vm342_vm0, %v12031_v32 }
 0x893   :  { %7766 = vmatmul.mubr.msk.bf16.gmra.mrb[100].mxu0 %vm342_vm0, %v8820_v58 }
 0x894   :  { %7769 = vmatprep.mubr.msk.bf16.mxu0 %vm342_vm0, %v8821_v20 }
 0x89b   :  { %7770 = vmatmul.mubr.msk.bf16.gmra.mrb[104].mxu0 %vm342_vm0, %v8822_v31 }
 0x89c   :  { %7773 = vmatprep.mubr.msk.bf16.mxu0 %vm342_vm0, %v8823_v21 }
 0x8a3   :  { %7774 = vmatmul.mubr.msk.bf16.gmra.mrb[108].mxu0 %vm342_vm0, %v8824_v30 }
 0x8a4   :  { %7809 = vmatprep.mubr.msk.bf16.mxu0 %vm342_vm0, %v12031_v32 }
 0x8ab   :  { %7810 = vmatmul.mubr.msk.bf16.vlgmr.msra.gmra.mrb[112].mxu0 %vm342_vm0, %v12032_v48 }
 0x8ac   :  { %7834 = vmatpush3.bf16.xpose.msra.mxu0 %v12035_v49  ;;  %7813 = vmatprep.mubr.msk.bf16.mxu0 %vm342_vm0, %v12033_v17 }
 0x8ad   :  { %8130 = vmatprep.subr.msk.bf16.mxu0 %vm342_vm0, %v12032_v48 }
 0x8b3   :  { %7814 = vmatmul.mubr.msk.bf16.gmra.mrb[116].mxu0 %vm342_vm0, %v12034_v29 }
 0x8b4   :  { %7836 = vmatpush3.bf16.xpose.msra.mxu0 %v12036_v40  ;;  %7841 = vmatprep.mubr.msk.bf16.mxu0 %vm342_vm0, %v8825_v25 }
 0x8b5   :  { %8131 = vmatprep.subr.msk.bf16.mxu0 %vm342_vm0, %v12033_v17 }
 0x8bc   :  { %7838 = vmatpush3.bf16.xpose.msra.mxu0 %v12037_v24 }
 0x8bd   :  { %8132 = vmatprep.subr.msk.bf16.mxu0 %vm342_vm0, %v12034_v29 }
 0x8c4   :  { %7840 = vmatpush3.bf16.xpose.msra.mxu0 %v12038_v28 }
 0x8c5   :  { %8133 = vmatprep.subr.msk.bf16.mxu0 %vm342_vm0, %v12031_v32 }
 0x8cb   :  { %7842 = vmatmul.mubr.msk.bf16.vlgmr.msra.gmra.mrb[120].mxu0 %vm342_vm0, %v8826_v61 }
 0x8cc   :  { %7914 = vmatpush3.bf16.xpose.msra.mxu0 %v12035_v49  ;;  %7845 = vmatprep.mubr.msk.bf16.mxu0 %vm342_vm0, %v8827_v51  ;;  %v3642_v49 = vpop.xlane.xlu1 %3641 }
 0x8cd   :  { %8134 = vmatprep.subr.msk.bf16.mxu0 %vm342_vm0, %v12032_v48  ;;  %8561 = vrcp.f32 %v3642_v49 }
 0x8d0   :  { %v3648_v14 = vpop.xlane.xlu1 %3647 }
 0x8d3   :  { %7846 = vmatmul.mubr.msk.bf16.gmra.mrb[124].mxu0 %vm342_vm0, %v8828_v60 }
 0x8d4   :  { %7916 = vmatpush3.bf16.xpose.msra.mxu0 %v12036_v40  ;;  %7849 = vmatprep.mubr.msk.bf16.mxu0 %vm342_vm0, %v8829_v52  ;;  %v3654_v31 = vpop.xlane.xlu1 %3653 }
 0x8d5   :  { %8135 = vmatprep.subr.msk.bf16.mxu0 %vm342_vm0, %v12033_v17 }
 0x8db   :  { %7850 = vmatmul.mubr.msk.bf16.gmra.mrb[128].mxu0 %vm342_vm0, %v8830_v43  ;;  %v3612_v43 = vpop.xlane.xlu1 %3611 }
 0x8dc   :  { %7918 = vmatpush3.bf16.xpose.msra.mxu0 %v12037_v24  ;;  %7853 = vmatprep.mubr.msk.bf16.mxu0 %vm342_vm0, %v8831_v9  ;;  %v3645_v24 = vpop.xlane.xlu0 %3644 }
 0x8dd   :  { %8136 = vmatprep.subr.msk.bf16.mxu0 %vm342_vm0, %v12034_v29  ;;  %8563 = vrcp.f32 %v3645_v24 }
 0x8de   :  { %8565 = vrcp.f32 %v3648_v14 }
 0x8e0   :  { %v3651_v20 = vpop.xlane.xlu0 %3650 }
 0x8e1   :  { %8567 = vrcp.f32 %v3651_v20 }
 0x8e2   :  { %8569 = vrcp.f32 %v3654_v31 }
 0x8e3   :  { %7854 = vmatmul.mubr.msk.bf16.gmra.mrb[132].mxu0 %vm342_vm0, %v8832_v15 }
 0x8e4   :  { %7920 = vmatpush3.bf16.xpose.msra.mxu0 %v12038_v28  ;;  %7921 = vmatprep.mubr.msk.bf16.mxu0 %vm342_vm0, %v8833_v0  ;;  %v3609_v52 = vpop.xlane.xlu0 %3608 }
 0x8e5   :  { %7965 = vmatprep.subr.bf16.mxu0 %v8834_v11  ;;  %8571 = vrcp.f32 %v3609_v52 }
 0x8e6   :  { %8573 = vrcp.f32 %v3612_v43 }
 0x8eb   :  { %7922 = vmatmul.mubr.msk.bf16.vlgmr.msra.gmra.mrb[136].mxu0 %vm342_vm0, %v8835_v33  ;;  %v3615_v33 = vpop.xlane.xlu0 %3614 }
 0x8ec   :  { %7925 = vmatprep.mubr.msk.bf16.mxu0 %vm342_vm0, %v8836_v57  ;;  %7966 = vmatpush3.bf16.msra.mxu0 %v8834_v11  ;;  %v8560_v11 = vpop.eup %8559  ;;  %8575 = vrcp.f32 %v3615_v33 }
 0x8ed   :  { %7967 = vmatprep.subr.bf16.mxu0 %v8837_v36 }
 0x8f0   :  { %7968 = vmatpush3.bf16.msra.mxu0 %v8837_v36 }
 0x8f3   :  { %7926 = vmatmul.mubr.msk.bf16.gmra.mrb[140].mxu0 %vm342_vm0, %v8838_v18  ;;  %v8562_v18 = vpop.eup %8561 }
 0x8f4   :  { %7929 = vmatprep.mubr.msk.bf16.mxu0 %vm342_vm0, %v8839_v16  ;;  %v3618_v16 = vpop.xlane.xlu1 %3617 }
 0x8f5   :  { %8577 = vrcp.f32 %v3618_v16 }
 0x8f8   :  { %v3624_v49 = vpop.xlane.xlu1 %3623 }
 0x8fb   :  { %7930 = vmatmul.mubr.msk.bf16.gmra.mrb[144].mxu0 %vm342_vm0, %v8840_v2 }
 0x8fc   :  { %7933 = vmatprep.mubr.msk.bf16.mxu0 %vm342_vm0, %v8841_v42  ;;  %v8564_v42 = vpop.eup %8563 }
 0x8fd   :  { %v3683_v50 = vmul.f32 %v8564_v42, %v10359_v47  ;;  %v3630_v47 = vpop.xlane.xlu1 %3629 }
 0x903   :  { %7934 = vmatmul.mubr.msk.bf16.gmra.mrb[148].mxu0 %vm342_vm0, %v8842_v19  ;;  %v8566_v19 = vpop.eup %8565 }
 0x904   :  { %7969 = vmatprep.mubr.msk.bf16.mxu0 %vm342_vm0, %v12031_v32 }
 0x90b   :  { %7970 = vmatmul.mubr.msk.bf16.vlgmr.msra.gmra.mrb[152].mxu0 %vm342_vm0, %v12032_v48 }
 0x90c   :  { %7973 = vmatprep.mubr.msk.bf16.mxu0 %vm342_vm0, %v12033_v17 }
 0x913   :  { %7974 = vmatmul.mubr.msk.bf16.gmra.mrb[156].mxu0 %vm342_vm0, %v12034_v29 }
 0x91e   :  { %v10679_v56 = vpop.f32.mrb[32].mxu0 }
 0x91f   :  { %12039 = vst [vmem:[#allocation30_spill] sm:$0xff] %v10679_v56  ;;  %v10681_v37 = vpop.f32.mrb[33].mxu0 }
 0x920   :  { %12040 = vst [vmem:[#allocation27_spill] sm:$0xff] %v10681_v37  ;;  %v10683_v26 = vpop.f32.mrb[34].mxu0 }
 0x921   :  { %12041 = vst [vmem:[#allocation29_spill] sm:$0xff] %v10683_v26  ;;  %v10685_v62 = vpop.f32.mrb[35].mxu0 }
 0x922   :  { %12042 = vst [vmem:[#allocation32_spill] sm:$0xff] %v10685_v62 }
 0x926   :  { %v10687_v39 = vpop.f32.mrb[36].mxu0 }
 0x927   :  { %12043 = vst [vmem:[#allocation34_spill] sm:$0xff] %v10687_v39  ;;  %v10689_v34 = vpop.f32.mrb[37].mxu0 }
 0x928   :  { %12044 = vst [vmem:[#allocation31_spill] sm:$0xff] %v10689_v34  ;;  %v10691_v63 = vpop.f32.mrb[38].mxu0 }
 0x929   :  { %12045 = vst [vmem:[#allocation33_spill] sm:$0xff] %v10691_v63  ;;  %v10693_v3 = vpop.f32.mrb[39].mxu0 }
 0x92a   :  { %12046 = vst [vmem:[#allocation36_spill] sm:$0xff] %v10693_v3 }
 0x92e   :  { %v7703_v7 = vpop.f32.mrb[80].mxu0 }
 0x92f   :  { %v3729_v55 = vpop.f32.mrb[81].mxu0 }
 0x930   :  { %v7704_v44 = vpop.f32.mrb[82].mxu0 }
 0x931   :  { %v10695_v23 = vpack.c.bf16 %v7704_v44, %v7703_v7  ;;  %v3732_v22 = vpop.f32.mrb[83].mxu0  ;;  %v3681_v7 = vmul.f32 %v8560_v11, %v10349_v10  ;;  %v3621_v44 = vpop.xlane.xlu0 %3620 }
 0x932   :  { %v10697_v40 = vpack.c.bf16 %v3732_v22, %v3729_v55  ;;  %v3682_v55 = vmul.f32 %v8562_v18, %v10351_v27  ;;  %v3684_v22 = vmul.f32 %v8566_v19, %v10361_v54  ;;  %8579 = vrcp.f32 %v3621_v44  ;;  %v8844_v18 = vld [vmem:[%s11868_s2 + $0x28] sm:$0xff]  }
 0x933   :  { %8581 = vrcp.f32 %v3624_v49 }
 0x934   :  { %v3693_v14 = vpack.c.bf16 %v3684_v22, %v3683_v50 }
 0x936   :  { %v7707_v1 = vpop.f32.mrb[84].mxu0 }
 0x937   :  { %v3745_v28 = vpop.f32.mrb[85].mxu0 }
 0x938   :  { %v7708_v4 = vpop.f32.mrb[86].mxu0 }
 0x939   :  { %v10699_v53 = vpack.c.bf16 %v7708_v4, %v7707_v1  ;;  %v3748_v5 = vpop.f32.mrb[87].mxu0  ;;  %v8568_v1 = vpop.eup %8567 }
 0x93a   :  { %v10701_v58 = vpack.c.bf16 %v3748_v5, %v3745_v28  ;;  %v8570_v24 = vpop.eup %8569  ;;  %v3692_v28 = vpack.c.bf16 %v3682_v55, %v3681_v7  ;;  %v3627_v4 = vpop.xlane.xlu0 %3626  ;;  %v3685_v54 = vmul.f32 %v8568_v1, %v10369_v13 }
 0x93b   :  { %v8572_v10 = vpop.eup %8571  ;;  %v3686_v5 = vmul.f32 %v8570_v24, %v10371_v46  ;;  %8583 = vrcp.f32 %v3627_v4 }
 0x93c   :  { %v8574_v27 = vpop.eup %8573  ;;  %v3671_v20 = vmul.f32 %v8572_v10, %v10379_v8  ;;  %8585 = vrcp.f32 %v3630_v47 }
 0x93d   :  { %v3672_v31 = vmul.f32 %v8574_v27, %v10381_v38 }
 0x93e   :  { %v7715_v21 = vpop.f32.mrb[88].mxu0 }
 0x93f   :  { %v3798_v30 = vpop.f32.mrb[89].mxu0 }
 0x940   :  { %v7716_v25 = vpop.f32.mrb[90].mxu0 }
 0x941   :  { %v3830_v61 = vpack.c.bf16 %v7716_v25, %v7715_v21  ;;  %v3801_v51 = vpop.f32.mrb[91].mxu0  ;;  %v8576_v21 = vpop.eup %8575 }
 0x942   :  { %v3829_v60 = vpack.c.bf16 %v3801_v51, %v3798_v30  ;;  %v8578_v30 = vpop.eup %8577  ;;  %v3673_v13 = vmul.f32 %v8576_v21, %v10387_v41 }
 0x943   :  { %v8580_v25 = vpop.eup %8579  ;;  %v3674_v46 = vmul.f32 %v8578_v30, %v10389_v35 }
 0x944   :  { %7721 = vmatprep.subr.bf16.mxu1 %v3829_v60  ;;  %v8582_v51 = vpop.eup %8581 }
 0x945   :  { %7722 = vmatpush3.bf16.msra.mxu1 %v3829_v60  ;;  %v3676_v60 = vmul.f32 %v8582_v51, %v10397_v6  ;;  %v8584_v41 = vpop.eup %8583  ;;  %v3688_v35 = vpack.c.bf16 %v3674_v46, %v3673_v13 }
 0x946   :  { %v7719_v9 = vpop.f32.mrb[92].mxu0  ;;  %7723 = vmatprep.subr.bf16.mxu1 %v3830_v61  ;;  %v8586_v6 = vpop.eup %8585  ;;  %v3677_v33 = vmul.f32 %v8584_v41, %v10403_v59 }
 0x947   :  { %v3814_v15 = vpop.f32.mrb[93].mxu0 }
 0x948   :  { %v7720_v0 = vpop.f32.mrb[94].mxu0 }
 0x949   :  { %v3832_v57 = vpack.c.bf16 %v7720_v0, %v7719_v9  ;;  %v3817_v36 = vpop.f32.mrb[95].mxu0  ;;  %7724 = vmatpush3.bf16.msra.mxu1 %v3830_v61  ;;  %v3687_v61 = vpack.c.bf16 %v3672_v31, %v3671_v20 }
 0x94a   :  { %v3831_v2 = vpack.c.bf16 %v3817_v36, %v3814_v15 }
 0x94c   :  { %7725 = vmatprep.subr.bf16.mxu1 %v3831_v2 }
 0x94d   :  { %7726 = vmatpush3.bf16.msra.mxu1 %v3831_v2 }
 0x94e   :  { %7727 = vmatprep.subr.bf16.mxu1 %v3832_v57 }
 0x951   :  { %7728 = vmatpush3.bf16.msra.mxu1 %v3832_v57  ;;  %v3678_v57 = vmul.f32 %v8586_v6, %v10405_v12 }
 0x952   :  { %7737 = vmatprep.subr.bf16.mxu1 %v10697_v40 }
 0x953   :  { %v3690_v12 = vpack.c.bf16 %v3678_v57, %v3677_v33 }
 0x954   :  { %7730 = vmatmul.mubr.msk.bf16.vlgmr.msra.gmra.mrb[120].mxu1 %vm790_vm1, %v3692_v28 }
 0x955   :  { %7733 = vmatprep.mubr.msk.bf16.mxu1 %vm790_vm1, %v3693_v14  ;;  %7738 = vmatpush3.bf16.msra.mxu1 %v10697_v40  ;;  %v3694_v40 = vpack.c.bf16 %v3686_v5, %v3685_v54 }
 0x956   :  { %7739 = vmatprep.subr.bf16.mxu1 %v10695_v23 }
 0x959   :  { %7740 = vmatpush3.bf16.msra.mxu1 %v10695_v23  ;;  %v3675_v23 = vmul.f32 %v8580_v25, %v10395_v45  ;;  %v8843_v45 = vld [vmem:[%s11868_s2 + $0x20] sm:$0xff]  }
 0x95a   :  { %7741 = vmatprep.subr.bf16.mxu1 %v10701_v58 }
 0x95b   :  { %v3689_v15 = vpack.c.bf16 %v3676_v60, %v3675_v23 }
 0x95c   :  { %7734 = vmatmul.mubr.msk.bf16.gmra.mrb[124].mxu1 %vm790_vm1, %v3694_v40 }
 0x95d   :  { %7742 = vmatpush3.bf16.msra.mxu1 %v10701_v58  ;;  %7745 = vmatprep.mubr.msk.bf16.mxu1 %vm790_vm1, %v3687_v61 }
 0x95e   :  { %v10723_v8 = vpop.f32.mrb[96].mxu0  ;;  %7743 = vmatprep.subr.bf16.mxu1 %v10699_v53 }
 0x95f   :  { %v10726_v38 = vpop.f32.mrb[97].mxu0  ;;  %v4090_v0 = vsel %vm790_vm1, %v10723_v8, -inf }
 0x960   :  { %v10730_v52 = vpop.f32.mrb[98].mxu0  ;;  %v4084_v58 = vsel %vm790_vm1, %v10726_v38, -inf }
 0x961   :  { %4085 = vmax.xlane.f32.xlu0 %v4084_v58  ;;  %v10734_v43 = vpop.f32.mrb[99].mxu0  ;;  %7744 = vmatpush3.bf16.msra.mxu1 %v10699_v53  ;;  %v4093_v11 = vsel %vm790_vm1, %v10730_v52, -inf }
 0x962   :  { %v4087_v9 = vsel %vm790_vm1, %v10734_v43, -inf  ;;  %7777 = vmatprep.subr.bf16.mxu1 %v8843_v45 }
 0x963   :  { %4088 = vmax.xlane.f32.xlu1 %v4087_v9 }
 0x964   :  { %7746 = vmatmul.mubr.msk.bf16.vlgmr.msra.gmra.mrb[120].mxu1 %vm790_vm1, %v3688_v35 }
 0x965   :  { %4091 = vmax.xlane.f32.xlu0 %v4090_v0  ;;  %7749 = vmatprep.mubr.msk.bf16.mxu1 %vm790_vm1, %v3689_v15 }
 0x966   :  { %v10746_v53 = vpop.f32.mrb[100].mxu0  ;;  %7778 = vmatpush3.bf16.msra.mxu1 %v8843_v45 }
 0x967   :  { %v10752_v36 = vpop.f32.mrb[101].mxu0  ;;  %4094 = vmax.xlane.f32.xlu1 %v4093_v11  ;;  %7779 = vmatprep.subr.bf16.mxu1 %v8844_v18  ;;  %v4102_v19 = vsel %vm790_vm1, %v10746_v53, -inf }
 0x968   :  { %v10757_v16 = vpop.f32.mrb[102].mxu0  ;;  %v4096_v2 = vsel %vm790_vm1, %v10752_v36, -inf }
 0x969   :  { %4097 = vmax.xlane.f32.xlu0 %v4096_v2  ;;  %v10761_v42 = vpop.f32.mrb[103].mxu0  ;;  %v4105_v55 = vsel %vm790_vm1, %v10757_v16, -inf }
 0x96a   :  { %v4099_v59 = vsel %vm790_vm1, %v10761_v42, -inf  ;;  %7780 = vmatpush3.bf16.msra.mxu1 %v8844_v18 }
 0x96b   :  { %4100 = vmax.xlane.f32.xlu1 %v4099_v59 }
 0x96c   :  { %7750 = vmatmul.mubr.msk.bf16.gmra.mrb[124].mxu1 %vm790_vm1, %v3690_v12 }
 0x96d   :  { %4103 = vmax.xlane.f32.xlu0 %v4102_v19  ;;  %7781 = vmatprep.mubr.msk.bf16.mxu1 %vm342_vm0, %v12031_v32 }
 0x96e   :  { %v10770_v7 = vpop.f32.mrb[104].mxu0 }
 0x96f   :  { %v10774_v44 = vpop.f32.mrb[105].mxu0  ;;  %4106 = vmax.xlane.f32.xlu1 %v4105_v55  ;;  %v4114_v24 = vsel %vm790_vm1, %v10770_v7, -inf }
 0x970   :  { %v10776_v50 = vpop.f32.mrb[106].mxu0  ;;  %v4108_v22 = vsel %vm790_vm1, %v10774_v44, -inf }
 0x971   :  { %4109 = vmax.xlane.f32.xlu0 %v4108_v22  ;;  %v10780_v49 = vpop.f32.mrb[107].mxu0  ;;  %v4117_v10 = vsel %vm790_vm1, %v10776_v50, -inf }
 0x972   :  { %v4111_v1 = vsel %vm790_vm1, %v10780_v49, -inf }
 0x973   :  { %4112 = vmax.xlane.f32.xlu1 %v4111_v1 }
 0x974   :  { %7782 = vmatmul.mubr.msk.bf16.vlgmr.msra.gmra.mrb[128].mxu1 %vm342_vm0, %v12032_v48 }
 0x975   :  { %4115 = vmax.xlane.f32.xlu0 %v4114_v24  ;;  %7785 = vmatprep.mubr.msk.bf16.mxu1 %vm342_vm0, %v12033_v17 }
 0x976   :  { %v10790_v28 = vpop.f32.mrb[108].mxu0 }
 0x977   :  { %v10794_v14 = vpop.f32.mrb[109].mxu0  ;;  %4118 = vmax.xlane.f32.xlu1 %v4117_v10  ;;  %v4126_v5 = vsel %vm790_vm1, %v10790_v28, -inf }
 0x978   :  { %v10796_v27 = vpop.f32.mrb[110].mxu0  ;;  %v4120_v4 = vsel %vm790_vm1, %v10794_v14, -inf }
 0x979   :  { %4121 = vmax.xlane.f32.xlu0 %v4120_v4  ;;  %v10800_v47 = vpop.f32.mrb[111].mxu0  ;;  %v4129_v31 = vsel %vm790_vm1, %v10796_v27, -inf }
 0x97a   :  { %v4123_v54 = vsel %vm790_vm1, %v10800_v47, -inf }
 0x97b   :  { %4124 = vmax.xlane.f32.xlu1 %v4123_v54 }
 0x97c   :  { %7786 = vmatmul.mubr.msk.bf16.gmra.mrb[132].mxu1 %vm342_vm0, %v12034_v29 }
 0x97d   :  { %4127 = vmax.xlane.f32.xlu0 %v4126_v5 }
 0x97e   :  { %v7811_v20 = vpop.f32.mrb[112].mxu0 }
 0x97f   :  { %v4456_v21 = vpop.f32.mrb[113].mxu0  ;;  %4130 = vmax.xlane.f32.xlu1 %v4129_v31 }
 0x980   :  { %v7812_v30 = vpop.f32.mrb[114].mxu0 }
 0x981   :  { %v10810_v40 = vpack.c.bf16 %v7812_v30, %v7811_v20  ;;  %v4459_v25 = vpop.f32.mrb[115].mxu0 }
 0x982   :  { %v10812_v61 = vpack.c.bf16 %v4459_v25, %v4456_v21 }
 0x986   :  { %v7815_v51 = vpop.f32.mrb[116].mxu0 }
 0x987   :  { %v4472_v13 = vpop.f32.mrb[117].mxu0 }
 0x988   :  { %v7816_v46 = vpop.f32.mrb[118].mxu0 }
 0x989   :  { %v10814_v23 = vpack.c.bf16 %v7816_v46, %v7815_v51  ;;  %v4475_v60 = vpop.f32.mrb[119].mxu0 }
 0x98a   :  { %v10816_v58 = vpack.c.bf16 %v4475_v60, %v4472_v13 }
 0x99e   :  { %v10818_v41 = vpop.f32.mrb[120].mxu0 }
 0x99f   :  { %v10820_v35 = vpop.f32.mrb[121].mxu0 }
 0x9a0   :  { %v10822_v9 = vpop.f32.mrb[122].mxu0 }
 0x9a1   :  { %v10824_v45 = vpop.f32.mrb[123].mxu0 }
 0x9a6   :  { %v10826_v6 = vpop.f32.mrb[124].mxu0 }
 0x9a7   :  { %v10828_v15 = vpop.f32.mrb[125].mxu0 }
 0x9a8   :  { %v10830_v0 = vpop.f32.mrb[126].mxu0 }
 0x9a9   :  { %v10832_v11 = vpop.f32.mrb[127].mxu0 }
 0x9ae   :  { %v10834_v33 = vpop.f32.mrb[128].mxu0 }
 0x9af   :  { %v10836_v57 = vpop.f32.mrb[129].mxu0 }
 0x9b0   :  { %v10838_v18 = vpop.f32.mrb[130].mxu0 }
 0x9b1   :  { %v10840_v2 = vpop.f32.mrb[131].mxu0 }
 0x9b6   :  { %v10842_v59 = vpop.f32.mrb[132].mxu0 }
 0x9b7   :  { %v10844_v12 = vpop.f32.mrb[133].mxu0 }
 0x9b8   :  { %v10846_v19 = vpop.f32.mrb[134].mxu0 }
 0x9b9   :  { %v10848_v55 = vpop.f32.mrb[135].mxu0 }
 0x9be   :  { %v10850_v22 = vpop.f32.mrb[136].mxu0 }
 0x9bf   :  { %v10852_v1 = vpop.f32.mrb[137].mxu0 }
 0x9c0   :  { %v10854_v24 = vpop.f32.mrb[138].mxu0 }
 0x9c1   :  { %v10856_v10 = vpop.f32.mrb[139].mxu0 }
 0x9c6   :  { %v10858_v4 = vpop.f32.mrb[140].mxu0 }
 0x9c7   :  { %v10860_v54 = vpop.f32.mrb[141].mxu0 }
 0x9c8   :  { %v10862_v5 = vpop.f32.mrb[142].mxu0 }
 0x9c9   :  { %12047 = vst [vmem:[#allocation35_spill] sm:$0xff] %v10862_v5  ;;  %v10864_v20 = vpop.f32.mrb[143].mxu0 }
 0x9ce   :  { %v10866_v31 = vpop.f32.mrb[144].mxu0 }
 0x9cf   :  { %12048 = vst [vmem:[#allocation26_spill] sm:$0xff] %v10866_v31  ;;  %v10868_v21 = vpop.f32.mrb[145].mxu0 }
 0x9d0   :  { %12049 = vst [vmem:[#allocation23_spill] sm:$0xff] %v10868_v21  ;;  %v10870_v30 = vpop.f32.mrb[146].mxu0 }
 0x9d1   :  { %12050 = vst [vmem:[#allocation38_spill] sm:$0xff] %v10870_v30  ;;  %v10872_v25 = vpop.f32.mrb[147].mxu0 }
 0x9d2   :  { %12051 = vst [vmem:[#allocation37_spill] sm:$0xff] %v10872_v25 }
 0x9d6   :  { %v10874_v51 = vpop.f32.mrb[148].mxu0 }
 0x9d7   :  { %12052 = vst [vmem:[#allocation14_spill] sm:$0xff] %v10874_v51  ;;  %v10876_v13 = vpop.f32.mrb[149].mxu0 }
 0x9d8   :  { %12053 = vst [vmem:[#allocation18_spill] sm:$0xff] %v10876_v13  ;;  %v10878_v46 = vpop.f32.mrb[150].mxu0 }
 0x9d9   :  { %12054 = vst [vmem:[#allocation16_spill] sm:$0xff] %v10878_v46  ;;  %v10880_v60 = vpop.f32.mrb[151].mxu0 }
 0x9da   :  { %12055 = vst [vmem:[#allocation17_spill] sm:$0xff] %v10880_v60 }
 0x9de   :  { %v7971_v63 = vpop.f32.mrb[152].mxu0 }
 0x9df   :  { %v5634_v39 = vpop.f32.mrb[153].mxu0 }
 0x9e0   :  { %v7972_v3 = vpop.f32.mrb[154].mxu0 }
 0x9e1   :  { %v10882_v34 = vpack.c.bf16 %v7972_v3, %v7971_v63  ;;  %v5637_v26 = vpop.f32.mrb[155].mxu0 }
 0x9e2   :  { %v10884_v56 = vpack.c.bf16 %v5637_v26, %v5634_v39 }
 0x9e3   :  { %12056 = vst [vmem:[#allocation25_spill] sm:$0xff] %v10882_v34 }
 0x9e6   :  { %v7975_v62 = vpop.f32.mrb[156].mxu0 }
 0x9e7   :  { %v5650_v37 = vpop.f32.mrb[157].mxu0 }
 0x9e8   :  { %v7976_v30 = vpop.f32.mrb[158].mxu0 }
 0x9e9   :  { %v10886_v31 = vpack.c.bf16 %v7976_v30, %v7975_v62  ;;  %v5653_v51 = vpop.f32.mrb[159].mxu0 }
 0x9ea   :  { %v10888_v25 = vpack.c.bf16 %v5653_v51, %v5650_v37 }
 0x9eb   :  { %12057 = vst [vmem:[#allocation28_spill] sm:$0xff] %v10886_v31 }
 0x9ee   :  { %v4086_v13 = vpop.xlane.xlu0 %4085 }
 0x9ef   :  { %v4132_v46 = vsub.f32 %v10726_v38, %v4086_v13 }
 0x9f0   :  { %v4089_v60 = vpop.xlane.xlu1 %4088 }
 0x9f1   :  { %v4148_v21 = vmul.f32 1.442695, %v4132_v46  ;;  %v4133_v5 = vsub.f32 %v10734_v43, %v4089_v60 }
 0x9f2   :  { %v4092_v63 = vpop.xlane.xlu0 %4091 }
 0x9f3   :  { %8587 = vpow2.f32 %v4148_v21  ;;  %v4150_v3 = vmul.f32 1.442695, %v4133_v5  ;;  %v4134_v26 = vsub.f32 %v10723_v8, %v4092_v63 }
 0x9f4   :  { %v4095_v39 = vpop.xlane.xlu1 %4094 }
 0x9f5   :  { %8589 = vpow2.f32 %v4150_v3  ;;  %v4152_v34 = vmul.f32 1.442695, %v4134_v26  ;;  %v4135_v62 = vsub.f32 %v10730_v52, %v4095_v39 }
 0x9f6   :  { %v4098_v30 = vpop.xlane.xlu0 %4097 }
 0x9f7   :  { %8591 = vpow2.f32 %v4152_v34  ;;  %v4154_v37 = vmul.f32 1.442695, %v4135_v62  ;;  %v4136_v51 = vsub.f32 %v10752_v36, %v4098_v30 }
 0x9f8   :  { %v4101_v38 = vpop.xlane.xlu1 %4100 }
 0x9f9   :  { %8593 = vpow2.f32 %v4154_v37  ;;  %v4156_v13 = vmul.f32 1.442695, %v4136_v51  ;;  %v4137_v43 = vsub.f32 %v10761_v42, %v4101_v38 }
 0x9fa   :  { %v4104_v46 = vpop.xlane.xlu0 %4103 }
 0x9fb   :  { %8595 = vpow2.f32 %v4156_v13  ;;  %v4158_v5 = vmul.f32 1.442695, %v4137_v43  ;;  %v4138_v8 = vsub.f32 %v10746_v53, %v4104_v46 }
 0x9fc   :  { %v4107_v21 = vpop.xlane.xlu1 %4106 }
 0x9fd   :  { %v10897_v60 = vpop.eup %8587  ;;  %8597 = vpow2.f32 %v4158_v5  ;;  %v4160_v52 = vmul.f32 1.442695, %v4138_v8  ;;  %v4139_v34 = vsub.f32 %v10757_v16, %v4107_v21 }
 0x9fe   :  { %v4110_v63 = vpop.xlane.xlu0 %4109  ;;  %v4180_v36 = vsel %vm790_vm1, %v10897_v60, 0.0 }
 0x9ff   :  { %v10902_v3 = vpop.eup %8589  ;;  %8599 = vpow2.f32 %v4160_v52  ;;  %v4162_v42 = vmul.f32 1.442695, %v4139_v34  ;;  %v4140_v26 = vsub.f32 %v10774_v44, %v4110_v63  ;;  %4181 = vadd.xlane.f32.xlu0 %v4180_v36 }
 0xa00   :  { %v4113_v39 = vpop.xlane.xlu1 %4112  ;;  %v4183_v53 = vsel %vm790_vm1, %v10902_v3, 0.0 }
 0xa01   :  { %v10907_v62 = vpop.eup %8591  ;;  %8601 = vpow2.f32 %v4162_v42  ;;  %v4164_v30 = vmul.f32 1.442695, %v4140_v26  ;;  %v4141_v16 = vsub.f32 %v10780_v49, %v4113_v39  ;;  %4184 = vadd.xlane.f32.xlu1 %v4183_v53 }
 0xa02   :  { %v4116_v37 = vpop.xlane.xlu0 %4115  ;;  %v4186_v51 = vsel %vm790_vm1, %v10907_v62, 0.0 }
 0xa03   :  { %v10912_v38 = vpop.eup %8593  ;;  %8603 = vpow2.f32 %v4164_v30  ;;  %v4166_v44 = vmul.f32 1.442695, %v4141_v16  ;;  %v4142_v13 = vsub.f32 %v10770_v7, %v4116_v37  ;;  %4187 = vadd.xlane.f32.xlu0 %v4186_v51 }
 0xa04   :  { %v4119_v43 = vpop.xlane.xlu1 %4118  ;;  %v4189_v46 = vsel %vm790_vm1, %v10912_v38, 0.0 }
 0xa05   :  { %v10917_v5 = vpop.eup %8595  ;;  %8605 = vpow2.f32 %v4166_v44  ;;  %v4168_v49 = vmul.f32 1.442695, %v4142_v13  ;;  %v4143_v8 = vsub.f32 %v10776_v50, %v4119_v43  ;;  %4190 = vadd.xlane.f32.xlu1 %v4189_v46 }
 0xa06   :  { %v4122_v21 = vpop.xlane.xlu0 %4121  ;;  %v4192_v52 = vsel %vm790_vm1, %v10917_v5, 0.0 }
 0xa07   :  { %v10922_v34 = vpop.eup %8597  ;;  %8607 = vpow2.f32 %v4168_v49  ;;  %v4170_v7 = vmul.f32 1.442695, %v4143_v8  ;;  %v4144_v63 = vsub.f32 %v10794_v14, %v4122_v21  ;;  %4193 = vadd.xlane.f32.xlu0 %v4192_v52 }
 0xa08   :  { %v4125_v36 = vpop.xlane.xlu1 %4124  ;;  %v4195_v42 = vsel %vm790_vm1, %v10922_v34, 0.0 }
 0xa09   :  { %v10927_v26 = vpop.eup %8599  ;;  %8609 = vpow2.f32 %v4170_v7  ;;  %v4172_v50 = vmul.f32 1.442695, %v4144_v63  ;;  %v4145_v39 = vsub.f32 %v10800_v47, %v4125_v36  ;;  %4196 = vadd.xlane.f32.xlu1 %v4195_v42 }
 0xa0a   :  { %v4128_v53 = vpop.xlane.xlu0 %4127  ;;  %v4198_v30 = vsel %vm790_vm1, %v10927_v26, 0.0 }
 0xa0b   :  { %v10932_v16 = vpop.eup %8601  ;;  %8611 = vpow2.f32 %v4172_v50  ;;  %v4174_v14 = vmul.f32 1.442695, %v4145_v39  ;;  %v4146_v37 = vsub.f32 %v10790_v28, %v4128_v53  ;;  %4199 = vadd.xlane.f32.xlu0 %v4198_v30 }
 0xa0c   :  { %v4131_v51 = vpop.xlane.xlu1 %4130  ;;  %v4201_v44 = vsel %vm790_vm1, %v10932_v16, 0.0 }
 0xa0d   :  { %v10937_v13 = vpop.eup %8603  ;;  %8613 = vpow2.f32 %v4174_v14  ;;  %v4176_v47 = vmul.f32 1.442695, %v4146_v37  ;;  %v4147_v43 = vsub.f32 %v10796_v27, %v4131_v51  ;;  %4202 = vadd.xlane.f32.xlu1 %v4201_v44  ;;  %v4673_v37 = vsel %vm790_vm1, %v10820_v35, -inf }
 0xa0e   :  { %v4204_v46 = vsel %vm790_vm1, %v10937_v13, 0.0  ;;  %v4676_v51 = vsel %vm790_vm1, %v10824_v45, -inf  ;;  %v4679_v44 = vsel %vm790_vm1, %v10818_v41, -inf }
 0xa0f   :  { %v10942_v49 = vpop.eup %8605  ;;  %8615 = vpow2.f32 %v4176_v47  ;;  %v4178_v8 = vmul.f32 1.442695, %v4147_v43  ;;  %4205 = vadd.xlane.f32.xlu0 %v4204_v46  ;;  %v4682_v47 = vsel %vm790_vm1, %v10822_v9, -inf  ;;  %v4685_v43 = vsel %vm790_vm1, %v10828_v15, -inf }
 0xa10   :  { %v4207_v28 = vsel %vm790_vm1, %v10942_v49, 0.0  ;;  %v4688_v46 = vsel %vm790_vm1, %v10832_v11, -inf }
 0xa11   :  { %v10946_v21 = vpop.eup %8607  ;;  %8617 = vpow2.f32 %v4178_v8  ;;  %4208 = vadd.xlane.f32.xlu1 %v4207_v28  ;;  %v4691_v8 = vsel %vm790_vm1, %v10826_v6, -inf  ;;  %v4694_v28 = vsel %vm790_vm1, %v10830_v0, -inf }
 0xa12   :  { %v4210_v52 = vsel %vm790_vm1, %v10946_v21, 0.0 }
 0xa13   :  { %v10950_v27 = vpop.eup %8609  ;;  %4211 = vadd.xlane.f32.xlu0 %v4210_v52 }
 0xa14   :  { %v4213_v7 = vsel %vm790_vm1, %v10950_v27, 0.0 }
 0xa15   :  { %v10954_v63 = vpop.eup %8611  ;;  %4214 = vadd.xlane.f32.xlu1 %v4213_v7 }
 0xa16   :  { %v4216_v36 = vsel %vm790_vm1, %v10954_v63, 0.0 }
 0xa17   :  { %v10958_v42 = vpop.eup %8613  ;;  %4217 = vadd.xlane.f32.xlu0 %v4216_v36 }
 0xa18   :  { %v4219_v50 = vsel %vm790_vm1, %v10958_v42, 0.0 }
 0xa19   :  { %v10962_v39 = vpop.eup %8615  ;;  %4220 = vadd.xlane.f32.xlu1 %v4219_v50 }
 0xa1a   :  { %v4222_v53 = vsel %vm790_vm1, %v10962_v39, 0.0 }
 0xa1b   :  { %v10966_v30 = vpop.eup %8617  ;;  %4223 = vadd.xlane.f32.xlu0 %v4222_v53 }
 0xa1c   :  { %v4225_v14 = vsel %vm790_vm1, %v10966_v30, 0.0 }
 0xa1d   :  { %4226 = vadd.xlane.f32.xlu1 %v4225_v14 }
 0xa1f   :  { %4674 = vmax.xlane.f32.xlu0 %v4673_v37 }
 0xa21   :  { %4677 = vmax.xlane.f32.xlu1 %v4676_v51 }
 0xa23   :  { %4680 = vmax.xlane.f32.xlu0 %v4679_v44 }
 0xa25   :  { %4683 = vmax.xlane.f32.xlu1 %v4682_v47 }
 0xa27   :  { %4686 = vmax.xlane.f32.xlu0 %v4685_v43 }
 0xa29   :  { %4689 = vmax.xlane.f32.xlu1 %v4688_v46 }
 0xa2b   :  { %4692 = vmax.xlane.f32.xlu0 %v4691_v8 }
 0xa2d   :  { %4695 = vmax.xlane.f32.xlu1 %v4694_v28 }
 0xa47   :  { %v7783_v52 = vpop.f32.mrb[128].mxu1 }
 0xa48   :  { %v4302_v7 = vpop.f32.mrb[129].mxu1 }
 0xa49   :  { %v7784_v36 = vpop.f32.mrb[130].mxu1 }
 0xa4a   :  { %v4334_v50 = vpack.c.bf16 %v7784_v36, %v7783_v52  ;;  %v4305_v53 = vpop.f32.mrb[131].mxu1 }
 0xa4b   :  { %v4333_v14 = vpack.c.bf16 %v4305_v53, %v4302_v7 }
 0xa4d   :  { %7789 = vmatprep.subr.bf16.mxu1 %v4333_v14 }
 0xa4e   :  { %7790 = vmatpush3.bf16.msra.mxu1 %v4333_v14 }
 0xa4f   :  { %v7787_v37 = vpop.f32.mrb[132].mxu1  ;;  %7791 = vmatprep.subr.bf16.mxu1 %v4334_v50 }
 0xa50   :  { %v4318_v51 = vpop.f32.mrb[133].mxu1 }
 0xa51   :  { %v7788_v44 = vpop.f32.mrb[134].mxu1 }
 0xa52   :  { %v4336_v47 = vpack.c.bf16 %v7788_v44, %v7787_v37  ;;  %v4321_v43 = vpop.f32.mrb[135].mxu1  ;;  %7792 = vmatpush3.bf16.msra.mxu1 %v4334_v50 }
 0xa53   :  { %v4335_v46 = vpack.c.bf16 %v4321_v43, %v4318_v51 }
 0xa55   :  { %7793 = vmatprep.subr.bf16.mxu1 %v4335_v46 }
 0xa56   :  { %7794 = vmatpush3.bf16.msra.mxu1 %v4335_v46 }
 0xa57   :  { %7795 = vmatprep.subr.bf16.mxu1 %v4336_v47 }
 0xa5a   :  { %7796 = vmatpush3.bf16.msra.mxu1 %v4336_v47 }
 0xa5b   :  { %7817 = vmatprep.subr.bf16.mxu1 %v10812_v61 }
 0xa8c   :  { %v4182_v8 = vpop.xlane.xlu0 %4181 }
 0xa8d   :  { %8619 = vrcp.f32 %v4182_v8 }
 0xa8e   :  { %v4185_v28 = vpop.xlane.xlu1 %4184 }
 0xa8f   :  { %8621 = vrcp.f32 %v4185_v28 }
 0xa90   :  { %v4188_v52 = vpop.xlane.xlu0 %4187 }
 0xa91   :  { %8623 = vrcp.f32 %v4188_v52 }
 0xa92   :  { %v4191_v7 = vpop.xlane.xlu1 %4190 }
 0xa93   :  { %8625 = vrcp.f32 %v4191_v7 }
 0xa94   :  { %v4194_v36 = vpop.xlane.xlu0 %4193 }
 0xa95   :  { %8627 = vrcp.f32 %v4194_v36 }
 0xa96   :  { %v4197_v53 = vpop.xlane.xlu1 %4196 }
 0xa97   :  { %v8620_v14 = vpop.eup %8619  ;;  %8629 = vrcp.f32 %v4197_v53 }
 0xa98   :  { %v4200_v50 = vpop.xlane.xlu0 %4199  ;;  %v4244_v44 = vmul.f32 %v8620_v14, %v10897_v60 }
 0xa99   :  { %v8622_v37 = vpop.eup %8621  ;;  %8631 = vrcp.f32 %v4200_v50 }
 0xa9a   :  { %v4203_v51 = vpop.xlane.xlu1 %4202  ;;  %v4245_v47 = vmul.f32 %v8622_v37, %v10902_v3 }
 0xa9b   :  { %v8624_v43 = vpop.eup %8623  ;;  %8633 = vrcp.f32 %v4203_v51 }
 0xa9c   :  { %v4206_v46 = vpop.xlane.xlu0 %4205  ;;  %v4260_v8 = vpack.c.bf16 %v4245_v47, %v4244_v44  ;;  %v4246_v52 = vmul.f32 %v8624_v43, %v10907_v62 }
 0xa9d   :  { %v8626_v28 = vpop.eup %8625  ;;  %8635 = vrcp.f32 %v4206_v46 }
 0xa9e   :  { %v4247_v7 = vmul.f32 %v8626_v28, %v10912_v38  ;;  %7797 = vmatprep.mubr.msk.bf16.mxu1 %vm790_vm1, %v4260_v8  ;;  %v4209_v36 = vpop.xlane.xlu1 %4208 }
 0xa9f   :  { %v8628_v53 = vpop.eup %8627  ;;  %8637 = vrcp.f32 %v4209_v36 }
 0xaa0   :  { %v4261_v50 = vpack.c.bf16 %v4247_v7, %v4246_v52  ;;  %v4212_v31 = vpop.xlane.xlu0 %4211  ;;  %v4248_v14 = vmul.f32 %v8628_v53, %v10917_v5 }
 0xaa1   :  { %v8630_v60 = vpop.eup %8629  ;;  %8639 = vrcp.f32 %v4212_v31 }
 0xaa2   :  { %7798 = vmatmul.mubr.msk.bf16.vlgmr.msra.gmra.mrb[120].mxu1 %vm790_vm1, %v4261_v50  ;;  %v4215_v3 = vpop.xlane.xlu1 %4214  ;;  %v4249_v37 = vmul.f32 %v8630_v60, %v10922_v34 }
 0xaa3   :  { %v8632_v51 = vpop.eup %8631  ;;  %7818 = vmatpush3.bf16.msra.mxu1 %v10812_v61  ;;  %8641 = vrcp.f32 %v4215_v3 }
 0xaa4   :  { %7819 = vmatprep.subr.bf16.mxu1 %v10810_v40  ;;  %v4218_v62 = vpop.xlane.xlu0 %4217  ;;  %v4262_v38 = vpack.c.bf16 %v4249_v37, %v4248_v14  ;;  %v4250_v47 = vmul.f32 %v8632_v51, %v10927_v26  ;;  %v8845_v37 = vld [vmem:[%s11868_s2 + $0x40] sm:$0xff]  }
 0xaa5   :  { %v8634_v44 = vpop.eup %8633  ;;  %8643 = vrcp.f32 %v4218_v62 }
 0xaa6   :  { %7801 = vmatprep.mubr.msk.bf16.mxu1 %vm790_vm1, %v4262_v38  ;;  %v4221_v31 = vpop.xlane.xlu1 %4220  ;;  %v4251_v43 = vmul.f32 %v8634_v44, %v10932_v16 }
 0xaa7   :  { %v8636_v5 = vpop.eup %8635  ;;  %7820 = vmatpush3.bf16.msra.mxu1 %v10810_v40  ;;  %8645 = vrcp.f32 %v4221_v31 }
 0xaa8   :  { %7821 = vmatprep.subr.bf16.mxu1 %v10816_v58  ;;  %v4224_v61 = vpop.xlane.xlu0 %4223  ;;  %v4263_v34 = vpack.c.bf16 %v4251_v43, %v4250_v47  ;;  %v4252_v28 = vmul.f32 %v8636_v5, %v10937_v13  ;;  %v8846_v43 = vld [vmem:[%s11868_s2 + $0x48] sm:$0xff]  }
 0xaa9   :  { %v8638_v46 = vpop.eup %8637  ;;  %8647 = vrcp.f32 %v4224_v61 }
 0xaaa   :  { %7802 = vmatmul.mubr.msk.bf16.gmra.mrb[124].mxu1 %vm790_vm1, %v4263_v34  ;;  %v4227_v8 = vpop.xlane.xlu1 %4226  ;;  %v4253_v52 = vmul.f32 %v8638_v46, %v10942_v49 }
 0xaab   :  { %v8640_v26 = vpop.eup %8639  ;;  %7822 = vmatpush3.bf16.msra.mxu1 %v10816_v58  ;;  %8649 = vrcp.f32 %v4227_v8 }
 0xaac   :  { %7823 = vmatprep.subr.bf16.mxu1 %v10814_v23  ;;  %v4675_v40 = vpop.xlane.xlu0 %4674  ;;  %v4264_v16 = vpack.c.bf16 %v4253_v52, %v4252_v28  ;;  %v4254_v53 = vmul.f32 %v8640_v26, %v10946_v21 }
 0xaad   :  { %v8642_v7 = vpop.eup %8641  ;;  %v4721_v36 = vsub.f32 %v10820_v35, %v4675_v40 }
 0xaae   :  { %v4255_v50 = vmul.f32 %v8642_v7, %v10950_v27  ;;  %7825 = vmatprep.mubr.msk.bf16.mxu1 %vm790_vm1, %v4264_v16  ;;  %v4678_v13 = vpop.xlane.xlu1 %4677 }
 0xaaf   :  { %v8644_v60 = vpop.eup %8643  ;;  %v4737_v49 = vmul.f32 1.442695, %v4721_v36  ;;  %7824 = vmatpush3.bf16.msra.mxu1 %v10814_v23  ;;  %v4722_v58 = vsub.f32 %v10824_v45, %v4678_v13 }
 0xab0   :  { %v4265_v3 = vpack.c.bf16 %v4255_v50, %v4254_v53  ;;  %v4681_v14 = vpop.xlane.xlu0 %4680  ;;  %7857 = vmatprep.subr.bf16.mxu1 %v8845_v37  ;;  %v4256_v62 = vmul.f32 %v8644_v60, %v10954_v63 }
 0xab1   :  { %v8646_v35 = vpop.eup %8645  ;;  %8651 = vpow2.f32 %v4737_v49  ;;  %v4739_v21 = vmul.f32 1.442695, %v4722_v58  ;;  %v4723_v27 = vsub.f32 %v10818_v41, %v4681_v14 }
 0xab2   :  { %7826 = vmatmul.mubr.msk.bf16.vlgmr.msra.gmra.mrb[120].mxu1 %vm790_vm1, %v4265_v3  ;;  %v4684_v51 = vpop.xlane.xlu1 %4683  ;;  %v4257_v23 = vmul.f32 %v8646_v35, %v10958_v42 }
 0xab3   :  { %v8648_v45 = vpop.eup %8647  ;;  %8653 = vpow2.f32 %v4739_v21  ;;  %v4741_v38 = vmul.f32 1.442695, %v4723_v27  ;;  %v4724_v44 = vsub.f32 %v10822_v9, %v4684_v51  ;;  %7858 = vmatpush3.bf16.msra.mxu1 %v8845_v37  ;;  %v4697_v21 = vsel %vm790_vm1, %v10836_v57, -inf }
 0xab4   :  { %v4687_v31 = vpop.xlane.xlu0 %4686  ;;  %v4266_v47 = vpack.c.bf16 %v4257_v23, %v4256_v62  ;;  %7859 = vmatprep.subr.bf16.mxu1 %v8846_v43  ;;  %v4258_v61 = vmul.f32 %v8648_v45, %v10962_v39  ;;  %v4700_v27 = vsel %vm790_vm1, %v10840_v2, -inf  ;;  %v4703_v51 = vsel %vm790_vm1, %v10834_v33, -inf }
 0xab5   :  { %v8650_v41 = vpop.eup %8649  ;;  %8655 = vpow2.f32 %v4741_v38  ;;  %v4743_v5 = vmul.f32 1.442695, %v4724_v44  ;;  %v4725_v63 = vsub.f32 %v10828_v15, %v4687_v31  ;;  %v4706_v62 = vsel %vm790_vm1, %v10838_v18, -inf }
 0xab6   :  { %7829 = vmatprep.mubr.msk.bf16.mxu1 %vm790_vm1, %v4266_v47  ;;  %v4690_v42 = vpop.xlane.xlu1 %4689  ;;  %v4259_v9 = vmul.f32 %v8650_v41, %v10966_v30  ;;  %v4709_v23 = vsel %vm790_vm1, %v10844_v12, -inf  ;;  %v4712_v45 = vsel %vm790_vm1, %v10848_v55, -inf  ;;  %v4715_v38 = vsel %vm790_vm1, %v10842_v59, -inf }
 0xab7   :  { %8657 = vpow2.f32 %v4743_v5  ;;  %v4745_v34 = vmul.f32 1.442695, %v4725_v63  ;;  %v4726_v46 = vsub.f32 %v10832_v11, %v4690_v42  ;;  %7860 = vmatpush3.bf16.msra.mxu1 %v8846_v43  ;;  %v4718_v44 = vsel %vm790_vm1, %v10846_v19, -inf }
 0xab8   :  { %v4693_v8 = vpop.xlane.xlu0 %4692  ;;  %v4267_v28 = vpack.c.bf16 %v4259_v9, %v4258_v61 }
 0xab9   :  { %8659 = vpow2.f32 %v4745_v34  ;;  %v4747_v52 = vmul.f32 1.442695, %v4726_v46  ;;  %v4727_v26 = vsub.f32 %v10826_v6, %v4693_v8 }
 0xaba   :  { %7830 = vmatmul.mubr.msk.bf16.gmra.mrb[124].mxu1 %vm790_vm1, %v4267_v28  ;;  %v4696_v15 = vpop.xlane.xlu1 %4695 }
 0xabb   :  { %v11031_v40 = vpop.eup %8651  ;;  %8661 = vpow2.f32 %v4747_v52  ;;  %v4749_v39 = vmul.f32 1.442695, %v4727_v26  ;;  %v4728_v30 = vsub.f32 %v10830_v0, %v4696_v15  ;;  %7861 = vmatprep.mubr.msk.bf16.mxu1 %vm342_vm0, %v12031_v32 }
 0xabc   :  { %v4769_v11 = vsel %vm790_vm1, %v11031_v40, 0.0 }
 0xabd   :  { %v8654_v16 = vpop.eup %8653  ;;  %8663 = vpow2.f32 %v4749_v39  ;;  %v4751_v7 = vmul.f32 1.442695, %v4728_v30  ;;  %4770 = vadd.xlane.f32.xlu0 %v4769_v11 }
 0xabe   :  { %v4772_v6 = vsel %vm790_vm1, %v8654_v16, 0.0 }
 0xabf   :  { %v11039_v36 = vpop.eup %8655  ;;  %8665 = vpow2.f32 %v4751_v7  ;;  %4773 = vadd.xlane.f32.xlu1 %v4772_v6 }
 0xac0   :  { %v4775_v53 = vsel %vm790_vm1, %v11039_v36, 0.0 }
 0xac1   :  { %v8658_v0 = vpop.eup %8657  ;;  %4776 = vadd.xlane.f32.xlu0 %v4775_v53 }
 0xac2   :  { %7862 = vmatmul.mubr.msk.bf16.vlgmr.msra.gmra.mrb[136].mxu1 %vm342_vm0, %v12032_v48  ;;  %v4778_v50 = vsel %vm790_vm1, %v8658_v0, 0.0 }
 0xac3   :  { %v11046_v13 = vpop.eup %8659  ;;  %7865 = vmatprep.mubr.msk.bf16.mxu1 %vm342_vm0, %v12033_v17  ;;  %4779 = vadd.xlane.f32.xlu1 %v4778_v50 }
 0xac4   :  { %v4781_v60 = vsel %vm790_vm1, %v11046_v13, 0.0 }
 0xac5   :  { %v11052_v49 = vpop.eup %8661  ;;  %4782 = vadd.xlane.f32.xlu0 %v4781_v60 }
 0xac6   :  { %v4784_v58 = vsel %vm790_vm1, %v11052_v49, 0.0 }
 0xac7   :  { %v11056_v3 = vpop.eup %8663  ;;  %4785 = vadd.xlane.f32.xlu1 %v4784_v58 }
 0xac8   :  { %v4787_v14 = vsel %vm790_vm1, %v11056_v3, 0.0 }
 0xac9   :  { %v11060_v37 = vpop.eup %8665  ;;  %4788 = vadd.xlane.f32.xlu0 %v4787_v14 }
 0xaca   :  { %7866 = vmatmul.mubr.msk.bf16.gmra.mrb[140].mxu1 %vm342_vm0, %v12034_v29  ;;  %v4790_v35 = vsel %vm790_vm1, %v11060_v37, 0.0 }
 0xacb   :  { %4791 = vadd.xlane.f32.xlu1 %v4790_v35 }
 0xacd   :  { %4698 = vmax.xlane.f32.xlu0 %v4697_v21 }
 0xacf   :  { %4701 = vmax.xlane.f32.xlu1 %v4700_v27 }
 0xad1   :  { %4704 = vmax.xlane.f32.xlu0 %v4703_v51 }
 0xad3   :  { %4707 = vmax.xlane.f32.xlu1 %v4706_v62 }
 0xad5   :  { %4710 = vmax.xlane.f32.xlu0 %v4709_v23 }
 0xad7   :  { %4713 = vmax.xlane.f32.xlu1 %v4712_v45 }
 0xad9   :  { %4716 = vmax.xlane.f32.xlu0 %v4715_v38 }
 0xadb   :  { %4719 = vmax.xlane.f32.xlu1 %v4718_v44 }
 0xb4a   :  { %v4771_v31 = vpop.xlane.xlu0 %4770 }
 0xb4b   :  { %8667 = vrcp.f32 %v4771_v31 }
 0xb4c   :  { %v4774_v47 = vpop.xlane.xlu1 %4773 }
 0xb4d   :  { %8669 = vrcp.f32 %v4774_v47 }
 0xb4e   :  { %v4777_v43 = vpop.xlane.xlu0 %4776 }
 0xb4f   :  { %8671 = vrcp.f32 %v4777_v43 }
 0xb50   :  { %v4780_v41 = vpop.xlane.xlu1 %4779 }
 0xb51   :  { %8673 = vrcp.f32 %v4780_v41 }
 0xb52   :  { %v4783_v5 = vpop.xlane.xlu0 %4782 }
 0xb53   :  { %8675 = vrcp.f32 %v4783_v5 }
 0xb54   :  { %v4786_v63 = vpop.xlane.xlu1 %4785 }
 0xb55   :  { %v8668_v42 = vpop.eup %8667  ;;  %8677 = vrcp.f32 %v4786_v63 }
 0xb56   :  { %v4789_v61 = vpop.xlane.xlu0 %4788  ;;  %v4833_v46 = vmul.f32 %v8668_v42, %v11031_v40 }
 0xb57   :  { %v8670_v9 = vpop.eup %8669  ;;  %8679 = vrcp.f32 %v4789_v61 }
 0xb58   :  { %v4792_v34 = vpop.xlane.xlu1 %4791  ;;  %v4834_v8 = vmul.f32 %v8670_v9, %v8654_v16 }
 0xb59   :  { %v8672_v28 = vpop.eup %8671  ;;  %8681 = vrcp.f32 %v4792_v34 }
 0xb5a   :  { %v4699_v52 = vpop.xlane.xlu0 %4698  ;;  %v4849_v26 = vpack.c.bf16 %v4834_v8, %v4833_v46  ;;  %v11085_v30 = vmul.f32 %v8672_v28, %v11039_v36 }
 0xb5b   :  { %v8674_v15 = vpop.eup %8673  ;;  %v4729_v39 = vsub.f32 %v10836_v57, %v4699_v52 }
 0xb5c   :  { %v11087_v11 = vmul.f32 %v8674_v15, %v8658_v0  ;;  %7877 = vmatprep.mubr.msk.bf16.mxu1 %vm790_vm1, %v4849_v26  ;;  %v4702_v7 = vpop.xlane.xlu1 %4701 }
 0xb5d   :  { %v8676_v6 = vpop.eup %8675  ;;  %v4753_v53 = vmul.f32 1.442695, %v4729_v39  ;;  %v4730_v40 = vsub.f32 %v10840_v2, %v4702_v7  ;;  %v5262_v7 = vsel %vm790_vm1, %v10852_v1, -inf }
 0xb5e   :  { %v4850_v16 = vpack.c.bf16 %v11087_v11, %v11085_v30  ;;  %v4705_v50 = vpop.xlane.xlu0 %4704  ;;  %v11095_v0 = vmul.f32 %v8676_v6, %v11046_v13  ;;  %v5265_v6 = vsel %vm790_vm1, %v10856_v10, -inf }
 0xb5f   :  { %v8678_v60 = vpop.eup %8677  ;;  %8683 = vpow2.f32 %v4753_v53  ;;  %v4755_v58 = vmul.f32 1.442695, %v4730_v40  ;;  %v4731_v57 = vsub.f32 %v10834_v33, %v4705_v50  ;;  %v5268_v53 = vsel %vm790_vm1, %v10850_v22, -inf }
 0xb60   :  { %v4708_v36 = vpop.xlane.xlu1 %4707  ;;  %v11098_v14 = vmul.f32 %v8678_v60, %v11052_v49  ;;  %v5271_v40 = vsel %vm790_vm1, %v10854_v24, -inf  ;;  %v5274_v50 = vsel %vm790_vm1, %v10860_v54, -inf  ;;  %v5277_v60 = vsel %vm790_vm1, %v10864_v20, -inf }
 0xb61   :  { %v8680_v35 = vpop.eup %8679  ;;  %8685 = vpow2.f32 %v4755_v58  ;;  %v4757_v21 = vmul.f32 1.442695, %v4731_v57  ;;  %v4732_v2 = vsub.f32 %v10838_v18, %v4708_v36  ;;  %v5280_v58 = vsel %vm790_vm1, %v10858_v4, -inf  ;;  %v12058_v57 = vld [vmem:[#allocation35_spill] sm:$0xff] }
 0xb62   :  { %v4711_v27 = vpop.xlane.xlu0 %4710  ;;  %v4851_v51 = vpack.c.bf16 %v11098_v14, %v11095_v0  ;;  %v11105_v13 = vmul.f32 %v8680_v35, %v11056_v3  ;;  %v5283_v36 = vsel %vm790_vm1, %v12058_v57, -inf  ;;  %v12059_v35 = vld [vmem:[#allocation23_spill] sm:$0xff] }
 0xb63   :  { %v8682_v62 = vpop.eup %8681  ;;  %8687 = vpow2.f32 %v4757_v21  ;;  %v4759_v23 = vmul.f32 1.442695, %v4732_v2  ;;  %v4733_v33 = vsub.f32 %v10844_v12, %v4711_v27  ;;  %v5286_v21 = vsel %vm790_vm1, %v12059_v35, -inf  ;;  %v12060_v2 = vld [vmem:[#allocation37_spill] sm:$0xff] }
 0xb64   :  { %v4714_v45 = vpop.xlane.xlu1 %4713  ;;  %v11108_v49 = vmul.f32 %v8682_v62, %v11060_v37  ;;  %v5289_v27 = vsel %vm790_vm1, %v12060_v2, -inf  ;;  %v12061_v62 = vld [vmem:[#allocation26_spill] sm:$0xff] }
 0xb65   :  { %8689 = vpow2.f32 %v4759_v23  ;;  %v4761_v38 = vmul.f32 1.442695, %v4733_v33  ;;  %v4734_v18 = vsub.f32 %v10848_v55, %v4714_v45  ;;  %v5292_v23 = vsel %vm790_vm1, %v12061_v62, -inf  ;;  %v12062_v33 = vld [vmem:[#allocation38_spill] sm:$0xff] }
 0xb66   :  { %v4717_v44 = vpop.xlane.xlu0 %4716  ;;  %v4852_v31 = vpack.c.bf16 %v11108_v49, %v11105_v13  ;;  %v5295_v45 = vsel %vm790_vm1, %v12062_v33, -inf }
 0xb67   :  { %8691 = vpow2.f32 %v4761_v38  ;;  %v4763_v47 = vmul.f32 1.442695, %v4734_v18  ;;  %v4735_v43 = vsub.f32 %v10842_v59, %v4717_v44  ;;  %v12063_v38 = vld [vmem:[#allocation18_spill] sm:$0xff]  ;;  %v12064_v44 = vld [vmem:[#allocation17_spill] sm:$0xff] }
 0xb68   :  { %v4720_v12 = vpop.xlane.xlu1 %4719  ;;  %v5298_v18 = vsel %vm790_vm1, %v12063_v38, -inf }
 0xb69   :  { %v11114_v41 = vpop.eup %8683  ;;  %8693 = vpow2.f32 %v4763_v47  ;;  %v4765_v3 = vmul.f32 1.442695, %v4735_v43  ;;  %v4736_v37 = vsub.f32 %v10846_v19, %v4720_v12  ;;  %v5301_v47 = vsel %vm790_vm1, %v12064_v44, -inf  ;;  %v12065_v43 = vld [vmem:[#allocation14_spill] sm:$0xff] }
 0xb6a   :  { %v4793_v5 = vsel %vm790_vm1, %v11114_v41, 0.0  ;;  %v5304_v12 = vsel %vm790_vm1, %v12065_v43, -inf }
 0xb6b   :  { %v11119_v63 = vpop.eup %8685  ;;  %8695 = vpow2.f32 %v4765_v3  ;;  %v4767_v55 = vmul.f32 1.442695, %v4736_v37  ;;  %4794 = vadd.xlane.f32.xlu0 %v4793_v5  ;;  %v12066_v5 = vld [vmem:[#allocation16_spill] sm:$0xff] }
 0xb6c   :  { %v4796_v42 = vsel %vm790_vm1, %v11119_v63, 0.0 }
 0xb6d   :  { %v11123_v61 = vpop.eup %8687  ;;  %8697 = vpow2.f32 %v4767_v55  ;;  %4797 = vadd.xlane.f32.xlu1 %v4796_v42  ;;  %v5307_v55 = vsel %vm790_vm1, %v12066_v5, -inf }
 0xb6e   :  { %v4799_v59 = vsel %vm790_vm1, %v11123_v61, 0.0 }
 0xb6f   :  { %v11127_v9 = vpop.eup %8689  ;;  %4800 = vadd.xlane.f32.xlu0 %v4799_v59 }
 0xb70   :  { %v4802_v19 = vsel %vm790_vm1, %v11127_v9, 0.0 }
 0xb71   :  { %v11131_v34 = vpop.eup %8691  ;;  %4803 = vadd.xlane.f32.xlu1 %v4802_v19 }
 0xb72   :  { %v4805_v46 = vsel %vm790_vm1, %v11131_v34, 0.0 }
 0xb73   :  { %v11135_v8 = vpop.eup %8693  ;;  %4806 = vadd.xlane.f32.xlu0 %v4805_v46 }
 0xb74   :  { %v4808_v28 = vsel %vm790_vm1, %v11135_v8, 0.0 }
 0xb75   :  { %v11139_v52 = vpop.eup %8695  ;;  %4809 = vadd.xlane.f32.xlu1 %v4808_v28 }
 0xb76   :  { %v4811_v26 = vsel %vm790_vm1, %v11139_v52, 0.0 }
 0xb77   :  { %v11143_v15 = vpop.eup %8697  ;;  %4812 = vadd.xlane.f32.xlu0 %v4811_v26 }
 0xb78   :  { %v4814_v39 = vsel %vm790_vm1, %v11143_v15, 0.0 }
 0xb79   :  { %4815 = vadd.xlane.f32.xlu1 %v4814_v39 }
 0xb7b   :  { %5263 = vmax.xlane.f32.xlu0 %v5262_v7 }
 0xb7d   :  { %5266 = vmax.xlane.f32.xlu1 %v5265_v6 }
 0xb7f   :  { %5269 = vmax.xlane.f32.xlu0 %v5268_v53 }
 0xb81   :  { %5272 = vmax.xlane.f32.xlu1 %v5271_v40  ;;  %v8847_v40 = vld [vmem:[%s11868_s2 + $0x50] sm:$0xff]  }
 0xb83   :  { %5275 = vmax.xlane.f32.xlu0 %v5274_v50  ;;  %v8848_v50 = vld [vmem:[%s11868_s2 + $0x58] sm:$0xff]  }
 0xb85   :  { %5278 = vmax.xlane.f32.xlu1 %v5277_v60 }
 0xb87   :  { %5281 = vmax.xlane.f32.xlu0 %v5280_v58 }
 0xb89   :  { %5284 = vmax.xlane.f32.xlu1 %v5283_v36 }
 0xb8b   :  { %5287 = vmax.xlane.f32.xlu0 %v5286_v21 }
 0xb8d   :  { %5290 = vmax.xlane.f32.xlu1 %v5289_v27 }
 0xb8f   :  { %5293 = vmax.xlane.f32.xlu0 %v5292_v23 }
 0xb91   :  { %5296 = vmax.xlane.f32.xlu1 %v5295_v45 }
 0xb93   :  { %5299 = vmax.xlane.f32.xlu0 %v5298_v18 }
 0xb95   :  { %v7863_v3 = vpop.f32.mrb[136].mxu1  ;;  %5302 = vmax.xlane.f32.xlu1 %v5301_v47 }
 0xb96   :  { %v4891_v37 = vpop.f32.mrb[137].mxu1 }
 0xb97   :  { %5305 = vmax.xlane.f32.xlu0 %v5304_v12  ;;  %v7864_v42 = vpop.f32.mrb[138].mxu1 }
 0xb98   :  { %v4923_v59 = vpack.c.bf16 %v7864_v42, %v7863_v3  ;;  %v4894_v19 = vpop.f32.mrb[139].mxu1 }
 0xb99   :  { %v4922_v46 = vpack.c.bf16 %v4894_v19, %v4891_v37  ;;  %5308 = vmax.xlane.f32.xlu1 %v5307_v55 }
 0xb9b   :  { %7869 = vmatprep.subr.bf16.mxu1 %v4922_v46 }
 0xb9c   :  { %7870 = vmatpush3.bf16.msra.mxu1 %v4922_v46 }
 0xb9d   :  { %v7867_v28 = vpop.f32.mrb[140].mxu1  ;;  %7871 = vmatprep.subr.bf16.mxu1 %v4923_v59 }
 0xb9e   :  { %v4907_v26 = vpop.f32.mrb[141].mxu1 }
 0xb9f   :  { %v7868_v39 = vpop.f32.mrb[142].mxu1 }
 0xba0   :  { %v4925_v7 = vpack.c.bf16 %v7868_v39, %v7867_v28  ;;  %v4910_v6 = vpop.f32.mrb[143].mxu1  ;;  %7872 = vmatpush3.bf16.msra.mxu1 %v4923_v59 }
 0xba1   :  { %v4924_v53 = vpack.c.bf16 %v4910_v6, %v4907_v26 }
 0xba3   :  { %7873 = vmatprep.subr.bf16.mxu1 %v4924_v53 }
 0xba4   :  { %7874 = vmatpush3.bf16.msra.mxu1 %v4924_v53 }
 0xba5   :  { %7875 = vmatprep.subr.bf16.mxu1 %v4925_v7 }
 0xba8   :  { %7876 = vmatpush3.bf16.msra.mxu1 %v4925_v7 }
 0xba9   :  { %7885 = vmatprep.subr.bf16.mxu1 %v8847_v40 }
 0xbab   :  { %7878 = vmatmul.mubr.msk.bf16.vlgmr.msra.gmra.mrb[120].mxu1 %vm790_vm1, %v4850_v16 }
 0xbac   :  { %7881 = vmatprep.mubr.msk.bf16.mxu1 %vm790_vm1, %v4851_v51  ;;  %7886 = vmatpush3.bf16.msra.mxu1 %v8847_v40 }
 0xbad   :  { %7887 = vmatprep.subr.bf16.mxu1 %v8848_v50 }
 0xbb0   :  { %7888 = vmatpush3.bf16.msra.mxu1 %v8848_v50 }
 0xbb3   :  { %7882 = vmatmul.mubr.msk.bf16.gmra.mrb[124].mxu1 %vm790_vm1, %v4852_v31 }
 0xbb4   :  { %7889 = vmatprep.mubr.msk.bf16.mxu1 %vm342_vm0, %v12031_v32 }
 0xbbb   :  { %7890 = vmatmul.mubr.msk.bf16.vlgmr.msra.gmra.mrb[144].mxu1 %vm342_vm0, %v12032_v48 }
 0xbbc   :  { %7893 = vmatprep.mubr.msk.bf16.mxu1 %vm342_vm0, %v12033_v17 }
 0xbc3   :  { %7894 = vmatmul.mubr.msk.bf16.gmra.mrb[148].mxu1 %vm342_vm0, %v12034_v29 }
 0xbf8   :  { %v4795_v30 = vpop.xlane.xlu0 %4794 }
 0xbf9   :  { %8699 = vrcp.f32 %v4795_v30 }
 0xbfa   :  { %v4798_v11 = vpop.xlane.xlu1 %4797 }
 0xbfb   :  { %8701 = vrcp.f32 %v4798_v11 }
 0xbfc   :  { %v4801_v16 = vpop.xlane.xlu0 %4800 }
 0xbfd   :  { %8703 = vrcp.f32 %v4801_v16 }
 0xbfe   :  { %v4804_v0 = vpop.xlane.xlu1 %4803 }
 0xbff   :  { %8705 = vrcp.f32 %v4804_v0 }
 0xc00   :  { %v4807_v14 = vpop.xlane.xlu0 %4806 }
 0xc01   :  { %8707 = vrcp.f32 %v4807_v14 }
 0xc02   :  { %v4810_v51 = vpop.xlane.xlu1 %4809 }
 0xc03   :  { %v8700_v13 = vpop.eup %8699  ;;  %8709 = vrcp.f32 %v4810_v51 }
 0xc04   :  { %v4813_v49 = vpop.xlane.xlu0 %4812  ;;  %v4841_v58 = vmul.f32 %v8700_v13, %v11114_v41 }
 0xc05   :  { %v8702_v31 = vpop.eup %8701  ;;  %8711 = vrcp.f32 %v4813_v49 }
 0xc06   :  { %v4816_v60 = vpop.xlane.xlu1 %4815  ;;  %v4842_v36 = vmul.f32 %v8702_v31, %v11119_v63 }
 0xc07   :  { %v8704_v21 = vpop.eup %8703  ;;  %8713 = vrcp.f32 %v4816_v60 }
 0xc08   :  { %v5264_v27 = vpop.xlane.xlu0 %5263  ;;  %v4853_v23 = vpack.c.bf16 %v4842_v36, %v4841_v58  ;;  %v11209_v47 = vmul.f32 %v8704_v21, %v11123_v61 }
 0xc09   :  { %v8706_v45 = vpop.eup %8705  ;;  %v5310_v18 = vsub.f32 %v10852_v1, %v5264_v27 }
 0xc0a   :  { %v11212_v12 = vmul.f32 %v8706_v45, %v11127_v9  ;;  %7905 = vmatprep.mubr.msk.bf16.mxu1 %vm790_vm1, %v4853_v23  ;;  %v5267_v3 = vpop.xlane.xlu1 %5266 }
 0xc0b   :  { %v8708_v37 = vpop.eup %8707  ;;  %v5326_v41 = vmul.f32 1.442695, %v5310_v18  ;;  %v5311_v63 = vsub.f32 %v10856_v10, %v5267_v3 }
 0xc0c   :  { %v4854_v55 = vpack.c.bf16 %v11212_v12, %v11209_v47  ;;  %v5270_v42 = vpop.xlane.xlu0 %5269  ;;  %v11220_v9 = vmul.f32 %v8708_v37, %v11131_v34 }
 0xc0d   :  { %v8710_v59 = vpop.eup %8709  ;;  %8715 = vpow2.f32 %v5326_v41  ;;  %v5328_v1 = vmul.f32 1.442695, %v5311_v63  ;;  %v5312_v61 = vsub.f32 %v10850_v22, %v5270_v42 }
 0xc0e   :  { %v5273_v19 = vpop.xlane.xlu1 %5272  ;;  %v11223_v46 = vmul.f32 %v8710_v59, %v11135_v8 }
 0xc0f   :  { %v8712_v28 = vpop.eup %8711  ;;  %8717 = vpow2.f32 %v5328_v1  ;;  %v5330_v26 = vmul.f32 1.442695, %v5312_v61  ;;  %v5313_v10 = vsub.f32 %v10854_v24, %v5273_v19 }
 0xc10   :  { %v5276_v39 = vpop.xlane.xlu0 %5275  ;;  %v4855_v7 = vpack.c.bf16 %v11223_v46, %v11220_v9  ;;  %v11230_v34 = vmul.f32 %v8712_v28, %v11139_v52 }
 0xc11   :  { %v8714_v6 = vpop.eup %8713  ;;  %8719 = vpow2.f32 %v5330_v26  ;;  %v5332_v53 = vmul.f32 1.442695, %v5313_v10  ;;  %v5314_v22 = vsub.f32 %v10860_v54, %v5276_v39 }
 0xc12   :  { %v5279_v40 = vpop.xlane.xlu1 %5278  ;;  %v11233_v8 = vmul.f32 %v8714_v6, %v11143_v15 }
 0xc13   :  { %8721 = vpow2.f32 %v5332_v53  ;;  %v5334_v50 = vmul.f32 1.442695, %v5314_v22  ;;  %v5315_v24 = vsub.f32 %v10864_v20, %v5279_v40 }
 0xc14   :  { %v5282_v30 = vpop.xlane.xlu0 %5281  ;;  %v4856_v11 = vpack.c.bf16 %v11233_v8, %v11230_v34 }
 0xc15   :  { %8723 = vpow2.f32 %v5334_v50  ;;  %v5336_v16 = vmul.f32 1.442695, %v5315_v24  ;;  %v5316_v0 = vsub.f32 %v10858_v4, %v5282_v30 }
 0xc16   :  { %v5285_v54 = vpop.xlane.xlu1 %5284 }
 0xc17   :  { %v11239_v14 = vpop.eup %8715  ;;  %8725 = vpow2.f32 %v5336_v16  ;;  %v5338_v52 = vmul.f32 1.442695, %v5316_v0  ;;  %v5317_v15 = vsub.f32 %v12058_v57, %v5285_v54 }
 0xc18   :  { %v5288_v51 = vpop.xlane.xlu0 %5287  ;;  %v5358_v13 = vsel %vm790_vm1, %v11239_v14, 0.0 }
 0xc19   :  { %v11244_v20 = vpop.eup %8717  ;;  %8727 = vpow2.f32 %v5338_v52  ;;  %v5340_v49 = vmul.f32 1.442695, %v5317_v15  ;;  %v5318_v31 = vsub.f32 %v12059_v35, %v5288_v51  ;;  %5359 = vadd.xlane.f32.xlu0 %v5358_v13  ;;  %v12067_v52 = vld [vmem:[#allocation5_spill] sm:$0xff] }
 0xc1a   :  { %v5291_v60 = vpop.xlane.xlu1 %5290  ;;  %v5361_v4 = vsel %vm790_vm1, %v11244_v20, 0.0  ;;  %v5756_v15 = vsub.s32 1, %v12067_v52 }
 0xc1b   :  { %v11249_v58 = vpop.eup %8719  ;;  %8729 = vpow2.f32 %v5340_v49  ;;  %v5342_v36 = vmul.f32 1.442695, %v5318_v31  ;;  %v5319_v57 = vsub.f32 %v12060_v2, %v5291_v60  ;;  %5362 = vadd.xlane.f32.xlu1 %v5361_v4  ;;  %v11302_v31 = vld [vmem:[%s11870_s4] sm:$0xff] }
 0xc1c   :  { %v5294_v21 = vpop.xlane.xlu0 %5293  ;;  %v5364_v27 = vsel %vm790_vm1, %v11249_v58, 0.0  ;;  %v11307_v60 = vrot.slane %v11302_v31, %v5756_v15 }
 0xc1d   :  { %v11254_v23 = vpop.eup %8721  ;;  %8731 = vpow2.f32 %v5342_v36  ;;  %v5344_v35 = vmul.f32 1.442695, %v5319_v57  ;;  %v5320_v45 = vsub.f32 %v12061_v62, %v5294_v21  ;;  %5365 = vadd.xlane.f32.xlu0 %v5364_v27  ;;  %v12068_v27 = vld [vmem:[#allocation27_spill] sm:$0xff] }
 0xc1e   :  { %v5297_v18 = vpop.xlane.xlu1 %5296  ;;  %v5367_v3 = vsel %vm790_vm1, %v11254_v23, 0.0 }
 0xc1f   :  { %v11259_v37 = vpop.eup %8723  ;;  %8733 = vpow2.f32 %v5344_v35  ;;  %v5346_v2 = vmul.f32 1.442695, %v5320_v45  ;;  %v5321_v41 = vsub.f32 %v12062_v33, %v5297_v18  ;;  %5368 = vadd.xlane.f32.xlu1 %v5367_v3  ;;  %v11319_v35 = vadd.f32 %v11307_v60, %v12068_v27  ;;  %v12069_v3 = vld [vmem:[#allocation32_spill] sm:$0xff] }
 0xc20   :  { %v5300_v63 = vpop.xlane.xlu0 %5299  ;;  %v5370_v42 = vsel %vm790_vm1, %v11259_v37, 0.0 }
 0xc21   :  { %v11264_v59 = vpop.eup %8725  ;;  %8735 = vpow2.f32 %v5346_v2  ;;  %v5348_v62 = vmul.f32 1.442695, %v5321_v41  ;;  %v5322_v1 = vsub.f32 %v12063_v38, %v5300_v63  ;;  %5371 = vadd.xlane.f32.xlu0 %v5370_v42  ;;  %v11327_v2 = vadd.f32 %v11307_v60, %v12069_v3  ;;  %v12070_v63 = vld [vmem:[#allocation30_spill] sm:$0xff] }
 0xc22   :  { %v5303_v61 = vpop.xlane.xlu1 %5302  ;;  %v5373_v19 = vsel %vm790_vm1, %v11264_v59, 0.0  ;;  %v11333_v42 = vadd.f32 %v12070_v63, %v11307_v60 }
 0xc23   :  { %v11269_v28 = vpop.eup %8727  ;;  %8737 = vpow2.f32 %v5348_v62  ;;  %v5350_v33 = vmul.f32 1.442695, %v5322_v1  ;;  %v5323_v26 = vsub.f32 %v12064_v44, %v5303_v61  ;;  %5374 = vadd.xlane.f32.xlu1 %v5373_v19  ;;  %v5774_v62 = vsel %vm790_vm1, %v11319_v35, 0.0  ;;  %v12071_v1 = vld [vmem:[#allocation29_spill] sm:$0xff] }
 0xc24   :  { %v5306_v10 = vpop.xlane.xlu0 %5305  ;;  %v5376_v39 = vsel %vm790_vm1, %v11269_v28, 0.0  ;;  %v11339_v61 = vadd.f32 %v12071_v1, %v11307_v60  ;;  %v5777_v19 = vsel %vm790_vm1, %v11327_v2, 0.0 }
 0xc25   :  { %v11274_v6 = vpop.eup %8729  ;;  %8739 = vpow2.f32 %v5350_v33  ;;  %v5352_v38 = vmul.f32 1.442695, %v5323_v26  ;;  %v5324_v53 = vsub.f32 %v12065_v43, %v5306_v10  ;;  %5377 = vadd.xlane.f32.xlu0 %v5376_v39  ;;  %v12072_v33 = vld [vmem:[#allocation31_spill] sm:$0xff]  ;;  %v5780_v10 = vsel %vm790_vm1, %v11333_v42, 0.0  ;;  %v12073_v39 = vld [vmem:[#allocation36_spill] sm:$0xff] }
 0xc26   :  { %v5309_v22 = vpop.xlane.xlu1 %5308  ;;  %v5379_v40 = vsel %vm790_vm1, %v11274_v6, 0.0  ;;  %v11345_v26 = vadd.f32 %v11307_v60, %v12072_v33 }
 0xc27   :  { %v11279_v50 = vpop.eup %8731  ;;  %8741 = vpow2.f32 %v5352_v38  ;;  %v5354_v44 = vmul.f32 1.442695, %v5324_v53  ;;  %v5325_v24 = vsub.f32 %v12066_v5, %v5309_v22  ;;  %5380 = vadd.xlane.f32.xlu1 %v5379_v40  ;;  %v11351_v38 = vadd.f32 %v11307_v60, %v12073_v39  ;;  %v12074_v22 = vld [vmem:[#allocation34_spill] sm:$0xff] }
 0xc28   :  { %v5382_v30 = vsel %vm790_vm1, %v11279_v50, 0.0  ;;  %v5783_v53 = vsel %vm790_vm1, %v11339_v61, 0.0  ;;  %v11357_v40 = vadd.f32 %v12074_v22, %v11307_v60  ;;  %v8851_v39 = vld [vmem:[%s11868_s2 + $0x68] sm:$0xff]  }
 0xc29   :  { %v11284_v16 = vpop.eup %8733  ;;  %8743 = vpow2.f32 %v5354_v44  ;;  %v5356_v0 = vmul.f32 1.442695, %v5325_v24  ;;  %5383 = vadd.xlane.f32.xlu0 %v5382_v30  ;;  %v5786_v44 = vsel %vm790_vm1, %v11345_v26, 0.0  ;;  %v12075_v24 = vld [vmem:[#allocation33_spill] sm:$0xff] }
 0xc2a   :  { %v5385_v43 = vsel %vm790_vm1, %v11284_v16, 0.0  ;;  %v11363_v30 = vadd.f32 %v12075_v24, %v11307_v60 }
 0xc2b   :  { %v11288_v54 = vpop.eup %8735  ;;  %8745 = vpow2.f32 %v5356_v0  ;;  %5386 = vadd.xlane.f32.xlu1 %v5385_v43  ;;  %v5789_v0 = vsel %vm790_vm1, %v11351_v38, 0.0  ;;  %v5792_v43 = vsel %vm790_vm1, %v11357_v40, 0.0 }
 0xc2c   :  { %v5388_v5 = vsel %vm790_vm1, %v11288_v54, 0.0 }
 0xc2d   :  { %v11293_v51 = vpop.eup %8737  ;;  %5389 = vadd.xlane.f32.xlu0 %v5388_v5  ;;  %v5795_v5 = vsel %vm790_vm1, %v11363_v30, 0.0 }
 0xc2e   :  { %v5391_v13 = vsel %vm790_vm1, %v11293_v51, 0.0 }
 0xc2f   :  { %v11297_v49 = vpop.eup %8739  ;;  %5392 = vadd.xlane.f32.xlu1 %v5391_v13 }
 0xc30   :  { %v5394_v4 = vsel %vm790_vm1, %v11297_v49, 0.0 }
 0xc31   :  { %v11311_v36 = vpop.eup %8741  ;;  %5395 = vadd.xlane.f32.xlu0 %v5394_v4 }
 0xc32   :  { %v5397_v57 = vsel %vm790_vm1, %v11311_v36, 0.0 }
 0xc33   :  { %v11315_v21 = vpop.eup %8743  ;;  %5398 = vadd.xlane.f32.xlu1 %v5397_v57 }
 0xc34   :  { %v5400_v45 = vsel %vm790_vm1, %v11315_v21, 0.0 }
 0xc35   :  { %v11323_v18 = vpop.eup %8745  ;;  %5401 = vadd.xlane.f32.xlu0 %v5400_v45 }
 0xc36   :  { %v5403_v41 = vsel %vm790_vm1, %v11323_v18, 0.0 }
 0xc37   :  { %5404 = vadd.xlane.f32.xlu1 %v5403_v41 }
 0xc39   :  { %5775 = vadd.xlane.f32.xlu0 %v5774_v62 }
 0xc3b   :  { %5778 = vadd.xlane.f32.xlu1 %v5777_v19 }
 0xc3d   :  { %5781 = vadd.xlane.f32.xlu0 %v5780_v10  ;;  %v8850_v10 = vld [vmem:[%s11868_s2 + $0x60] sm:$0xff]  }
 0xc3f   :  { %5784 = vadd.xlane.f32.xlu1 %v5783_v53 }
 0xc41   :  { %5787 = vadd.xlane.f32.xlu0 %v5786_v44 }
 0xc43   :  { %5790 = vadd.xlane.f32.xlu1 %v5789_v0 }
 0xc45   :  { %5793 = vadd.xlane.f32.xlu0 %v5792_v43 }
 0xc47   :  { %5796 = vadd.xlane.f32.xlu1 %v5795_v5 }
 0xc8e   :  { %v7891_v13 = vpop.f32.mrb[144].mxu1 }
 0xc8f   :  { %v5045_v4 = vpop.f32.mrb[145].mxu1 }
 0xc90   :  { %v7892_v57 = vpop.f32.mrb[146].mxu1 }
 0xc91   :  { %v5077_v27 = vpack.c.bf16 %v7892_v57, %v7891_v13  ;;  %v5048_v45 = vpop.f32.mrb[147].mxu1 }
 0xc92   :  { %v5076_v3 = vpack.c.bf16 %v5048_v45, %v5045_v4 }
 0xc94   :  { %7897 = vmatprep.subr.bf16.mxu1 %v5076_v3 }
 0xc95   :  { %7898 = vmatpush3.bf16.msra.mxu1 %v5076_v3 }
 0xc96   :  { %v7895_v41 = vpop.f32.mrb[148].mxu1  ;;  %7899 = vmatprep.subr.bf16.mxu1 %v5077_v27 }
 0xc97   :  { %v5061_v63 = vpop.f32.mrb[149].mxu1 }
 0xc98   :  { %v7896_v62 = vpop.f32.mrb[150].mxu1 }
 0xc99   :  { %v5079_v1 = vpack.c.bf16 %v7896_v62, %v7895_v41  ;;  %v5064_v19 = vpop.f32.mrb[151].mxu1  ;;  %7900 = vmatpush3.bf16.msra.mxu1 %v5077_v27 }
 0xc9a   :  { %v5078_v33 = vpack.c.bf16 %v5064_v19, %v5061_v63 }
 0xc9c   :  { %7901 = vmatprep.subr.bf16.mxu1 %v5078_v33 }
 0xc9d   :  { %7902 = vmatpush3.bf16.msra.mxu1 %v5078_v33 }
 0xc9e   :  { %7903 = vmatprep.subr.bf16.mxu1 %v5079_v1 }
 0xca1   :  { %7904 = vmatpush3.bf16.msra.mxu1 %v5079_v1 }
 0xca2   :  { %7937 = vmatprep.subr.bf16.mxu1 %v8850_v10 }
 0xca4   :  { %7906 = vmatmul.mubr.msk.bf16.vlgmr.msra.gmra.mrb[120].mxu1 %vm790_vm1, %v4854_v55 }
 0xca5   :  { %7909 = vmatprep.mubr.msk.bf16.mxu1 %vm790_vm1, %v4855_v7  ;;  %7938 = vmatpush3.bf16.msra.mxu1 %v8850_v10 }
 0xca6   :  { %7939 = vmatprep.subr.bf16.mxu1 %v8851_v39  ;;  %v5360_v22 = vpop.xlane.xlu0 %5359 }
 0xca8   :  { %v5363_v53 = vpop.xlane.xlu1 %5362 }
 0xca9   :  { %7940 = vmatpush3.bf16.msra.mxu1 %v8851_v39  ;;  %8747 = vrcp.f32 %v5363_v53 }
 0xcaa   :  { %8749 = vrcp.f32 %v5360_v22 }
 0xcac   :  { %7910 = vmatmul.mubr.msk.bf16.gmra.mrb[124].mxu1 %vm790_vm1, %v4856_v11  ;;  %v5369_v7 = vpop.xlane.xlu1 %5368 }
 0xcad   :  { %7941 = vmatprep.mubr.msk.bf16.mxu1 %vm342_vm0, %v12031_v32  ;;  %v5366_v32 = vpop.xlane.xlu0 %5365  ;;  %8751 = vrcp.f32 %v5369_v7  ;;  %v12076_v7 = vld [vmem:[#allocation25_spill] sm:$0xff] }
 0xcb0   :  { %v5375_v34 = vpop.xlane.xlu1 %5374 }
 0xcb1   :  { %v5372_v8 = vpop.xlane.xlu0 %5371  ;;  %8753 = vrcp.f32 %v5375_v34 }
 0xcb2   :  { %8755 = vrcp.f32 %v5366_v32 }
 0xcb3   :  { %v8748_v47 = vpop.eup %8747  ;;  %8757 = vrcp.f32 %v5372_v8 }
 0xcb4   :  { %7942 = vmatmul.mubr.msk.bf16.vlgmr.msra.gmra.mrb[152].mxu1 %vm342_vm0, %v12032_v48  ;;  %v8750_v12 = vpop.eup %8749  ;;  %v5423_v55 = vmul.f32 %v8748_v47, %v11244_v20  ;;  %v5381_v11 = vpop.xlane.xlu1 %5380 }
 0xcb5   :  { %7945 = vmatprep.mubr.msk.bf16.mxu1 %vm342_vm0, %v12033_v17  ;;  %v5422_v9 = vmul.f32 %v8750_v12, %v11239_v14  ;;  %v5378_v44 = vpop.xlane.xlu0 %5377  ;;  %8759 = vrcp.f32 %v5381_v11 }
 0xcb7   :  { %v5438_v46 = vpack.c.bf16 %v5423_v55, %v5422_v9  ;;  %v8752_v41 = vpop.eup %8751 }
 0xcb8   :  { %v5387_v43 = vpop.xlane.xlu1 %5386  ;;  %v5425_v33 = vmul.f32 %v8752_v41, %v11254_v23 }
 0xcb9   :  { %8761 = vrcp.f32 %v5387_v43 }
 0xcba   :  { %8763 = vrcp.f32 %v5378_v44 }
 0xcbb   :  { %v8754_v62 = vpop.eup %8753 }
 0xcbc   :  { %7946 = vmatmul.mubr.msk.bf16.gmra.mrb[156].mxu1 %vm342_vm0, %v12034_v29  ;;  %v5384_v29 = vpop.xlane.xlu0 %5383  ;;  %v5393_v57 = vpop.xlane.xlu1 %5392  ;;  %v5427_v39 = vmul.f32 %v8754_v62, %v11264_v59 }
 0xcbd   :  { %7957 = vmatprep.mubr.msk.bf16.mxu1 %vm790_vm1, %v5438_v46  ;;  %8765 = vrcp.f32 %v5384_v29  ;;  %v8756_v1 = vpop.eup %8755 }
 0xcbe   :  { %v8758_v19 = vpop.eup %8757  ;;  %v5424_v53 = vmul.f32 %v8756_v1, %v11249_v58  ;;  %8767 = vrcp.f32 %v5393_v57 }
 0xcbf   :  { %v5426_v47 = vmul.f32 %v8758_v19, %v11259_v37  ;;  %v8760_v55 = vpop.eup %8759 }
 0xcc0   :  { %v5390_v63 = vpop.xlane.xlu0 %5389  ;;  %v5399_v10 = vpop.xlane.xlu1 %5398  ;;  %v5439_v12 = vpack.c.bf16 %v5425_v33, %v5424_v53  ;;  %v5429_v37 = vmul.f32 %v8760_v55, %v11274_v6 }
 0xcc1   :  { %8769 = vrcp.f32 %v5399_v10  ;;  %v5440_v9 = vpack.c.bf16 %v5427_v39, %v5426_v47 }
 0xcc2   :  { %8771 = vrcp.f32 %v5390_v63 }
 0xcc3   :  { %v8762_v46 = vpop.eup %8761 }
 0xcc4   :  { %v5396_v22 = vpop.xlane.xlu0 %5395  ;;  %v8764_v23 = vpop.eup %8763  ;;  %v5431_v32 = vmul.f32 %v8762_v46, %v11284_v16 }
 0xcc5   :  { %8773 = vrcp.f32 %v5396_v22  ;;  %v5405_v59 = vpop.xlane.xlu1 %5404  ;;  %v5428_v8 = vmul.f32 %v8764_v23, %v11269_v28 }
 0xcc6   :  { %8775 = vrcp.f32 %v5405_v59 }
 0xcc7   :  { %v8766_v58 = vpop.eup %8765 }
 0xcc8   :  { %v5402_v34 = vpop.xlane.xlu0 %5401  ;;  %v5430_v11 = vmul.f32 %v8766_v58, %v11279_v50 }
 0xcc9   :  { %8777 = vrcp.f32 %v5402_v34 }
 0xcca   :  { %v5442_v44 = vpack.c.bf16 %v5431_v32, %v5430_v11 }
 0xd87   :  { %v7943_v48 = vpop.f32.mrb[152].mxu1 }
 0xd88   :  { %v5480_v24 = vpop.f32.mrb[153].mxu1 }
 0xd89   :  { %v7944_v17 = vpop.f32.mrb[154].mxu1 }
 0xd8a   :  { %v5512_v0 = vpack.c.bf16 %v7944_v17, %v7943_v48  ;;  %v5483_v20 = vpop.f32.mrb[155].mxu1  ;;  %v5441_v48 = vpack.c.bf16 %v5429_v37, %v5428_v8  ;;  %v12077_v17 = vld [vmem:[#allocation28_spill] sm:$0xff] }
 0xd8b   :  { %v5511_v14 = vpack.c.bf16 %v5483_v20, %v5480_v24 }
 0xd8d   :  { %7949 = vmatprep.subr.bf16.mxu1 %v5511_v14 }
 0xd8e   :  { %7950 = vmatpush3.bf16.msra.mxu1 %v5511_v14 }
 0xd8f   :  { %v7947_v5 = vpop.f32.mrb[156].mxu1  ;;  %7951 = vmatprep.subr.bf16.mxu1 %v5512_v0 }
 0xd90   :  { %v5496_v13 = vpop.f32.mrb[157].mxu1 }
 0xd91   :  { %v7948_v4 = vpop.f32.mrb[158].mxu1 }
 0xd92   :  { %v5514_v27 = vpack.c.bf16 %v7948_v4, %v7947_v5  ;;  %v5499_v45 = vpop.f32.mrb[159].mxu1  ;;  %7952 = vmatpush3.bf16.msra.mxu1 %v5512_v0  ;;  %v5779_v4 = vpop.xlane.xlu1 %5778 }
 0xd93   :  { %v5513_v3 = vpack.c.bf16 %v5499_v45, %v5496_v13  ;;  %v5824_v53 = vmul.f32 0.015625, %v5779_v4 }
 0xd95   :  { %7953 = vmatprep.subr.bf16.mxu1 %v5513_v3  ;;  %v11464_v32 = vsub.f32 %v11327_v2, %v5824_v53 }
 0xd96   :  { %7954 = vmatpush3.bf16.msra.mxu1 %v5513_v3  ;;  %v5785_v19 = vpop.xlane.xlu1 %5784 }
 0xd97   :  { %7955 = vmatprep.subr.bf16.mxu1 %v5514_v27 }
 0xd9a   :  { %7956 = vmatpush3.bf16.msra.mxu1 %v5514_v27  ;;  %v5791_v37 = vpop.xlane.xlu1 %5790 }
 0xd9b   :  { %7977 = vmatprep.subr.bf16.mxu1 %v10884_v56 }
 0xd9d   :  { %7958 = vmatmul.mubr.msk.bf16.vlgmr.msra.gmra.mrb[120].mxu1 %vm790_vm1, %v5439_v12 }
 0xd9e   :  { %7961 = vmatprep.mubr.msk.bf16.mxu1 %vm790_vm1, %v5440_v9  ;;  %7978 = vmatpush3.bf16.msra.mxu1 %v10884_v56  ;;  %v8768_v56 = vpop.eup %8767 }
 0xd9f   :  { %7979 = vmatprep.subr.bf16.mxu1 %v12076_v7  ;;  %v8770_v24 = vpop.eup %8769  ;;  %v5433_v16 = vmul.f32 %v8768_v56, %v11293_v51 }
 0xda0   :  { %v8772_v6 = vpop.eup %8771  ;;  %v5435_v50 = vmul.f32 %v8770_v24, %v11311_v36 }
 0xda1   :  { %v8774_v28 = vpop.eup %8773  ;;  %v5432_v0 = vmul.f32 %v8772_v6, %v11288_v54  ;;  %v5776_v54 = vpop.xlane.xlu0 %5775 }
 0xda2   :  { %7980 = vmatpush3.bf16.msra.mxu1 %v12076_v7  ;;  %v5434_v20 = vmul.f32 %v8774_v28, %v11297_v49  ;;  %v8776_v43 = vpop.eup %8775  ;;  %v5823_v1 = vmul.f32 0.015625, %v5776_v54  ;;  %v5797_v28 = vpop.xlane.xlu1 %5796 }
 0xda3   :  { %7981 = vmatprep.subr.bf16.mxu1 %v10888_v25  ;;  %v5443_v14 = vpack.c.bf16 %v5433_v16, %v5432_v0  ;;  %v5437_v51 = vmul.f32 %v8776_v43, %v11323_v18 }
 0xda4   :  { %v5444_v29 = vpack.c.bf16 %v5435_v50, %v5434_v20  ;;  %v11453_v55 = vsub.f32 %v11319_v35, %v5823_v1  ;;  %v5826_v35 = vmul.f32 0.015625, %v5785_v19  ;;  %v5830_v20 = vmul.f32 0.015625, %v5797_v28  ;;  %v8250_v1 = vld [vmem:[%s11869_s3 + $0x34] ss:$8 sps:$4 sm:$0xff]   ;;  %v8248_v19 = vld [vmem:[%s11869_s3 + $0x30] ss:$8 sps:$4 sm:$0xff]  }
 0xda5   :  { %7962 = vmatmul.mubr.msk.bf16.gmra.mrb[124].mxu1 %vm790_vm1, %v5441_v48  ;;  %v5782_v18 = vpop.xlane.xlu0 %5781 }
 0xda6   :  { %7982 = vmatpush3.bf16.msra.mxu1 %v10888_v25  ;;  %7985 = vmatprep.mubr.msk.bf16.mxu1 %vm790_vm1, %v5442_v44  ;;  %v8778_v25 = vpop.eup %8777  ;;  %v5825_v23 = vmul.f32 0.015625, %v5782_v18  ;;  %v5855_v44 = vmul.f32 %v11453_v55, %v11453_v55  ;;  %v11479_v24 = vsub.f32 %v11339_v61, %v5826_v35  ;;  %v8247_v18 = vld [vmem:[%s11869_s3 + $0x24] ss:$8 sps:$4 sm:$0xff]  }
 0xda7   :  { %7983 = vmatprep.subr.bf16.mxu1 %v12077_v17  ;;  %v5436_v5 = vmul.f32 %v8778_v25, %v11315_v21 }
 0xda8   :  { %v11472_v11 = vsub.f32 %v11333_v42, %v5825_v23  ;;  %v5856_v42 = vmul.f32 %v11464_v32, %v11464_v32  ;;  %v5871_v50 = vsel %vm790_vm1, %v5855_v44, 0.0  ;;  %v5858_v43 = vmul.f32 %v11479_v24, %v11479_v24 }
 0xda9   :  { %v5445_v13 = vpack.c.bf16 %v5437_v51, %v5436_v5  ;;  %v5788_v9 = vpop.xlane.xlu0 %5787  ;;  %v11504_v51 = vsub.f32 %v11363_v30, %v5830_v20 }
 0xdaa   :  { %7984 = vmatpush3.bf16.msra.mxu1 %v12077_v17  ;;  %v5827_v48 = vmul.f32 0.015625, %v5788_v9  ;;  %v5857_v0 = vmul.f32 %v11472_v11, %v11472_v11 }
 0xdac   :  { %v11486_v16 = vsub.f32 %v11345_v26, %v5827_v48 }
 0xdad   :  { %7986 = vmatmul.mubr.msk.bf16.vlgmr.msra.gmra.mrb[120].mxu1 %vm790_vm1, %v5443_v14  ;;  %v5794_v2 = vpop.xlane.xlu0 %5793  ;;  %v5874_v14 = vsel %vm790_vm1, %v5856_v42, 0.0 }
 0xdae   :  { %7989 = vmatprep.mubr.msk.bf16.mxu1 %vm790_vm1, %v5444_v29  ;;  %v5829_v17 = vmul.f32 0.015625, %v5794_v2  ;;  %v5877_v29 = vsel %vm790_vm1, %v5857_v0, 0.0  ;;  %v5859_v25 = vmul.f32 %v11486_v16, %v11486_v16 }
 0xdb0   :  { %v11498_v26 = vsub.f32 %v11357_v40, %v5829_v17 }
 0xdb2   :  { %v5861_v40 = vmul.f32 %v11498_v26, %v11498_v26 }
 0xdb4   :  { %v5889_v30 = vsel %vm790_vm1, %v5861_v40, 0.0 }
 0xdb5   :  { %7990 = vmatmul.mubr.msk.bf16.gmra.mrb[124].mxu1 %vm790_vm1, %v5445_v13  ;;  %v5883_v13 = vsel %vm790_vm1, %v5859_v25, 0.0 }
 0xe80   :  { %v7987_v36 = vpop.f32.mrb[120].mxu1 }
 0xe81   :  { %v5715_v57 = vpop.f32.mrb[121].mxu1  ;;  %v11433_v3 = vadd.f32 %v7987_v36, %v11307_v60  ;;  %v5862_v36 = vmul.f32 %v11504_v51, %v11504_v51 }
 0xe82   :  { %v11430_v49 = vadd.f32 %v11307_v60, %v5715_v57  ;;  %v7988_v27 = vpop.f32.mrb[122].mxu1  ;;  %v8241_v57 = vld [vmem:[%s11869_s3 + $0x4] ss:$8 sps:$4 sm:$0xff]  }
 0xe83   :  { %v5718_v45 = vpop.f32.mrb[123].mxu1  ;;  %v11441_v63 = vadd.f32 %v7988_v27, %v11307_v60  ;;  %v5804_v10 = vsel %vm790_vm1, %v11433_v3, 0.0  ;;  %v5892_v4 = vsel %vm790_vm1, %v5862_v36, 0.0  ;;  %v8239_v27 = vld [vmem:[%s11869_s3] ss:$8 sps:$4 sm:$0xff]   ;;  %6115 = vmatprep.subr.bf16.mxu0 %v8241_v57 }
 0xe84   :  { %v11436_v41 = vadd.f32 %v11307_v60, %v5718_v45  ;;  %v5798_v21 = vsel %vm790_vm1, %v11430_v49, 0.0  ;;  %6116 = vmatpush1.bf16.msra.mxu0 %v8239_v27  ;;  %v8244_v45 = vld [vmem:[%s11869_s3 + $0x14] ss:$8 sps:$4 sm:$0xff]  }
 0xe85   :  { %5799 = vadd.xlane.f32.xlu0 %v5798_v21  ;;  %v5807_v12 = vsel %vm790_vm1, %v11441_v63, 0.0  ;;  %v8242_v21 = vld [vmem:[%s11869_s3 + $0x10] ss:$8 sps:$4 sm:$0xff]   ;;  %6117 = vmatprep.subr.bf16.mxu0 %v8244_v45 }
 0xe86   :  { %v5801_v62 = vsel %vm790_vm1, %v11436_v41, 0.0 }
 0xe87   :  { %5802 = vadd.xlane.f32.xlu1 %v5801_v62  ;;  %v8245_v62 = vld [vmem:[%s11869_s3 + $0x20] ss:$8 sps:$4 sm:$0xff]  }
 0xe88   :  { %v7991_v33 = vpop.f32.mrb[124].mxu1  ;;  %6118 = vmatpush1.bf16.msra.mxu0 %v8242_v21 }
 0xe89   :  { %5805 = vadd.xlane.f32.xlu0 %v5804_v10  ;;  %v5731_v39 = vpop.f32.mrb[125].mxu1  ;;  %v11456_v58 = vadd.f32 %v7991_v33, %v11307_v60  ;;  %6119 = vmatprep.subr.bf16.mxu0 %v8247_v18  ;;  %v8877_v33 = vmov 0  }
 0xe8a   :  { %v11448_v22 = vadd.f32 %v11307_v60, %v5731_v39  ;;  %v7992_v47 = vpop.f32.mrb[126].mxu1  ;;  %6147 = vmatprep.mubr.bf16.mxu0 %v8877_v33 }
 0xe8b   :  { %5808 = vadd.xlane.f32.xlu1 %v5807_v12  ;;  %v5734_v46 = vpop.f32.mrb[127].mxu1  ;;  %v11467_v34 = vadd.f32 %v7992_v47, %v11307_v60  ;;  %v5816_v56 = vsel %vm790_vm1, %v11456_v58, 0.0 }
 0xe8c   :  { %v11459_v59 = vadd.f32 %v11307_v60, %v5734_v46  ;;  %v5810_v7 = vsel %vm790_vm1, %v11448_v22, 0.0  ;;  %v5828_v60 = vmul.f32 0.015625, %v5791_v37  ;;  %6120 = vmatpush1.bf16.msra.mxu0 %v8245_v62 }
 0xe8d   :  { %5811 = vadd.xlane.f32.xlu0 %v5810_v7  ;;  %v5819_v6 = vsel %vm790_vm1, %v11467_v34, 0.0  ;;  %6121 = vmatprep.subr.bf16.mxu0 %v8250_v1 }
 0xe8e   :  { %v5813_v8 = vsel %vm790_vm1, %v11459_v59, 0.0  ;;  %v11492_v61 = vsub.f32 %v11351_v38, %v5828_v60  ;;  %v5880_v38 = vsel %vm790_vm1, %v5858_v43, 0.0 }
 0xe8f   :  { %5814 = vadd.xlane.f32.xlu1 %v5813_v8 }
 0xe90   :  { %v5860_v5 = vmul.f32 %v11492_v61, %v11492_v61  ;;  %6122 = vmatpush1.bf16.msra.mxu0 %v8248_v19 }
 0xe91   :  { %5817 = vadd.xlane.f32.xlu0 %v5816_v56 }
 0xe92   :  { %v5886_v54 = vsel %vm790_vm1, %v5860_v5, 0.0 }
 0xe93   :  { %5820 = vadd.xlane.f32.xlu1 %v5819_v6 }
 0xe95   :  { %5872 = vadd.xlane.f32.xlu0 %v5871_v50 }
 0xe97   :  { %5875 = vadd.xlane.f32.xlu1 %v5874_v14 }
 0xe99   :  { %5878 = vadd.xlane.f32.xlu0 %v5877_v29 }
 0xe9b   :  { %5881 = vadd.xlane.f32.xlu1 %v5880_v38 }
 0xe9d   :  { %5884 = vadd.xlane.f32.xlu0 %v5883_v13 }
 0xe9f   :  { %5887 = vadd.xlane.f32.xlu1 %v5886_v54 }
 0xea1   :  { %5890 = vadd.xlane.f32.xlu0 %v5889_v30 }
 0xea3   :  { %5893 = vadd.xlane.f32.xlu1 %v5892_v4 }
 0xf12   :  { %v5800_v10 = vpop.xlane.xlu0 %5799 }
 0xf13   :  { %v5831_v39 = vmul.f32 0.015625, %v5800_v10 }
 0xf14   :  { %v5803_v53 = vpop.xlane.xlu1 %5802 }
 0xf15   :  { %v11543_v47 = vsub.f32 %v11430_v49, %v5831_v39  ;;  %v5832_v12 = vmul.f32 0.015625, %v5803_v53  ;;  %v5985_v53 = vsub.s32 2, %v12067_v52 }
 0xf16   :  { %v5806_v9 = vpop.xlane.xlu0 %5805 }
 0xf17   :  { %v11546_v46 = vsub.f32 %v11436_v41, %v5832_v12  ;;  %v5833_v23 = vmul.f32 0.015625, %v5806_v9  ;;  %v5863_v7 = vmul.f32 %v11543_v47, %v11543_v47 }
 0xf18   :  { %v5809_v37 = vpop.xlane.xlu1 %5808 }
 0xf19   :  { %v11551_v35 = vsub.f32 %v11433_v3, %v5833_v23  ;;  %v5834_v8 = vmul.f32 0.015625, %v5809_v37  ;;  %v5895_v48 = vsel %vm790_vm1, %v5863_v7, 0.0  ;;  %v5864_v49 = vmul.f32 %v11546_v46, %v11546_v46 }
 0xf1a   :  { %5896 = vadd.xlane.f32.xlu0 %v5895_v48  ;;  %v5812_v56 = vpop.xlane.xlu0 %5811  ;;  %v11592_v37 = vrot.slane %v11302_v31, %v5985_v53  ;;  %v8254_v53 = vld [vmem:[%s11868_s2 + $0x88] sm:$0xff]  }
 0xf1b   :  { %v11557_v44 = vsub.f32 %v11441_v63, %v5834_v8  ;;  %v5835_v41 = vmul.f32 0.015625, %v5812_v56  ;;  %v5898_v2 = vsel %vm790_vm1, %v5864_v49, 0.0  ;;  %v5865_v60 = vmul.f32 %v11551_v35, %v11551_v35 }
 0xf1c   :  { %5899 = vadd.xlane.f32.xlu1 %v5898_v2  ;;  %v5815_v3 = vpop.xlane.xlu1 %5814  ;;  %v6005_v8 = vsub.s32 3, %v12067_v52 }
 0xf1d   :  { %v11563_v6 = vsub.f32 %v11448_v22, %v5835_v41  ;;  %v5836_v42 = vmul.f32 0.015625, %v5815_v3  ;;  %v5901_v28 = vsel %vm790_vm1, %v5865_v60, 0.0  ;;  %v5866_v17 = vmul.f32 %v11557_v44, %v11557_v44 }
 0xf1e   :  { %5902 = vadd.xlane.f32.xlu0 %v5901_v28  ;;  %v5818_v63 = vpop.xlane.xlu0 %5817 }
 0xf1f   :  { %v11569_v50 = vsub.f32 %v11459_v59, %v5836_v42  ;;  %v5837_v0 = vmul.f32 0.015625, %v5818_v63  ;;  %v5904_v20 = vsel %vm790_vm1, %v5866_v17, 0.0  ;;  %v5867_v14 = vmul.f32 %v11563_v6, %v11563_v6 }
 0xf20   :  { %5905 = vadd.xlane.f32.xlu1 %v5904_v20  ;;  %v5821_v22 = vpop.xlane.xlu1 %5820  ;;  %v11597_v42 = vrot.slane %v11302_v31, %v6005_v8  ;;  %v8259_v8 = vld [vmem:[%s11868_s2 + $0xe0] sm:$0xff]  }
 0xf21   :  { %v11575_v43 = vsub.f32 %v11456_v58, %v5837_v0  ;;  %v5838_v29 = vmul.f32 0.015625, %v5821_v22  ;;  %v5907_v25 = vsel %vm790_vm1, %v5867_v14, 0.0  ;;  %v5868_v38 = vmul.f32 %v11569_v50, %v11569_v50 }
 0xf22   :  { %5908 = vadd.xlane.f32.xlu0 %v5907_v25  ;;  %v5873_v59 = vpop.xlane.xlu0 %5872 }
 0xf23   :  { %v11581_v5 = vsub.f32 %v11467_v34, %v5838_v29  ;;  %v5919_v13 = vmul.f32 0.015625, %v5873_v59  ;;  %v5910_v40 = vsel %vm790_vm1, %v5868_v38, 0.0  ;;  %v5869_v54 = vmul.f32 %v11575_v43, %v11575_v43 }
 0xf24   :  { %5911 = vadd.xlane.f32.xlu1 %v5910_v40  ;;  %v5876_v58 = vpop.xlane.xlu1 %5875 }
 0xf25   :  { %v5935_v36 = vadd.f32 1e-05, %v5919_v13  ;;  %v5920_v30 = vmul.f32 0.015625, %v5876_v58  ;;  %v5913_v4 = vsel %vm790_vm1, %v5869_v54, 0.0  ;;  %v5870_v57 = vmul.f32 %v11581_v5, %v11581_v5 }
 0xf26   :  { %5914 = vadd.xlane.f32.xlu0 %v5913_v4  ;;  %v5879_v27 = vpop.xlane.xlu0 %5878 }
 0xf27   :  { %8779 = vrsqrt.f32 %v5935_v36  ;;  %v5936_v34 = vadd.f32 1e-05, %v5920_v30  ;;  %v5921_v45 = vmul.f32 0.015625, %v5879_v27  ;;  %v5916_v21 = vsel %vm790_vm1, %v5870_v57, 0.0 }
 0xf28   :  { %5917 = vadd.xlane.f32.xlu1 %v5916_v21  ;;  %v5882_v18 = vpop.xlane.xlu1 %5881 }
 0xf29   :  { %8781 = vrsqrt.f32 %v5936_v34  ;;  %v5937_v62 = vadd.f32 1e-05, %v5921_v45  ;;  %v5922_v1 = vmul.f32 0.015625, %v5882_v18 }
 0xf2a   :  { %v5885_v19 = vpop.xlane.xlu0 %5884 }
 0xf2b   :  { %8783 = vrsqrt.f32 %v5937_v62  ;;  %v5938_v10 = vadd.f32 1e-05, %v5922_v1  ;;  %v5923_v39 = vmul.f32 0.015625, %v5885_v19  ;;  %v8251_v19 = vld [vmem:[%s11868_s2 + $0xc0] sm:$0xff]  }
 0xf2c   :  { %v5888_v12 = vpop.xlane.xlu1 %5887  ;;  %7269 = vmatprep.subr.bf16.mxu1 %v8251_v19 }
 0xf2d   :  { %8785 = vrsqrt.f32 %v5938_v10  ;;  %v5924_v9 = vmul.f32 0.015625, %v5888_v12  ;;  %v5939_v23 = vadd.f32 1e-05, %v5923_v39  ;;  %v8252_v10 = vld [vmem:[%s11868_s2 + $0x80] sm:$0xff]   ;;  %v8253_v39 = vld [vmem:[%s11868_s2 + $0xc8] sm:$0xff]   ;;  %v8255_v12 = vld [vmem:[%s11868_s2 + $0xd0] sm:$0xff]  }
 0xf2e   :  { %v5891_v48 = vpop.xlane.xlu0 %5890  ;;  %7270 = vmatpush3.bf16.msra.mxu1 %v8252_v10 }
 0xf2f   :  { %v5940_v7 = vadd.f32 1e-05, %v5924_v9  ;;  %v5925_v3 = vmul.f32 0.015625, %v5891_v48  ;;  %7271 = vmatprep.subr.bf16.mxu1 %v8253_v39  ;;  %v8256_v9 = vld [vmem:[%s11868_s2 + $0x90] sm:$0xff]   ;;  %v8260_v48 = vld [vmem:[%s11868_s2 + $0xa0] sm:$0xff]  }
 0xf30   :  { %v5894_v49 = vpop.xlane.xlu1 %5893 }
 0xf31   :  { %v8780_v56 = vpop.eup %8779  ;;  %8787 = vrsqrt.f32 %v5940_v7  ;;  %v5926_v41 = vmul.f32 0.015625, %v5894_v49  ;;  %v5941_v22 = vadd.f32 1e-05, %v5925_v3  ;;  %v8258_v7 = vld [vmem:[%s11868_s2 + $0x98] sm:$0xff]   ;;  %v8261_v49 = vld [vmem:[%s11868_s2 + $0xe8] sm:$0xff]  }
 0xf32   :  { %v5967_v2 = vmul.f32 %v8780_v56, %v11453_v55  ;;  %8789 = vrsqrt.f32 %v5939_v23  ;;  %7272 = vmatpush3.bf16.msra.mxu1 %v8254_v53  ;;  %v8257_v23 = vld [vmem:[%s11868_s2 + $0xd8] sm:$0xff]   ;;  %v8262_v56 = vld [vmem:[%s11868_s2 + $0xa8] sm:$0xff]  }
 0xf33   :  { %v8782_v60 = vpop.eup %8781  ;;  %v5942_v0 = vadd.f32 1e-05, %v5926_v41  ;;  %7273 = vmatprep.subr.bf16.mxu1 %v8255_v12  ;;  %v8263_v41 = vld [vmem:[%s11868_s2 + $0xf0] sm:$0xff]   ;;  %v8266_v3 = vld [vmem:[%s11868_s2 + $0xb8] sm:$0xff]  }
 0xf34   :  { %v5987_v28 = vmul.f32 %v11592_v37, %v5967_v2  ;;  %v5968_v17 = vmul.f32 %v8782_v60, %v11464_v32  ;;  %v8264_v2 = vld [vmem:[%s11868_s2 + $0xb0] sm:$0xff]   ;;  %v8265_v60 = vld [vmem:[%s11868_s2 + $0xf8] sm:$0xff]  }
 0xf35   :  { %v8784_v63 = vpop.eup %8783  ;;  %8791 = vrsqrt.f32 %v5942_v0 }
 0xf36   :  { %v5988_v20 = vmul.f32 %v11592_v37, %v5968_v17  ;;  %v11603_v29 = vadd.f32 %v11597_v42, %v5987_v28  ;;  %v5969_v25 = vmul.f32 %v8784_v63, %v11472_v11  ;;  %8793 = vrsqrt.f32 %v5941_v22  ;;  %7274 = vmatpush3.bf16.msra.mxu1 %v8256_v9 }
 0xf37   :  { %v8786_v14 = vpop.eup %8785  ;;  %7275 = vmatprep.subr.bf16.mxu1 %v8257_v23 }
 0xf38   :  { %v11606_v55 = vadd.f32 %v11597_v42, %v5988_v20  ;;  %v5970_v31 = vmul.f32 %v8786_v14, %v11479_v24  ;;  %v5989_v13 = vmul.f32 %v11592_v37, %v5969_v25 }
 0xf3a   :  { %v6023_v32 = vpack.c.bf16 %v11606_v55, %v11603_v29  ;;  %v5990_v38 = vmul.f32 %v11592_v37, %v5970_v31  ;;  %v11622_v58 = vadd.f32 %v11597_v42, %v5989_v13  ;;  %7276 = vmatpush3.bf16.msra.mxu1 %v8258_v7 }
 0xf3b   :  { %v8788_v59 = vpop.eup %8787  ;;  %7277 = vmatprep.subr.bf16.mxu1 %v8259_v8 }
 0xf3c   :  { %6851 = vmatmul.mubr.msk.bf16.vlgmr.msra.gmra.mrb[160].mxu0 %vm790_vm1, %v6023_v32  ;;  %v8790_v40 = vpop.eup %8789  ;;  %v5972_v54 = vmul.f32 %v8788_v59, %v11492_v61  ;;  %v11618_v11 = vadd.f32 %v11597_v42, %v5990_v38 }
 0xf3d   :  { %6157 = vmatprep.mubr.bf16.mxu0 %v8877_v33  ;;  %v5971_v24 = vmul.f32 %v8790_v40, %v11486_v16 }
 0xf3e   :  { %v6024_v36 = vpack.c.bf16 %v11618_v11, %v11622_v58  ;;  %v5992_v30 = vmul.f32 %v11592_v37, %v5972_v54  ;;  %7278 = vmatpush3.bf16.msra.mxu1 %v8260_v48 }
 0xf3f   :  { %v8792_v4 = vpop.eup %8791  ;;  %v5991_v57 = vmul.f32 %v11592_v37, %v5971_v24  ;;  %7279 = vmatprep.subr.bf16.mxu1 %v8261_v49 }
 0xf40   :  { %v8794_v27 = vpop.eup %8793  ;;  %v5974_v61 = vmul.f32 %v8792_v4, %v11504_v51  ;;  %v11632_v16 = vadd.f32 %v11597_v42, %v5992_v30 }
 0xf41   :  { %v5973_v34 = vmul.f32 %v8794_v27, %v11498_v26  ;;  %v11636_v45 = vadd.f32 %v11597_v42, %v5991_v57 }
 0xf42   :  { %v5994_v18 = vmul.f32 %v11592_v37, %v5974_v61  ;;  %7280 = vmatpush3.bf16.msra.mxu1 %v8262_v56 }
 0xf43   :  { %v6025_v21 = vpack.c.bf16 %v11632_v16, %v11636_v45  ;;  %v5993_v62 = vmul.f32 %v11592_v37, %v5973_v34  ;;  %7281 = vmatprep.subr.bf16.mxu1 %v8263_v41 }
 0xf44   :  { %6852 = vmatmul.mubr.msk.bf16.gmra.mrb[164].mxu0 %vm790_vm1, %v6024_v36  ;;  %v11645_v51 = vadd.f32 %v11597_v42, %v5994_v18 }
 0xf45   :  { %6167 = vmatprep.mubr.bf16.mxu0 %v8877_v33  ;;  %v11648_v1 = vadd.f32 %v11597_v42, %v5993_v62 }
 0xf46   :  { %7282 = vmatpush3.bf16.msra.mxu1 %v8264_v2 }
 0xf47   :  { %v6026_v26 = vpack.c.bf16 %v11645_v51, %v11648_v1  ;;  %7283 = vmatprep.subr.bf16.mxu1 %v8265_v60 }
 0xf4a   :  { %7284 = vmatpush3.bf16.msra.mxu1 %v8266_v3 }
 0xf4c   :  { %6853 = vmatmul.mubr.msk.bf16.gmra.mrb[168].mxu0 %vm790_vm1, %v6025_v21 }
 0xf4d   :  { %6177 = vmatprep.mubr.bf16.mxu0 %v8877_v33 }
 0xf54   :  { %6854 = vmatmul.mubr.msk.bf16.gmra.mrb[172].mxu0 %vm790_vm1, %v6026_v26 }
 0xf55   :  { %6187 = vmatprep.mubr.bf16.mxu0 %v8877_v33 }
 0xfa7   :  { %v5897_v28 = vpop.xlane.xlu0 %5896 }
 0xfa8   :  { %v5927_v17 = vmul.f32 0.015625, %v5897_v28 }
 0xfa9   :  { %v5900_v63 = vpop.xlane.xlu1 %5899 }
 0xfaa   :  { %v5943_v0 = vadd.f32 1e-05, %v5927_v17  ;;  %v5928_v20 = vmul.f32 0.015625, %v5900_v63 }
 0xfab   :  { %v5903_v14 = vpop.xlane.xlu0 %5902 }
 0xfac   :  { %8795 = vrsqrt.f32 %v5943_v0  ;;  %v5944_v22 = vadd.f32 1e-05, %v5928_v20  ;;  %v5929_v25 = vmul.f32 0.015625, %v5903_v14 }
 0xfad   :  { %v5906_v31 = vpop.xlane.xlu1 %5905 }
 0xfae   :  { %8797 = vrsqrt.f32 %v5944_v22  ;;  %v5945_v32 = vadd.f32 1e-05, %v5929_v25  ;;  %v5930_v38 = vmul.f32 0.015625, %v5906_v31 }
 0xfaf   :  { %v5909_v59 = vpop.xlane.xlu0 %5908 }
 0xfb0   :  { %8799 = vrsqrt.f32 %v5945_v32  ;;  %v5946_v13 = vadd.f32 1e-05, %v5930_v38  ;;  %v5931_v40 = vmul.f32 0.015625, %v5909_v59  ;;  %v6039_v32 = vld [vmem:[%s11871_s5] sm:$0x3]  ;;  %v12078_v38 = vsub.s32 0, %v12067_v52 }
 0xfb1   :  { %v5912_v54 = vpop.xlane.xlu1 %5911 }
 0xfb2   :  { %8801 = vrsqrt.f32 %v5946_v13  ;;  %v5932_v24 = vmul.f32 0.015625, %v5912_v54  ;;  %v5947_v36 = vadd.f32 1e-05, %v5931_v40 }
 0xfb3   :  { %v5915_v4 = vpop.xlane.xlu0 %5914 }
 0xfb4   :  { %v5948_v30 = vadd.f32 1e-05, %v5932_v24  ;;  %v5933_v18 = vmul.f32 0.015625, %v5915_v4 }
 0xfb5   :  { %v5918_v57 = vpop.xlane.xlu1 %5917 }
 0xfb6   :  { %v8796_v27 = vpop.eup %8795  ;;  %8803 = vrsqrt.f32 %v5948_v30  ;;  %v5934_v61 = vmul.f32 0.015625, %v5918_v57  ;;  %v5949_v12 = vadd.f32 1e-05, %v5933_v18 }
 0xfb7   :  { %v5975_v34 = vmul.f32 %v8796_v27, %v11543_v47  ;;  %8805 = vrsqrt.f32 %v5947_v36 }
 0xfb8   :  { %v8798_v21 = vpop.eup %8797  ;;  %v5950_v10 = vadd.f32 1e-05, %v5934_v61 }
 0xfb9   :  { %v5976_v62 = vmul.f32 %v8798_v21, %v11546_v46  ;;  %v5995_v26 = vmul.f32 %v11592_v37, %v5975_v34 }
 0xfba   :  { %v8800_v19 = vpop.eup %8799  ;;  %8807 = vrsqrt.f32 %v5950_v10 }
 0xfbb   :  { %v5996_v39 = vmul.f32 %v11592_v37, %v5976_v62  ;;  %v5977_v9 = vmul.f32 %v8800_v19, %v11551_v35  ;;  %v11709_v7 = vadd.f32 %v11597_v42, %v5995_v26  ;;  %8809 = vrsqrt.f32 %v5949_v12 }
 0xfbc   :  { %v8802_v53 = vpop.eup %8801 }
 0xfbd   :  { %v5978_v23 = vmul.f32 %v8802_v53, %v11557_v44  ;;  %v11712_v47 = vadd.f32 %v11597_v42, %v5996_v39  ;;  %v5997_v35 = vmul.f32 %v11592_v37, %v5977_v9 }
 0xfbf   :  { %v6027_v46 = vpack.c.bf16 %v11712_v47, %v11709_v7  ;;  %v5998_v8 = vmul.f32 %v11592_v37, %v5978_v23  ;;  %v11726_v2 = vadd.f32 %v11597_v42, %v5997_v35 }
 0xfc0   :  { %v8804_v48 = vpop.eup %8803 }
 0xfc1   :  { %6855 = vmatmul.mubr.msk.bf16.gmra.mrb[176].mxu0 %vm790_vm1, %v6027_v46  ;;  %v8806_v49 = vpop.eup %8805  ;;  %v5980_v44 = vmul.f32 %v8804_v48, %v11569_v50  ;;  %v11722_v56 = vadd.f32 %v11597_v42, %v5998_v8 }
 0xfc2   :  { %6197 = vmatprep.mubr.bf16.mxu0 %v8877_v33  ;;  %v5979_v41 = vmul.f32 %v8806_v49, %v11563_v6 }
 0xfc3   :  { %v6028_v60 = vpack.c.bf16 %v11722_v56, %v11726_v2  ;;  %v6000_v3 = vmul.f32 %v11592_v37, %v5980_v44 }
 0xfc4   :  { %v8808_v28 = vpop.eup %8807  ;;  %v5999_v17 = vmul.f32 %v11592_v37, %v5979_v41 }
 0xfc5   :  { %v8810_v63 = vpop.eup %8809  ;;  %v5982_v50 = vmul.f32 %v8808_v28, %v11581_v5  ;;  %v11736_v6 = vadd.f32 %v11597_v42, %v6000_v3 }
 0xfc6   :  { %v5981_v0 = vmul.f32 %v8810_v63, %v11575_v43  ;;  %v11740_v20 = vadd.f32 %v11597_v42, %v5999_v17 }
 0xfc7   :  { %v6002_v22 = vmul.f32 %v11592_v37, %v5982_v50 }
 0xfc8   :  { %v6029_v14 = vpack.c.bf16 %v11736_v6, %v11740_v20  ;;  %v6001_v25 = vmul.f32 %v11592_v37, %v5981_v0  ;;  %v11762_v37 = vrot.slane %v6039_v32, %v12078_v38 }
 0xfc9   :  { %6856 = vmatmul.mubr.msk.bf16.gmra.mrb[180].mxu0 %vm790_vm1, %v6028_v60  ;;  %v11749_v5 = vadd.f32 %v11597_v42, %v6002_v22 }
 0xfca   :  { %6207 = vmatprep.mubr.bf16.mxu0 %v8877_v33  ;;  %v11752_v31 = vadd.f32 %v11597_v42, %v6001_v25 }
 0xfcc   :  { %v6030_v43 = vpack.c.bf16 %v11749_v5, %v11752_v31 }
 0xfd1   :  { %6857 = vmatmul.mubr.msk.bf16.gmra.mrb[184].mxu0 %vm790_vm1, %v6029_v14 }
 0xfd2   :  { %6217 = vmatprep.mubr.bf16.mxu0 %v8877_v33  ;;  %v11766_v33 = vrot.slane %v6039_v32, %v5756_v15 }
 0xfd9   :  { %6858 = vmatmul.mubr.msk.bf16.gmra.mrb[188].mxu0 %vm790_vm1, %v6030_v43 }
0x100f   :  { %v6149_v59 = vpop.f32.mrb[160].mxu0 }
0x1010   :  { %v6150_v42 = vadd.f32 %v6149_v59, %v11762_v37  ;;  %v6151_v13 = vpop.f32.mrb[161].mxu0 }
0x1011   :  { %v6152_v40 = vadd.f32 %v6151_v13, %v11766_v33  ;;  %v6153_v54 = vpop.f32.mrb[162].mxu0 }
0x1012   :  { %v6154_v24 = vadd.f32 %v6153_v54, %v11762_v37  ;;  %v6155_v36 = vpop.f32.mrb[163].mxu0  ;;  %v6228_v4 = vmax.f32 %v6150_v42, 0.0 }
0x1013   :  { %v6156_v30 = vadd.f32 %v6155_v36, %v11766_v33  ;;  %v6229_v27 = vmax.f32 %v6152_v40, 0.0 }
0x1014   :  { %v6230_v57 = vmax.f32 %v6154_v24, 0.0 }
0x1015   :  { %v6231_v61 = vmax.f32 %v6156_v30, 0.0 }
0x1016   :  { %v6260_v34 = vpack.c.bf16 %v6230_v57, %v6228_v4 }
0x1017   :  { %v6261_v21 = vpack.c.bf16 %v6231_v61, %v6229_v27  ;;  %v6159_v15 = vpop.f32.mrb[164].mxu0 }
0x1018   :  { %v6160_v18 = vadd.f32 %v6159_v15, %v11762_v37  ;;  %v6161_v62 = vpop.f32.mrb[165].mxu0 }
0x1019   :  { %v6162_v26 = vadd.f32 %v6161_v62, %v11766_v33  ;;  %v6163_v19 = vpop.f32.mrb[166].mxu0  ;;  %6440 = vmatprep.mubr.bf16.mxu1 %v6261_v21 }
0x101a   :  { %v6164_v10 = vadd.f32 %v6163_v19, %v11762_v37  ;;  %v6165_v39 = vpop.f32.mrb[167].mxu0  ;;  %6441 = vmatmul.mubr.bf16.vlgmr.msra.gmra.mrb[160].mxu1 %v6260_v34  ;;  %v6232_v12 = vmax.f32 %v6160_v18, 0.0 }
0x101b   :  { %v6166_v53 = vadd.f32 %v6165_v39, %v11766_v33  ;;  %v6233_v23 = vmax.f32 %v6162_v26, 0.0 }
0x101c   :  { %v6234_v9 = vmax.f32 %v6164_v10, 0.0 }
0x101d   :  { %v6235_v46 = vmax.f32 %v6166_v53, 0.0 }
0x101e   :  { %v6262_v8 = vpack.c.bf16 %v6234_v9, %v6232_v12 }
0x101f   :  { %v6263_v48 = vpack.c.bf16 %v6235_v46, %v6233_v23  ;;  %v6169_v35 = vpop.f32.mrb[168].mxu0 }
0x1020   :  { %v6170_v49 = vadd.f32 %v6169_v35, %v11762_v37  ;;  %v6171_v44 = vpop.f32.mrb[169].mxu0 }
0x1021   :  { %v6172_v41 = vadd.f32 %v6171_v44, %v11766_v33  ;;  %v6173_v60 = vpop.f32.mrb[170].mxu0  ;;  %6448 = vmatprep.mubr.bf16.mxu1 %v6263_v48 }
0x1022   :  { %v6174_v3 = vadd.f32 %v6173_v60, %v11762_v37  ;;  %v6175_v28 = vpop.f32.mrb[171].mxu0  ;;  %6449 = vmatmul.mubr.bf16.gmra.mrb[164].mxu1 %v6262_v8  ;;  %v6236_v63 = vmax.f32 %v6170_v49, 0.0 }
0x1023   :  { %v6176_v17 = vadd.f32 %v6175_v28, %v11766_v33  ;;  %v6237_v0 = vmax.f32 %v6172_v41, 0.0 }
0x1024   :  { %v6238_v50 = vmax.f32 %v6174_v3, 0.0 }
0x1025   :  { %v6239_v14 = vmax.f32 %v6176_v17, 0.0 }
0x1026   :  { %v6264_v22 = vpack.c.bf16 %v6238_v50, %v6236_v63 }
0x1027   :  { %v6265_v25 = vpack.c.bf16 %v6239_v14, %v6237_v0  ;;  %v6179_v43 = vpop.f32.mrb[172].mxu0 }
0x1028   :  { %v6180_v32 = vadd.f32 %v6179_v43, %v11762_v37  ;;  %v6181_v38 = vpop.f32.mrb[173].mxu0 }
0x1029   :  { %v6182_v59 = vadd.f32 %v6181_v38, %v11766_v33  ;;  %v6183_v42 = vpop.f32.mrb[174].mxu0  ;;  %6456 = vmatprep.mubr.bf16.mxu1 %v6265_v25 }
0x102a   :  { %v6184_v13 = vadd.f32 %v6183_v42, %v11762_v37  ;;  %v6185_v40 = vpop.f32.mrb[175].mxu0  ;;  %6457 = vmatmul.mubr.bf16.gmra.mrb[168].mxu1 %v6264_v22  ;;  %v6240_v24 = vmax.f32 %v6180_v32, 0.0 }
0x102b   :  { %v6186_v54 = vadd.f32 %v6185_v40, %v11766_v33  ;;  %v6241_v30 = vmax.f32 %v6182_v59, 0.0 }
0x102c   :  { %v6242_v36 = vmax.f32 %v6184_v13, 0.0 }
0x102d   :  { %v6243_v4 = vmax.f32 %v6186_v54, 0.0 }
0x102e   :  { %v6266_v57 = vpack.c.bf16 %v6242_v36, %v6240_v24 }
0x102f   :  { %v6267_v27 = vpack.c.bf16 %v6243_v4, %v6241_v30 }
0x1031   :  { %6464 = vmatprep.mubr.bf16.mxu1 %v6267_v27 }
0x1032   :  { %6465 = vmatmul.mubr.bf16.gmra.mrb[172].mxu1 %v6266_v57 }
0x1094   :  { %v6189_v61 = vpop.f32.mrb[176].mxu0 }
0x1095   :  { %v6190_v34 = vadd.f32 %v6189_v61, %v11762_v37  ;;  %v6191_v21 = vpop.f32.mrb[177].mxu0 }
0x1096   :  { %v6192_v15 = vadd.f32 %v6191_v21, %v11766_v33  ;;  %v6193_v18 = vpop.f32.mrb[178].mxu0 }
0x1097   :  { %v6194_v62 = vadd.f32 %v6193_v18, %v11762_v37  ;;  %v6195_v26 = vpop.f32.mrb[179].mxu0  ;;  %v6244_v10 = vmax.f32 %v6190_v34, 0.0 }
0x1098   :  { %v6196_v19 = vadd.f32 %v6195_v26, %v11766_v33  ;;  %v6245_v53 = vmax.f32 %v6192_v15, 0.0 }
0x1099   :  { %v6246_v39 = vmax.f32 %v6194_v62, 0.0 }
0x109a   :  { %v6247_v12 = vmax.f32 %v6196_v19, 0.0 }
0x109b   :  { %v6268_v9 = vpack.c.bf16 %v6246_v39, %v6244_v10 }
0x109c   :  { %v6269_v23 = vpack.c.bf16 %v6247_v12, %v6245_v53  ;;  %v6199_v46 = vpop.f32.mrb[180].mxu0  ;;  %v6310_v12 = vsub.s32 4, %v12067_v52 }
0x109d   :  { %v6200_v8 = vadd.f32 %v6199_v46, %v11762_v37  ;;  %v6201_v48 = vpop.f32.mrb[181].mxu0 }
0x109e   :  { %v6202_v35 = vadd.f32 %v6201_v48, %v11766_v33  ;;  %v6203_v49 = vpop.f32.mrb[182].mxu0  ;;  %6472 = vmatprep.mubr.bf16.mxu1 %v6269_v23  ;;  %v8852_v23 = vld [vmem:[%s11870_s4] sm:$0xff]  ;;  %s8878_s4 = smov [#allocation2]  }
0x109f   :  { %v6204_v44 = vadd.f32 %v6203_v49, %v11762_v37  ;;  %v6205_v41 = vpop.f32.mrb[183].mxu0  ;;  %6473 = vmatmul.mubr.bf16.gmra.mrb[176].mxu1 %v6268_v9  ;;  %v6248_v3 = vmax.f32 %v6200_v8, 0.0  ;;  %s6542_s15 = sshll.u32 %s8878_s4, 4  ;;  %s6543_s15 = int_to_ptr.vmem [resolvable:$true] %s6542_s15 }
0x10a0   :  { %v6206_v60 = vadd.f32 %v6205_v41, %v11766_v33  ;;  %v6249_v17 = vmax.f32 %v6202_v35, 0.0  ;;  %s8853_s16 = scalar_lea.vmem %s6543_s15, 2048  ;;  %p8858_p1 = scmp.lt.s32.totalorder %s6543_s15, %s6543_s15 }
0x10a1   :  { %v6250_v28 = vmax.f32 %v6204_v44, 0.0  ;;  %p8854_p0 = scmp.ne.s32.totalorder %s6543_s15, %s8853_s16  ;;  %p8859_p2 = scmp.lt.s32.totalorder %s8853_s16, %s8853_s16 }
0x10a2   :  { %v6251_v63 = vmax.f32 %v6206_v60, 0.0 }
0x10a3   :  { %v6270_v50 = vpack.c.bf16 %v6250_v28, %v6248_v3  ;;  %p8860_p3 = por %p8859_p2, %p8858_p1 }
0x10a4   :  { %v6271_v0 = vpack.c.bf16 %v6251_v63, %v6249_v17  ;;  %v6209_v14 = vpop.f32.mrb[184].mxu0 }
0x10a5   :  { %v6210_v22 = vadd.f32 %v6209_v14, %v11762_v37  ;;  %v6211_v25 = vpop.f32.mrb[185].mxu0  ;;  %p8861_p4 = pnand %p8860_p3, %p8854_p0 }
0x10a6   :  { %v6212_v43 = vadd.f32 %v6211_v25, %v11766_v33  ;;  %v6213_v32 = vpop.f32.mrb[186].mxu0  ;;  %6480 = vmatprep.mubr.bf16.mxu1 %v6271_v0 }
0x10a7   :  { %v6214_v38 = vadd.f32 %v6213_v32, %v11762_v37  ;;  %v6215_v59 = vpop.f32.mrb[187].mxu0  ;;  %6481 = vmatmul.mubr.bf16.gmra.mrb[180].mxu1 %v6270_v50  ;;  %v6252_v13 = vmax.f32 %v6210_v22, 0.0 }
0x10a8   :  { %v6216_v42 = vadd.f32 %v6215_v59, %v11766_v33  ;;  %v6253_v54 = vmax.f32 %v6212_v43, 0.0 }
0x10a9   :  { %v6254_v40 = vmax.f32 %v6214_v38, 0.0 }
0x10aa   :  { %v6255_v24 = vmax.f32 %v6216_v42, 0.0 }
0x10ab   :  { %v6272_v36 = vpack.c.bf16 %v6254_v40, %v6252_v13 }
0x10ac   :  { %v6273_v30 = vpack.c.bf16 %v6255_v24, %v6253_v54  ;;  %v6219_v4 = vpop.f32.mrb[188].mxu0 }
0x10ad   :  { %v6220_v57 = vadd.f32 %v6219_v4, %v11762_v37  ;;  %v6221_v27 = vpop.f32.mrb[189].mxu0 }
0x10ae   :  { %v6222_v61 = vadd.f32 %v6221_v27, %v11766_v33  ;;  %v6223_v34 = vpop.f32.mrb[190].mxu0  ;;  %6488 = vmatprep.mubr.bf16.mxu1 %v6273_v30 }
0x10af   :  { %v6224_v21 = vadd.f32 %v6223_v34, %v11762_v37  ;;  %v6225_v15 = vpop.f32.mrb[191].mxu0  ;;  %6489 = vmatmul.mubr.bf16.gmra.mrb[184].mxu1 %v6272_v36  ;;  %v6256_v62 = vmax.f32 %v6220_v57, 0.0  ;;  %v11804_v37 = vrot.slane %v8852_v23, %v6310_v12 }
0x10b0   :  { %v6226_v18 = vadd.f32 %v6225_v15, %v11766_v33  ;;  %v6257_v19 = vmax.f32 %v6222_v61, 0.0 }
0x10b1   :  { %v6258_v26 = vmax.f32 %v6224_v21, 0.0 }
0x10b2   :  { %v6259_v10 = vmax.f32 %v6226_v18, 0.0 }
0x10b3   :  { %v6274_v39 = vpack.c.bf16 %v6258_v26, %v6256_v62 }
0x10b4   :  { %v6275_v53 = vpack.c.bf16 %v6259_v10, %v6257_v19 }
0x10b6   :  { %6496 = vmatprep.mubr.bf16.mxu1 %v6275_v53 }
0x10b7   :  { %6497 = vmatmul.mubr.bf16.gmra.mrb[188].mxu1 %v6274_v39 }
0x10ed   :  { %v7285_v9 = vpop.f32.mrb[160].mxu1 }
0x10ee   :  { %v7286_v46 = vpop.f32.mrb[161].mxu1 }
0x10ef   :  { %v7287_v8 = vadd.f32 %v7286_v46, %v7285_v9  ;;  %v7288_v33 = vpop.f32.mrb[162].mxu1 }
0x10f0   :  { %v7289_v48 = vpop.f32.mrb[163].mxu1 }
0x10f1   :  { %v6443_v35 = vadd.f32 %v7287_v8, %v11804_v37  ;;  %v7290_v49 = vadd.f32 %v7289_v48, %v7288_v33 }
0x10f3   :  { %v6505_v44 = vadd.f32 %v6443_v35, %v11603_v29  ;;  %v6446_v41 = vadd.f32 %v7290_v49, %v11804_v37 }
0x10f5   :  { %6521 = vst.msk [vmem:[#allocation2] sm:$0xff] %vm790_vm1, %v6505_v44  ;;  %v6506_v52 = vadd.f32 %v6446_v41, %v11606_v55  ;;  %v7291_v60 = vpop.f32.mrb[164].mxu1 }
0x10f6   :  { %v7292_v3 = vpop.f32.mrb[165].mxu1 }
0x10f7   :  { %6522 = vst.msk [vmem:[#allocation2 + $0x8] sm:$0xff] %vm790_vm1, %v6506_v52  ;;  %v7293_v28 = vadd.f32 %v7292_v3, %v7291_v60  ;;  %v7294_v17 = vpop.f32.mrb[166].mxu1 }
0x10f8   :  { %v7295_v63 = vpop.f32.mrb[167].mxu1 }
0x10f9   :  { %v6451_v50 = vadd.f32 %v7293_v28, %v11804_v37  ;;  %v7296_v0 = vadd.f32 %v7295_v63, %v7294_v17 }
0x10fb   :  { %v6507_v14 = vadd.f32 %v6451_v50, %v11622_v58  ;;  %v6454_v29 = vadd.f32 %v7296_v0, %v11804_v37 }
0x10fd   :  { %6523 = vst.msk [vmem:[#allocation2 + $0x10] sm:$0xff] %vm790_vm1, %v6507_v14  ;;  %v6508_v22 = vadd.f32 %v6454_v29, %v11618_v11  ;;  %v7297_v25 = vpop.f32.mrb[168].mxu1 }
0x10fe   :  { %v7298_v55 = vpop.f32.mrb[169].mxu1 }
0x10ff   :  { %6524 = vst.msk [vmem:[#allocation2 + $0x18] sm:$0xff] %vm790_vm1, %v6508_v22  ;;  %v7299_v43 = vadd.f32 %v7298_v55, %v7297_v25  ;;  %v7300_v32 = vpop.f32.mrb[170].mxu1 }
0x1100   :  { %v7301_v38 = vpop.f32.mrb[171].mxu1 }
0x1101   :  { %v6459_v59 = vadd.f32 %v7299_v43, %v11804_v37  ;;  %v7302_v42 = vadd.f32 %v7301_v38, %v7300_v32 }
0x1103   :  { %v6509_v13 = vadd.f32 %v6459_v59, %v11636_v45  ;;  %v6462_v58 = vadd.f32 %v7302_v42, %v11804_v37 }
0x1105   :  { %6525 = vst.msk [vmem:[#allocation2 + $0x20] sm:$0xff] %vm790_vm1, %v6509_v13  ;;  %v6510_v40 = vadd.f32 %v6462_v58, %v11632_v16  ;;  %v7303_v54 = vpop.f32.mrb[172].mxu1 }
0x1106   :  { %v7304_v11 = vpop.f32.mrb[173].mxu1 }
0x1107   :  { %6526 = vst.msk [vmem:[#allocation2 + $0x28] sm:$0xff] %vm790_vm1, %v6510_v40  ;;  %v7305_v24 = vadd.f32 %v7304_v11, %v7303_v54  ;;  %v7306_v36 = vpop.f32.mrb[174].mxu1 }
0x1108   :  { %v7307_v30 = vpop.f32.mrb[175].mxu1 }
0x1109   :  { %v6467_v4 = vadd.f32 %v7305_v24, %v11804_v37  ;;  %v7308_v57 = vadd.f32 %v7307_v30, %v7306_v36 }
0x110b   :  { %v6511_v27 = vadd.f32 %v6467_v4, %v11648_v1  ;;  %v6470_v45 = vadd.f32 %v7308_v57, %v11804_v37 }
0x110d   :  { %6527 = vst.msk [vmem:[#allocation2 + $0x30] sm:$0xff] %vm790_vm1, %v6511_v27  ;;  %v6512_v61 = vadd.f32 %v6470_v45, %v11645_v51 }
0x110f   :  { %6528 = vst.msk [vmem:[#allocation2 + $0x38] sm:$0xff] %vm790_vm1, %v6512_v61 }
0x1172   :  { %v7309_v16 = vpop.f32.mrb[176].mxu1 }
0x1173   :  { %v7310_v34 = vpop.f32.mrb[177].mxu1 }
0x1174   :  { %v7311_v21 = vadd.f32 %v7310_v34, %v7309_v16  ;;  %v7312_v15 = vpop.f32.mrb[178].mxu1 }
0x1175   :  { %v7313_v18 = vpop.f32.mrb[179].mxu1 }
0x1176   :  { %v6475_v62 = vadd.f32 %v7311_v21, %v11804_v37  ;;  %v7314_v26 = vadd.f32 %v7313_v18, %v7312_v15 }
0x1178   :  { %v6513_v19 = vadd.f32 %v6475_v62, %v11709_v7  ;;  %v6478_v1 = vadd.f32 %v7314_v26, %v11804_v37 }
0x117a   :  { %6529 = vst.msk [vmem:[#allocation2 + $0x40] sm:$0xff] %vm790_vm1, %v6513_v19  ;;  %v6514_v10 = vadd.f32 %v6478_v1, %v11712_v47  ;;  %v7315_v39 = vpop.f32.mrb[180].mxu1 }
0x117b   :  { %v7316_v51 = vpop.f32.mrb[181].mxu1 }
0x117c   :  { %6530 = vst.msk [vmem:[#allocation2 + $0x48] sm:$0xff] %vm790_vm1, %v6514_v10  ;;  %v7317_v53 = vadd.f32 %v7316_v51, %v7315_v39  ;;  %v7318_v12 = vpop.f32.mrb[182].mxu1 }
0x117d   :  { %v7319_v9 = vpop.f32.mrb[183].mxu1 }
0x117e   :  { %v6483_v23 = vadd.f32 %v7317_v53, %v11804_v37  ;;  %v7320_v46 = vadd.f32 %v7319_v9, %v7318_v12 }
0x1180   :  { %v6515_v8 = vadd.f32 %v6483_v23, %v11726_v2  ;;  %v6486_v7 = vadd.f32 %v7320_v46, %v11804_v37 }
0x1182   :  { %6531 = vst.msk [vmem:[#allocation2 + $0x50] sm:$0xff] %vm790_vm1, %v6515_v8  ;;  %v6516_v33 = vadd.f32 %v6486_v7, %v11722_v56  ;;  %v7321_v48 = vpop.f32.mrb[184].mxu1 }
0x1183   :  { %v7322_v47 = vpop.f32.mrb[185].mxu1 }
0x1184   :  { %6532 = vst.msk [vmem:[#allocation2 + $0x58] sm:$0xff] %vm790_vm1, %v6516_v33  ;;  %v7323_v35 = vadd.f32 %v7322_v47, %v7321_v48  ;;  %v7324_v49 = vpop.f32.mrb[186].mxu1 }
0x1185   :  { %v7325_v44 = vpop.f32.mrb[187].mxu1 }
0x1186   :  { %v6491_v41 = vadd.f32 %v7323_v35, %v11804_v37  ;;  %v7326_v52 = vadd.f32 %v7325_v44, %v7324_v49 }
0x1188   :  { %v6517_v60 = vadd.f32 %v6491_v41, %v11740_v20  ;;  %v6494_v2 = vadd.f32 %v7326_v52, %v11804_v37 }
0x118a   :  { %6533 = vst.msk [vmem:[#allocation2 + $0x60] sm:$0xff] %vm790_vm1, %v6517_v60  ;;  %v6518_v3 = vadd.f32 %v6494_v2, %v11736_v6  ;;  %v7327_v28 = vpop.f32.mrb[188].mxu1 }
0x118b   :  { %v7328_v56 = vpop.f32.mrb[189].mxu1 }
0x118c   :  { %6534 = vst.msk [vmem:[#allocation2 + $0x68] sm:$0xff] %vm790_vm1, %v6518_v3  ;;  %v7329_v17 = vadd.f32 %v7328_v56, %v7327_v28  ;;  %v7330_v63 = vpop.f32.mrb[190].mxu1 }
0x118d   :  { %v7331_v50 = vpop.f32.mrb[191].mxu1 }
0x118e   :  { %v6499_v0 = vadd.f32 %v7329_v17, %v11804_v37  ;;  %v7332_v14 = vadd.f32 %v7331_v50, %v7330_v63 }
0x1190   :  { %v6519_v20 = vadd.f32 %v6499_v0, %v11752_v31  ;;  %v6502_v29 = vadd.f32 %v7332_v14, %v11804_v37 }
0x1192   :  { %6535 = vst.msk [vmem:[#allocation2 + $0x70] sm:$0xff] %vm790_vm1, %v6519_v20  ;;  %v6520_v6 = vadd.f32 %v6502_v29, %v11749_v5 }
0x1194   :  { %6536 = vst.msk [vmem:[#allocation2 + $0x78] sm:$0xff] %vm790_vm1, %v6520_v6 }
0x1195   :  { %8864 = shalt.err (!%p8861_p4)
}
0x1196   :  { %s8865_s19 = scalar_lea.hbm %s11872_s6, 2048 }
0x1197   :  { %p8866_p5 = scmp.ne.s32.totalorder %s11872_s6, %s8865_s19  ;;  %p8869_p6 = scmp.lt.u32.totalorder %s8865_s19, %s11872_s6 }
0x1199   :  { %p8871_p7 = pnand %p8869_p6, %p8866_p5 }
0x119b   :  { %8874 = shalt.err (!%p8871_p7)
}
0x119c   :  { %s8879_s24 = smov 128   ;;  %s8880_s25 = smov 8  }
0x119d   :  { %6548 = dma.vmem_to_hbm [thread:$0]  %s6543_s15, 2048, %s11872_s6, [#allocation3], %s8879_s24, %s8879_s24, %s8880_s25  }
0x119e   :  { %8875 = dma.done.wait [#allocation3], 2048  }
0x119f   :  { %8876 = vsyncadd [#allocation3], 4294965248 }
0x11a0   :  { %6552 = vsyncpa [#allocation3], 1 }

</bundles_post_ra>
